<compile_context>
chip_gen: v6e
topology: v6e:2x2x1
jax: 0.10.0
libtpu: 0.0.40
codegen_flags: <defaults>
</compile_context>

<pallas_src>
import jax
import jax.numpy as jnp
import numpy as np
from jax.experimental import pallas as pl
from jax.experimental.pallas import tpu as pltpu

HIDDEN = 20
OUT = 2
OUT_PAD = 8                                 # padded logits width (full-dim block)
BOARD_ROWS, BOARD_COLS = 6, 7
BOARD_ELEMS = BOARD_ROWS * BOARD_COLS       # 42
IN_FEATURES = 2 * BOARD_ELEMS               # 84
LANES = 128                                 # padded hidden feature width
DEFAULT_TB = 512                            # preferred batch tile (multiple of 8)
PRECISION = jax.lax.Precision.HIGHEST


def nn_kernel(bt_ref, w1_ref, wh_ref, b_ref, w5_ref, b5_ref, o_ref):
    bt = bt_ref[...].astype(jnp.float32)      # int8 boards -> f32, exact
    p1 = jnp.maximum(bt, 0.0)                 # relu(bt)
    p2 = jnp.maximum(-bt, 0.0)                # relu(-bt)

    # Layer 1: x = cat(p1, p2) folded into two dots against W1's row blocks.
    h = (jnp.dot(p1, w1_ref[0], precision=PRECISION,
                 preferred_element_type=jnp.float32)
         + jnp.dot(p2, w1_ref[1], precision=PRECISION,
                   preferred_element_type=jnp.float32)
         + b_ref[0:1, :])
    h = jnp.maximum(h, 0.0)

    # Hidden layers 2..4 (lane-padded 128x128 weights, rows >=20 are zero).
    for layer in range(3):
        h = jnp.maximum(
            jnp.dot(h, wh_ref[layer], precision=PRECISION,
                    preferred_element_type=jnp.float32)
            + b_ref[layer + 1:layer + 2, :],
            0.0)

    # Output layer: narrow (128, 8) weight -> only 8 lanes written back.
    o_ref[...] = (
        jnp.dot(h, w5_ref[...], precision=PRECISION,
                preferred_element_type=jnp.float32)
        + b5_ref[...])


def pack_params(params):
    """Pack (w,b) list into lane-dense slabs consumed by the kernel."""
    (w1, b1), (w2, b2), (w3, b3), (w4, b4), (w5, b5) = params

    def pad_to(w, rows, cols):
        return jnp.pad(w, ((0, rows - w.shape[0]), (0, cols - w.shape[1])))

    w1p = jnp.pad(w1, ((0, 0), (0, LANES - w1.shape[1])))            # (84, 128)
    w1_stack = jnp.stack([w1p[:BOARD_ELEMS], w1p[BOARD_ELEMS:]])     # (2, 42, 128)
    wh_stack = jnp.stack([pad_to(w, LANES, LANES) for w in (w2, w3, w4)])  # (3,128,128)
    w5p = pad_to(w5, LANES, OUT_PAD)                                 # (128, 8)

    biases = jnp.zeros((8, LANES), jnp.float32)
    for i, b in enumerate((b1, b2, b3, b4)):
        biases = biases.at[i, :b.shape[0]].set(b)
    b5p = jnp.zeros((1, OUT_PAD), jnp.float32).at[0, :OUT].set(b5)   # (1, 8)
    return w1_stack, wh_stack, biases, w5p, b5p


def _batch_tile(batch):
    """Large tile to amortize per-step overhead, but keep >=2 grid steps
    (so both v7x TensorCores get work) whenever the batch allows it."""
    if batch >= 2 * DEFAULT_TB:
        return DEFAULT_TB
    half = (batch + 1) // 2
    return max(8, ((half + 7) // 8) * 8)


def nn_forward(boards, packed):
    """boards: (B, 6, 7) array of {-1,0,+1}; returns logits of shape (B, 2)."""
    B = boards.shape[0]
    x = boards.reshape(B, BOARD_ELEMS).astype(jnp.int8)   # exact for {-1,0,+1}

    tb = _batch_tile(B)
    bp = ((B + tb - 1) // tb) * tb
    if bp != B:
        x = jnp.pad(x, ((0, bp - B), (0, 0)))

    w1_stack, wh_stack, biases, w5p, b5p = packed
    grid = (bp // tb,)

    out = pl.pallas_call(
        nn_kernel,
        out_shape=jax.ShapeDtypeStruct((bp, OUT_PAD), jnp.float32),
        grid_spec=pltpu.PrefetchScalarGridSpec(
            num_scalar_prefetch=0,
            grid=grid,
            in_specs=[
                pl.BlockSpec((tb, BOARD_ELEMS), lambda i: (i, 0)),        # boards (int8)
                pl.BlockSpec((2, BOARD_ELEMS, LANES), lambda i: (0, 0, 0)),  # W1 blocks
                pl.BlockSpec((3, LANES, LANES), lambda i: (0, 0, 0)),     # W2..W4
                pl.BlockSpec((8, LANES), lambda i: (0, 0)),               # b1..b4
                pl.BlockSpec((LANES, OUT_PAD), lambda i: (0, 0)),         # W5
                pl.BlockSpec((1, OUT_PAD), lambda i: (0, 0)),             # b5
            ],
            out_specs=pl.BlockSpec((tb, OUT_PAD), lambda i: (i, 0)),
        ),
        compiler_params=pltpu.CompilerParams(
            dimension_semantics=("parallel",)),
    )(x, w1_stack, wh_stack, biases, w5p, b5p)

    return out[:B, :OUT]


def nn_forward_ref(board, params):
    """Pure-JAX reference for one board, mirroring the PyTorch forward."""
    bt = board.astype(jnp.float32)
    p1 = (bt + jnp.abs(bt)) / 2
    p2 = jnp.abs(bt) - p1
    x = jnp.concatenate([p1, p2], axis=0).reshape(-1)   # (84,)
    h = x
    n_layers = len(params)
    for i, (w, b) in enumerate(params):
        h = jnp.dot(h, w, precision=PRECISION) + b
        if i < n_layers - 1:
            h = jnp.maximum(h, 0.0)
    return h


def init_params(key):
    """Deterministic PyTorch-style uniform(-1/sqrt(fan_in), 1/sqrt(fan_in)) init."""
    dims = [(IN_FEATURES, HIDDEN), (HIDDEN, HIDDEN), (HIDDEN, HIDDEN),
            (HIDDEN, HIDDEN), (HIDDEN, OUT)]
    params = []
    for fan_in, fan_out in dims:
        key, kw, kb = jax.random.split(key, 3)
        bound = 1.0 / float(np.sqrt(fan_in))
        w = jax.random.uniform(kw, (fan_in, fan_out), jnp.float32, -bound, bound)
        b = jax.random.uniform(kb, (fan_out,), jnp.float32, -bound, bound)
        params.append((w, b))
    return params


if __name__ == "__main__":
    key = jax.random.PRNGKey(0)
    kp, kb = jax.random.split(key)
    params = init_params(kp)
    packed = pack_params(params)

    # Batch of synthetic Connect-4 boards: entries in {-1, 0, +1}.
    BATCH = 256
    boards = jax.random.randint(
        kb, (BATCH, BOARD_ROWS, BOARD_COLS), -1, 2).astype(jnp.float32)

    logits = jax.block_until_ready(nn_forward(boards, packed))

    ref = jax.block_until_ready(
        jax.vmap(lambda b: nn_forward_ref(b, params))(boards))
    np.testing.assert_allclose(np.asarray(logits), np.asarray(ref),
                               rtol=1e-5, atol=1e-5)
    print("KERNEL_OK")
</pallas_src>

<mosaic_0001>
module attributes {stable_mosaic.version = 11 : i64} {
  func.func @nn_kernel(%arg0: i32, %arg1: memref<128x42xi8, #tpu.memory_space<vmem>>, %arg2: memref<2x42x128xf32, #tpu.memory_space<vmem>>, %arg3: memref<3x128x128xf32, #tpu.memory_space<vmem>>, %arg4: memref<8x128xf32, #tpu.memory_space<vmem>>, %arg5: memref<128x8xf32, #tpu.memory_space<vmem>>, %arg6: memref<1x8xf32, #tpu.memory_space<vmem>>, %arg7: memref<128x8xf32, #tpu.memory_space<vmem>>) attributes {dimension_semantics = [#tpu.dimension_semantics<parallel>], iteration_bounds = array<i64: 2>, scalar_prefetch = 0 : i64, scratch_operands = 0 : i64, tpu.core_type = #tpu.core_type<tc>, window_params = [{transform_indices = @transform_0, window_bounds = array<i64: 128, 42>}, {pipeline_mode = #tpu.pipeline_mode<synchronous>, transform_indices = @transform_1, window_bounds = array<i64: 2, 42, 128>}, {pipeline_mode = #tpu.pipeline_mode<synchronous>, transform_indices = @transform_2, window_bounds = array<i64: 3, 128, 128>}, {pipeline_mode = #tpu.pipeline_mode<synchronous>, transform_indices = @transform_3, window_bounds = array<i64: 8, 128>}, {pipeline_mode = #tpu.pipeline_mode<synchronous>, transform_indices = @transform_4, window_bounds = array<i64: 128, 8>}, {pipeline_mode = #tpu.pipeline_mode<synchronous>, transform_indices = @transform_5, window_bounds = array<i64: 1, 8>}, {transform_indices = @transform_6, window_bounds = array<i64: 128, 8>}]} {
    %c0 = arith.constant 0 : index
    %c0_0 = arith.constant 0 : index
    %0 = vector.load %arg1[%c0, %c0_0] : memref<128x42xi8, #tpu.memory_space<vmem>>, vector<128x42xi8>
    %1 = arith.sitofp %0 : vector<128x42xi8> to vector<128x42xf32>
    %cst = arith.constant 0.000000e+00 : f32
    %2 = vector.broadcast %cst : f32 to vector<128x42xf32>
    %3 = arith.maximumf %1, %2 : vector<128x42xf32>
    %cst_1 = arith.constant 0.000000e+00 : f32
    %4 = vector.broadcast %cst_1 : f32 to vector<128x42xf32>
    %5 = arith.subf %4, %1 : vector<128x42xf32>
    %cst_2 = arith.constant 0.000000e+00 : f32
    %6 = vector.broadcast %cst_2 : f32 to vector<128x42xf32>
    %7 = arith.maximumf %5, %6 : vector<128x42xf32>
    %c0_3 = arith.constant 0 : index
    %c0_4 = arith.constant 0 : index
    %c0_5 = arith.constant 0 : index
    %8 = vector.load %arg2[%c0_3, %c0_4, %c0_5] : memref<2x42x128xf32, #tpu.memory_space<vmem>>, vector<1x42x128xf32>
    %9 = vector.shape_cast %8 : vector<1x42x128xf32> to vector<42x128xf32>
    %cst_6 = arith.constant dense<0.000000e+00> : vector<128x128xf32>
    %10 = tpu.matmul %3, %9, %cst_6 {dimension_numbers = #tpu.dot_dimension_numbers<[1], [0], [0], [1], [0, 0, 1, 1], [], []>, precision = #tpu.contract_precision<fp32>} : vector<128x42xf32>, vector<42x128xf32>, vector<128x128xf32> -> vector<128x128xf32>
    %c1 = arith.constant 1 : index
    %c0_7 = arith.constant 0 : index
    %c0_8 = arith.constant 0 : index
    %11 = vector.load %arg2[%c1, %c0_7, %c0_8] : memref<2x42x128xf32, #tpu.memory_space<vmem>>, vector<1x42x128xf32>
    %12 = vector.shape_cast %11 : vector<1x42x128xf32> to vector<42x128xf32>
    %cst_9 = arith.constant dense<0.000000e+00> : vector<128x128xf32>
    %13 = tpu.matmul %7, %12, %cst_9 {dimension_numbers = #tpu.dot_dimension_numbers<[1], [0], [0], [1], [0, 0, 1, 1], [], []>, precision = #tpu.contract_precision<fp32>} : vector<128x42xf32>, vector<42x128xf32>, vector<128x128xf32> -> vector<128x128xf32>
    %14 = arith.addf %10, %13 : vector<128x128xf32>
    %c0_10 = arith.constant 0 : index
    %c0_11 = arith.constant 0 : index
    %15 = vector.load %arg4[%c0_10, %c0_11] : memref<8x128xf32, #tpu.memory_space<vmem>>, vector<1x128xf32>
    %16 = vector.broadcast %15 : vector<1x128xf32> to vector<128x128xf32>
    %17 = arith.addf %14, %16 : vector<128x128xf32>
    %cst_12 = arith.constant 0.000000e+00 : f32
    %18 = vector.broadcast %cst_12 : f32 to vector<128x128xf32>
    %19 = arith.maximumf %17, %18 : vector<128x128xf32>
    %c0_13 = arith.constant 0 : index
    %c0_14 = arith.constant 0 : index
    %c0_15 = arith.constant 0 : index
    %20 = vector.load %arg3[%c0_13, %c0_14, %c0_15] : memref<3x128x128xf32, #tpu.memory_space<vmem>>, vector<1x128x128xf32>
    %21 = vector.shape_cast %20 : vector<1x128x128xf32> to vector<128x128xf32>
    %cst_16 = arith.constant dense<0.000000e+00> : vector<128x128xf32>
    %22 = tpu.matmul %19, %21, %cst_16 {dimension_numbers = #tpu.dot_dimension_numbers<[1], [0], [0], [1], [0, 0, 1, 1], [], []>, precision = #tpu.contract_precision<fp32>} : vector<128x128xf32>, vector<128x128xf32>, vector<128x128xf32> -> vector<128x128xf32>
    %c1_17 = arith.constant 1 : index
    %c0_18 = arith.constant 0 : index
    %23 = vector.load %arg4[%c1_17, %c0_18] : memref<8x128xf32, #tpu.memory_space<vmem>>, vector<1x128xf32>
    %24 = vector.broadcast %23 : vector<1x128xf32> to vector<128x128xf32>
    %25 = arith.addf %22, %24 : vector<128x128xf32>
    %cst_19 = arith.constant 0.000000e+00 : f32
    %26 = vector.broadcast %cst_19 : f32 to vector<128x128xf32>
    %27 = arith.maximumf %25, %26 : vector<128x128xf32>
    %c1_20 = arith.constant 1 : index
    %c0_21 = arith.constant 0 : index
    %c0_22 = arith.constant 0 : index
    %28 = vector.load %arg3[%c1_20, %c0_21, %c0_22] : memref<3x128x128xf32, #tpu.memory_space<vmem>>, vector<1x128x128xf32>
    %29 = vector.shape_cast %28 : vector<1x128x128xf32> to vector<128x128xf32>
    %cst_23 = arith.constant dense<0.000000e+00> : vector<128x128xf32>
    %30 = tpu.matmul %27, %29, %cst_23 {dimension_numbers = #tpu.dot_dimension_numbers<[1], [0], [0], [1], [0, 0, 1, 1], [], []>, precision = #tpu.contract_precision<fp32>} : vector<128x128xf32>, vector<128x128xf32>, vector<128x128xf32> -> vector<128x128xf32>
    %c2 = arith.constant 2 : index
    %c0_24 = arith.constant 0 : index
    %31 = vector.load %arg4[%c2, %c0_24] : memref<8x128xf32, #tpu.memory_space<vmem>>, vector<1x128xf32>
    %32 = vector.broadcast %31 : vector<1x128xf32> to vector<128x128xf32>
    %33 = arith.addf %30, %32 : vector<128x128xf32>
    %cst_25 = arith.constant 0.000000e+00 : f32
    %34 = vector.broadcast %cst_25 : f32 to vector<128x128xf32>
    %35 = arith.maximumf %33, %34 : vector<128x128xf32>
    %c2_26 = arith.constant 2 : index
    %c0_27 = arith.constant 0 : index
    %c0_28 = arith.constant 0 : index
    %36 = vector.load %arg3[%c2_26, %c0_27, %c0_28] : memref<3x128x128xf32, #tpu.memory_space<vmem>>, vector<1x128x128xf32>
    %37 = vector.shape_cast %36 : vector<1x128x128xf32> to vector<128x128xf32>
    %cst_29 = arith.constant dense<0.000000e+00> : vector<128x128xf32>
    %38 = tpu.matmul %35, %37, %cst_29 {dimension_numbers = #tpu.dot_dimension_numbers<[1], [0], [0], [1], [0, 0, 1, 1], [], []>, precision = #tpu.contract_precision<fp32>} : vector<128x128xf32>, vector<128x128xf32>, vector<128x128xf32> -> vector<128x128xf32>
    %c3 = arith.constant 3 : index
    %c0_30 = arith.constant 0 : index
    %39 = vector.load %arg4[%c3, %c0_30] : memref<8x128xf32, #tpu.memory_space<vmem>>, vector<1x128xf32>
    %40 = vector.broadcast %39 : vector<1x128xf32> to vector<128x128xf32>
    %41 = arith.addf %38, %40 : vector<128x128xf32>
    %cst_31 = arith.constant 0.000000e+00 : f32
    %42 = vector.broadcast %cst_31 : f32 to vector<128x128xf32>
    %43 = arith.maximumf %41, %42 : vector<128x128xf32>
    %c0_32 = arith.constant 0 : index
    %c0_33 = arith.constant 0 : index
    %44 = vector.load %arg5[%c0_32, %c0_33] : memref<128x8xf32, #tpu.memory_space<vmem>>, vector<128x8xf32>
    %cst_34 = arith.constant dense<0.000000e+00> : vector<128x8xf32>
    %45 = tpu.matmul %43, %44, %cst_34 {dimension_numbers = #tpu.dot_dimension_numbers<[1], [0], [0], [1], [0, 0, 1, 1], [], []>, precision = #tpu.contract_precision<fp32>} : vector<128x128xf32>, vector<128x8xf32>, vector<128x8xf32> -> vector<128x8xf32>
    %c0_35 = arith.constant 0 : index
    %c0_36 = arith.constant 0 : index
    %46 = vector.load %arg6[%c0_35, %c0_36] : memref<1x8xf32, #tpu.memory_space<vmem>>, vector<1x8xf32>
    %47 = vector.broadcast %46 : vector<1x8xf32> to vector<128x8xf32>
    %48 = arith.addf %45, %47 : vector<128x8xf32>
    %c0_37 = arith.constant 0 : index
    %c0_38 = arith.constant 0 : index
    %49 = vector.load %arg7[%c0_37, %c0_38] : memref<128x8xf32, #tpu.memory_space<vmem>>, vector<128x8xf32>
    tpu.vector_store %arg7[%c0_37, %c0_38], %48 {strides = array<i32>} : memref<128x8xf32, #tpu.memory_space<vmem>>, vector<128x8xf32>,
    return
  }
  func.func @transform_0(%arg0: i32) -> (i32, i32) {
    %c0_i32 = arith.constant 0 : i32
    %c0_i32_0 = arith.constant 0 : i32
    return %arg0, %c0_i32 : i32, i32
  }
  func.func @transform_1(%arg0: i32) -> (i32, i32, i32) {
    %c0_i32 = arith.constant 0 : i32
    %c0_i32_0 = arith.constant 0 : i32
    %c0_i32_1 = arith.constant 0 : i32
    %c0_i32_2 = arith.constant 0 : i32
    return %c0_i32, %c0_i32_0, %c0_i32_1 : i32, i32, i32
  }
  func.func @transform_2(%arg0: i32) -> (i32, i32, i32) {
    %c0_i32 = arith.constant 0 : i32
    %c0_i32_0 = arith.constant 0 : i32
    %c0_i32_1 = arith.constant 0 : i32
    %c0_i32_2 = arith.constant 0 : i32
    return %c0_i32, %c0_i32_0, %c0_i32_1 : i32, i32, i32
  }
  func.func @transform_3(%arg0: i32) -> (i32, i32) {
    %c0_i32 = arith.constant 0 : i32
    %c0_i32_0 = arith.constant 0 : i32
    %c0_i32_1 = arith.constant 0 : i32
    return %c0_i32, %c0_i32_0 : i32, i32
  }
  func.func @transform_4(%arg0: i32) -> (i32, i32) {
    %c0_i32 = arith.constant 0 : i32
    %c0_i32_0 = arith.constant 0 : i32
    %c0_i32_1 = arith.constant 0 : i32
    return %c0_i32, %c0_i32_0 : i32, i32
  }
  func.func @transform_5(%arg0: i32) -> (i32, i32) {
    %c0_i32 = arith.constant 0 : i32
    %c0_i32_0 = arith.constant 0 : i32
    %c0_i32_1 = arith.constant 0 : i32
    return %c0_i32, %c0_i32_0 : i32, i32
  }
  func.func @transform_6(%arg0: i32) -> (i32, i32) {
    %c0_i32 = arith.constant 0 : i32
    %c0_i32_0 = arith.constant 0 : i32
    return %arg0, %c0_i32 : i32, i32
  }
}

</mosaic_0001>

<bundles_post_ra>
// kernel: tpu_custom_call.1
= control target key start
LH: loop header
LB: loop body
LE: loop exit
PB: predicated region body
PF: predicated region fallthrough
CT: control target
= control target key end

     0   :  { %s11071_s21 = smov 0   ;;  %s15619_s0 = inlined_call_operand.vmem [shape: s8[256,42], index: 0, kind: input, shape index: {}]   ;;  %s15620_s1 = inlined_call_operand.vmem [shape: f32[2,42,128], index: 1, kind: input, shape index: {}]   ;;  %s15621_s2 = inlined_call_operand.vmem [shape: f32[3,128,128], index: 2, kind: input, shape index: {}]   ;;  %s15622_s3 = inlined_call_operand.vmem [shape: f32[8,128], index: 3, kind: input, shape index: {}]   ;;  %s15623_s4 = inlined_call_operand.vmem [shape: f32[128,8], index: 4, kind: input, shape index: {}]   ;;  %s15624_s5 = inlined_call_operand.vmem [shape: f32[1,8], index: 5, kind: input, shape index: {}]   ;;  %s15625_s6 = inlined_call_operand.vmem [shape: f32[256,8], index: 6, kind: output, shape index: {}]  }
   0x1 LB: > { %s8158_s22 = sadd.s32 4294967295, %s11034_s21   ;;  %p8162_p0 = scmp.ge.s32.totalorder %s11034_s21, 1  ;;  %s11034_s21 = sphi %s11071_s21, %s16_s21  }
   0x2   : > { %p213_p1 = scmp.lt.s32.totalorder %s11034_s21, 3 }
   0x4   : > { %p214_p2 = pnand %p8162_p0, %p213_p1 }
   0x6   : > { %217 = sbr.rel (%p214_p2) target bundleno = 1653 (0x675), region = 44 }
   0xb   : > { %v8172_v0 = vld [vmem:[%s15620_s1 + $0x58] sm:$0x3]  ;;  %vm401_vm0 = vcmask 1041408   ;;  %v8171_v1 = vld [vmem:[%s15620_s1 + $0x50] sm:$0xff]  ;;  %v8170_v2 = vld [vmem:[%s15620_s1 + $0x48] sm:$0xff]  ;;  %s8163_s29 = sshll.u32 %s8158_s22, 2 }
   0xc   : > { %v403_v3 = vsel %vm401_vm0, %v8172_v0, 0  ;;  %v11091_v4 = vand.u32 4294901760, %v8171_v1  ;;  %v11093_v5 = vand.u32 4294901760, %v8170_v2  ;;  %v8169_v6 = vld [vmem:[%s15620_s1 + $0x40] sm:$0xff]  ;;  %v8168_v7 = vld [vmem:[%s15620_s1 + $0x38] sm:$0xff]  ;;  %v8167_v8 = vld [vmem:[%s15620_s1 + $0x30] sm:$0xff] }
   0xd   : > { %v11104_v9 = vand.u32 4294901760, %v403_v3  ;;  %v11106_v10 = vand.u32 4294901760, %v8169_v6  ;;  %v11108_v11 = vand.u32 4294901760, %v8168_v7  ;;  %v11110_v12 = vand.u32 4294901760, %v8167_v8  ;;  %p244_p3 = scmp.lt.s32.totalorder %s8163_s29, 7 }
   0xe   : > { %v11113_v13 = vsub.f32 %v8171_v1, %v11091_v4  ;;  %v11116_v14 = vsub.f32 %v8170_v2, %v11093_v5  ;;  %vm352_vm1 = vcmask 343040   ;;  %vm8085_vm2 = vcmask 64512  }
   0xf   : > { %9244 = vmatprep.subr.mxu0 %v11104_v9  ;;  %v11120_v15 = vsub.f32 %v403_v3, %v11104_v9  ;;  %v11123_v16 = vsub.f32 %v8169_v6, %v11106_v10  ;;  %v11126_v17 = vsub.f32 %v8168_v7, %v11108_v11  ;;  %v11129_v18 = vsub.f32 %v8167_v8, %v11110_v12  ;;  %s16653_s29 = smov (!%p244_p3, %s8163_s29), 7 }
  0x10   : > { %9245 = vmatpush3.msra.mxu0 %v11104_v9  ;;  %v11133_v19 = vand.u32 4294901760, %v11113_v13  ;;  %v11136_v20 = vand.u32 4294901760, %v11116_v14  ;;  %s8164_s12 = sshll.u32 %s16653_s29, 3 }
  0x11   : > { %v11139_v21 = vand.u32 4294901760, %v11120_v15  ;;  %9246 = vmatprep.subr.mxu0 %v11091_v4  ;;  %v11143_v22 = vand.u32 4294901760, %v11123_v16  ;;  %v11146_v23 = vand.u32 4294901760, %v11126_v17  ;;  %v11149_v24 = vand.u32 4294901760, %v11129_v18  ;;  %s11159_s15 = scalar_lea.vmem %s15619_s0, %s8164_s12  ;;  %s8165_s12 = sshll.u32 %s8158_s22, 4 }
  0x12   : > { %9247 = vmatpush3.msra.mxu0 %v11091_v4  ;;  %v667_v25 = vsub.f32 %v11113_v13, %v11133_v19  ;;  %v674_v26 = vsub.f32 %v11116_v14, %v11136_v20  ;;  %v255_v30 = vld [vmem:[%s11159_s15] sm:$0xff]  ;;  %v256_v35 = vld [vmem:[%s11159_s15 + $0x8] sm:$0xff]  ;;  %p250_p4 = scmp.lt.s32.totalorder %s8165_s12, 31 }
  0x13   : > { %v660_v27 = vsub.f32 %v11120_v15, %v11139_v21  ;;  %9248 = vmatprep.subr.mxu0 %v11093_v5  ;;  %v681_v28 = vsub.f32 %v11123_v16, %v11143_v22  ;;  %v688_v29 = vsub.f32 %v11126_v17, %v11146_v23  ;;  %v695_v32 = vsub.f32 %v11129_v18, %v11149_v24 }
  0x14   : > { %v668_v31 = vand.u32 4294901760, %v667_v25  ;;  %9249 = vmatpush3.msra.mxu0 %v11093_v5  ;;  %v259_v33 = vunpack.c.0.s8 %v255_v30  ;;  %v260_v34 = vunpack.c.1.s8 %v255_v30  ;;  %v675_v37 = vand.u32 4294901760, %v674_v26  ;;  %s16655_s12 = smov (!%p250_p4, %s8165_s12), 31 }
  0x15   : > { %v661_v36 = vand.u32 4294901760, %v660_v27  ;;  %9250 = vmatprep.subr.mxu0 %v11106_v10  ;;  %v682_v38 = vand.u32 4294901760, %v681_v28  ;;  %v689_v39 = vand.u32 4294901760, %v688_v29  ;;  %v261_v42 = vunpack.c.2.s8 %v255_v30  ;;  %s8166_s22 = sshll.u32 %s16655_s12, 3 }
  0x16   : > { %9251 = vmatpush3.msra.mxu0 %v11106_v10  ;;  %v11175_v40 = vcvt.s32.f32 %v259_v33  ;;  %v11177_v41 = vcvt.s32.f32 %v260_v34  ;;  %v262_v43 = vunpack.c.3.s8 %v255_v30  ;;  %v263_v44 = vunpack.c.0.s8 %v256_v35 }
  0x17   : > { %9280 = vmatprep.subr.mxu1 %v661_v36  ;;  %9252 = vmatprep.subr.mxu0 %v11108_v11  ;;  %v264_v45 = vunpack.c.1.s8 %v256_v35  ;;  %v265_v46 = vunpack.c.2.s8 %v256_v35  ;;  %v266_v47 = vunpack.c.3.s8 %v256_v35  ;;  %v696_v48 = vand.u32 4294901760, %v695_v32 }
  0x18   : > { %9281 = vmatpush3.msra.mxu1 %v661_v36  ;;  %9253 = vmatpush3.msra.mxu0 %v11108_v11  ;;  %v307_v49 = vsub.f32 0.0, %v11175_v40  ;;  %v308_v50 = vsub.f32 0.0, %v11177_v41  ;;  %v11183_v51 = vcvt.s32.f32 %v261_v42  ;;  %v11186_v52 = vcvt.s32.f32 %v262_v43 }
  0x19   : > { %9282 = vmatprep.subr.mxu1 %v668_v31  ;;  %9254 = vmatprep.subr.mxu0 %v11110_v12  ;;  %v11188_v53 = vcvt.s32.f32 %v263_v44  ;;  %v11190_v54 = vcvt.s32.f32 %v264_v45  ;;  %v11192_v55 = vcvt.s32.f32 %v265_v46  ;;  %v11196_v59 = vcvt.s32.f32 %v266_v47 }
  0x1a   : > { %9283 = vmatpush3.msra.mxu1 %v668_v31  ;;  %9255 = vmatpush3.msra.mxu0 %v11110_v12  ;;  %v323_v56 = vmax.f32 %v307_v49, 0.0  ;;  %v324_v57 = vmax.f32 %v308_v50, 0.0  ;;  %v309_v58 = vsub.f32 0.0, %v11183_v51  ;;  %v310_v60 = vsub.f32 0.0, %v11186_v52 }
  0x1b   : > { %9284 = vmatprep.subr.mxu1 %v675_v37  ;;  %9316 = vmatprep.subr.mxu0 %v11120_v15  ;;  %v311_v61 = vsub.f32 0.0, %v11188_v53  ;;  %v312_v62 = vsub.f32 0.0, %v11190_v54  ;;  %v313_v63 = vsub.f32 0.0, %v11192_v55  ;;  %v314_v3 = vsub.f32 0.0, %v11196_v59 }
  0x1c   : > { %9285 = vmatpush3.msra.mxu1 %v675_v37  ;;  %v354_v0 = vsel %vm352_vm1, %v323_v56, 0  ;;  %v357_v1 = vsel %vm352_vm1, %v324_v57, 0  ;;  %v325_v2 = vmax.f32 %v309_v58, 0.0  ;;  %v326_v8 = vmax.f32 %v310_v60, 0.0 }
  0x1d   : > { %9286 = vmatprep.subr.mxu1 %v682_v38  ;;  %v11206_v6 = vand.u32 4294901760, %v354_v0  ;;  %v11208_v7 = vand.u32 4294901760, %v357_v1  ;;  %v327_v25 = vmax.f32 %v311_v61, 0.0  ;;  %v328_v27 = vmax.f32 %v312_v62, 0.0  ;;  %v257_v62 = vld [vmem:[%s11159_s15 + $0x10] sm:$0xff] }
  0x1e   : > { %9287 = vmatpush3.msra.mxu1 %v682_v38  ;;  %v360_v26 = vsel %vm352_vm1, %v325_v2, 0  ;;  %v329_v28 = vmax.f32 %v313_v63, 0.0  ;;  %v330_v29 = vmax.f32 %v314_v3, 0.0  ;;  %v363_v33 = vsel %vm352_vm1, %v326_v8, 0 }
  0x1f   : > { %9288 = vmatprep.subr.mxu1 %v689_v39  ;;  %v11212_v30 = vsub.f32 %v354_v0, %v11206_v6  ;;  %9292 = vmatprep.mubr.f32.mxu1 %v11206_v6  ;;  %v11216_v31 = vsub.f32 %v357_v1, %v11208_v7  ;;  %v11218_v32 = vand.u32 4294901760, %v360_v26  ;;  %v11221_v34 = vand.u32 4294901760, %v363_v33 }
  0x20   : > { %9289 = vmatpush3.msra.mxu1 %v689_v39  ;;  %v366_v35 = vsel %vm352_vm1, %v327_v25, 0  ;;  %v369_v36 = vsel %vm352_vm1, %v328_v27, 0  ;;  %v372_v37 = vsel %vm352_vm1, %v329_v28, 0  ;;  %v375_v47 = vsel %vm352_vm1, %v330_v29, 0 }
  0x21   : > { %9290 = vmatprep.subr.mxu1 %v696_v48  ;;  %v15633_v38 = vand.u32 4294901760, %v11212_v30  ;;  %v15632_v42 = vand.u32 4294901760, %v11216_v31  ;;  %v11229_v43 = vsub.f32 %v360_v26, %v11218_v32  ;;  %v11231_v44 = vand.u32 4294901760, %v366_v35 }
  0x22   : > { %9291 = vmatpush3.msra.mxu1 %v696_v48  ;;  %v11234_v39 = vsub.f32 %v363_v33, %v11221_v34  ;;  %v11236_v45 = vand.u32 4294901760, %v369_v36  ;;  %v11238_v46 = vand.u32 4294901760, %v372_v37  ;;  %v11262_v61 = vand.u32 4294901760, %v375_v47 }
  0x23   : > { %v479_v49 = vsub.f32 %v11212_v30, %v15633_v38  ;;  %v489_v50 = vsub.f32 %v11216_v31, %v15632_v42  ;;  %9293 = vmatmul.mubr.f32.vlgmr.msra.gmra.mxu1 %v11208_v7  ;;  %9352 = vmatprep.subr.mxu1 %v11104_v9  ;;  %v15631_v48 = vand.u32 4294901760, %v11229_v43  ;;  %v11251_v56 = vsub.f32 %v366_v35, %v11231_v44 }
  0x24   : > { %16058 = vst [vmem:[#allocation2_spill] sm:$0xff] %v11236_v45  ;;  %16059 = vst [vmem:[#allocation3_spill] sm:$0xff] %v11238_v46  ;;  %9353 = vmatpush3.msra.mxu1 %v11104_v9  ;;  %9295 = vmatprep.mubr.f32.mxu1 %v11218_v32  ;;  %v15630_v57 = vand.u32 4294901760, %v11234_v39  ;;  %v11257_v58 = vsub.f32 %v369_v36, %v11236_v45  ;;  %v11260_v60 = vsub.f32 %v372_v37, %v11238_v46 }
  0x25   : > { %16060 = vst [vmem:[#allocation4_spill] sm:$0xff] %v11262_v61  ;;  %v480_v63 = vand.u32 4294901760, %v479_v49  ;;  %v490_v0 = vand.u32 4294901760, %v489_v50  ;;  %v499_v1 = vsub.f32 %v11229_v43, %v15631_v48  ;;  %v15628_v2 = vand.u32 4294901760, %v11251_v56  ;;  %9354 = vmatprep.subr.mxu1 %v11091_v4  ;;  %v258_v49 = vld [vmem:[%s11159_s15 + $0x18] sm:$0xff]  ;;  %s15532_s15 = scalar_lea.vmem %s15625_s6, %s8166_s22 }
  0x26   : > { %v509_v3 = vsub.f32 %v11234_v39, %v15630_v57  ;;  %v15626_v8 = vand.u32 4294901760, %v11257_v58  ;;  %9355 = vmatpush3.msra.mxu1 %v11091_v4  ;;  %v15627_v25 = vand.u32 4294901760, %v11260_v60  ;;  %v11277_v26 = vsub.f32 %v375_v47, %v11262_v61 }
  0x27   : > { %9256 = vmatprep.mubr.f32.mxu0 %v480_v63  ;;  %v500_v27 = vand.u32 4294901760, %v499_v1  ;;  %9296 = vmatmul.mubr.f32.gmra.mxu1 %v11221_v34  ;;  %v519_v28 = vsub.f32 %v11251_v56, %v15628_v2  ;;  %v267_v29 = vunpack.c.0.s8 %v257_v62  ;;  %v268_v33 = vunpack.c.1.s8 %v257_v62 }
  0x28   : > { %9257 = vmatmul.mubr.f32.vlgmr.msra.gmra.mxu0 %v490_v0  ;;  %v510_v35 = vand.u32 4294901760, %v509_v3  ;;  %9298 = vmatprep.mubr.f32.mxu1 %v11231_v44  ;;  %v529_v36 = vsub.f32 %v11257_v58, %v15626_v8  ;;  %v539_v37 = vsub.f32 %v11260_v60, %v15627_v25  ;;  %v15629_v47 = vand.u32 4294901760, %v11277_v26 }
  0x29   : > { %9317 = vmatpush3.msra.mxu0 %v11120_v15  ;;  %9259 = vmatprep.mubr.f32.mxu0 %v500_v27  ;;  %v520_v50 = vand.u32 4294901760, %v519_v28  ;;  %v11293_v63 = vcvt.s32.f32 %v267_v29  ;;  %v11295_v0 = vcvt.s32.f32 %v268_v33  ;;  %v269_v1 = vunpack.c.2.s8 %v257_v62 }
  0x2a   : > { %9318 = vmatprep.subr.mxu0 %v11113_v13  ;;  %v530_v3 = vand.u32 4294901760, %v529_v36  ;;  %v540_v8 = vand.u32 4294901760, %v539_v37  ;;  %v549_v25 = vsub.f32 %v11277_v26, %v15629_v47  ;;  %9356 = vmatprep.subr.mxu1 %v11093_v5  ;;  %v270_v2 = vunpack.c.3.s8 %v257_v62 }
  0x2b   : > { %9319 = vmatpush3.msra.mxu0 %v11113_v13  ;;  %9299 = vmatmul.mubr.f32.gmra.mxu1 %v11236_v45  ;;  %v315_v15 = vsub.f32 0.0, %v11293_v63  ;;  %v316_v27 = vsub.f32 0.0, %v11295_v0  ;;  %v11306_v28 = vcvt.s32.f32 %v269_v1  ;;  %v271_v29 = vunpack.c.0.s8 %v258_v49 }
  0x2c   : > { %9260 = vmatmul.mubr.f32.gmra.mxu0 %v510_v35  ;;  %9320 = vmatprep.subr.mxu0 %v11116_v14  ;;  %v550_v33 = vand.u32 4294901760, %v549_v25  ;;  %v11309_v36 = vcvt.s32.f32 %v270_v2  ;;  %v272_v37 = vunpack.c.1.s8 %v258_v49  ;;  %v273_v47 = vunpack.c.2.s8 %v258_v49 }
  0x2d   : > { %9262 = vmatprep.mubr.f32.mxu0 %v520_v50  ;;  %9301 = vmatprep.mubr.f32.mxu1 %v11238_v46  ;;  %v331_v13 = vmax.f32 %v315_v15, 0.0  ;;  %v332_v62 = vmax.f32 %v316_v27, 0.0  ;;  %v317_v57 = vsub.f32 0.0, %v11306_v28  ;;  %v11313_v48 = vcvt.s32.f32 %v271_v29 }
  0x2e   : > { %9321 = vmatpush3.msra.mxu0 %v11116_v14  ;;  %9357 = vmatpush3.msra.mxu1 %v11093_v5  ;;  %v318_v35 = vsub.f32 0.0, %v11309_v36  ;;  %v11318_v25 = vcvt.s32.f32 %v272_v37  ;;  %v11320_v2 = vcvt.s32.f32 %v273_v47  ;;  %v274_v1 = vunpack.c.3.s8 %v258_v49 }
  0x2f   : > { %9302 = vmatmul.mubr.f32.gmra.mxu1 %v11262_v61  ;;  %v378_v50 = vsel %vm352_vm1, %v331_v13, 0  ;;  %9322 = vmatprep.subr.mxu0 %v11123_v16  ;;  %v381_v15 = vsel %vm352_vm1, %v332_v62, 0  ;;  %v333_v27 = vmax.f32 %v317_v57, 0.0  ;;  %v319_v14 = vsub.f32 0.0, %v11313_v48 }
  0x30   : > { %9263 = vmatmul.mubr.f32.gmra.mxu0 %v530_v3  ;;  %v11327_v29 = vand.u32 4294901760, %v378_v50  ;;  %v11329_v42 = vand.u32 4294901760, %v381_v15  ;;  %9358 = vmatprep.subr.mxu1 %v11106_v10  ;;  %v334_v47 = vmax.f32 %v318_v35, 0.0  ;;  %v320_v49 = vsub.f32 0.0, %v11318_v25 }
  0x31   : > { %9265 = vmatprep.mubr.f32.mxu0 %v540_v8  ;;  %9323 = vmatpush3.msra.mxu0 %v11123_v16  ;;  %v384_v37 = vsel %vm352_vm1, %v333_v27, 0  ;;  %v335_v13 = vmax.f32 %v319_v14, 0.0  ;;  %v321_v57 = vsub.f32 0.0, %v11320_v2  ;;  %v11336_v62 = vcvt.s32.f32 %v274_v1 }
  0x32   : > { %16061 = vst [vmem:[#allocation5_spill] sm:$0xff] %v11327_v29  ;;  %16062 = vst [vmem:[#allocation6_spill] sm:$0xff] %v11329_v42  ;;  %v11339_v3 = vsub.f32 %v378_v50, %v11327_v29  ;;  %9304 = vmatprep.mubr.f32.mxu1 %v11327_v29  ;;  %v11343_v38 = vsub.f32 %v381_v15, %v11329_v42  ;;  %9359 = vmatpush3.msra.mxu1 %v11106_v10  ;;  %v11346_v8 = vand.u32 4294901760, %v384_v37 }
  0x33   : > { %v387_v16 = vsel %vm352_vm1, %v334_v47, 0  ;;  %9305 = vmatmul.mubr.f32.gmra.mxu1 %v11329_v42  ;;  %9324 = vmatprep.subr.mxu0 %v11126_v17  ;;  %v390_v1 = vsel %vm352_vm1, %v335_v13, 0  ;;  %v336_v50 = vmax.f32 %v320_v49, 0.0  ;;  %v337_v27 = vmax.f32 %v321_v57, 0.0 }
  0x34   : > { %16063 = vst [vmem:[#allocation7_spill] sm:$0xff] %v11346_v8  ;;  %v11350_v35 = vand.u32 4294901760, %v387_v16  ;;  %9266 = vmatmul.mubr.f32.gmra.mxu0 %v550_v33  ;;  %v15638_v15 = vand.u32 4294901760, %v11339_v3  ;;  %v15639_v14 = vand.u32 4294901760, %v11343_v38  ;;  %v11357_v29 = vsub.f32 %v384_v37, %v11346_v8  ;;  %9307 = vmatprep.mubr.f32.mxu1 %v11346_v8 }
  0x35   : > { %v11360_v47 = vand.u32 4294901760, %v390_v1  ;;  %9325 = vmatpush3.msra.mxu0 %v11126_v17  ;;  %9360 = vmatprep.subr.mxu1 %v11108_v11  ;;  %v393_v33 = vsel %vm352_vm1, %v336_v50, 0  ;;  %v396_v49 = vsel %vm352_vm1, %v337_v27, 0  ;;  %v322_v13 = vsub.f32 0.0, %v11336_v62 }
  0x36   : > { %16064 = vst [vmem:[#allocation8_spill] sm:$0xff] %v11350_v35  ;;  %v11363_v42 = vsub.f32 %v387_v16, %v11350_v35  ;;  %v559_v37 = vsub.f32 %v11339_v3, %v15638_v15  ;;  %v569_v57 = vsub.f32 %v11343_v38, %v15639_v14  ;;  %9361 = vmatpush3.msra.mxu1 %v11108_v11  ;;  %v11384_v27 = vand.u32 4294901760, %v393_v33 }
  0x37   : > { %v11378_v17 = vsub.f32 %v390_v1, %v11360_v47  ;;  %9326 = vmatprep.subr.mxu0 %v11129_v18  ;;  %9308 = vmatmul.mubr.f32.gmra.mxu1 %v11350_v35  ;;  %v11386_v15 = vand.u32 4294901760, %v396_v49  ;;  %v338_v14 = vmax.f32 %v322_v13, 0.0  ;;  %v16066_v1 = vand.u32 4294901760, %v11357_v29 }
  0x38   : > { %v15650_v50 = vand.u32 4294901760, %v11363_v42  ;;  %9327 = vmatpush3.msra.mxu0 %v11129_v18  ;;  %v560_v8 = vand.u32 4294901760, %v559_v37  ;;  %v570_v16 = vand.u32 4294901760, %v569_v57  ;;  %9310 = vmatprep.mubr.f32.mxu1 %v11360_v47  ;;  %v11399_v45 = vsub.f32 %v393_v33, %v11384_v27 }
  0x39   : > { %16065 = vst [vmem:[#allocation9_spill] sm:$0xff] %v11386_v15  ;;  %v579_v61 = vsub.f32 %v11357_v29, %v16066_v1  ;;  %v15651_v46 = vand.u32 4294901760, %v11378_v17  ;;  %9362 = vmatprep.subr.mxu1 %v11110_v12  ;;  %v11402_v18 = vsub.f32 %v396_v49, %v11386_v15  ;;  %v399_v13 = vsel %vm352_vm1, %v338_v14, 0  ;;  %9388 = vmatprep.subr.mxu0 %v11139_v21 }
  0x3a   : > { %v589_v35 = vsub.f32 %v11363_v42, %v15650_v50  ;;  %9363 = vmatpush3.msra.mxu1 %v11110_v12  ;;  %9268 = vmatprep.mubr.f32.mxu0 %v560_v8  ;;  %v11410_v1 = vand.u32 4294901760, %v399_v13  ;;  %v15652_v49 = vand.u32 4294901760, %v11399_v45  ;;  %v292_v8 = vmax.f32 %v11177_v41, 0.0 }
  0x3b   : > { %v580_v37 = vand.u32 4294901760, %v579_v61  ;;  %v599_v57 = vsub.f32 %v11378_v17, %v15651_v46  ;;  %9424 = vmatprep.subr.mxu1 %v11104_v9  ;;  %9269 = vmatmul.mubr.f32.gmra.mxu0 %v570_v16  ;;  %v618_v14 = vand.u32 4294901760, %v11402_v18 }
  0x3c   : > { %v590_v33 = vand.u32 4294901760, %v589_v35  ;;  %9311 = vmatmul.mubr.f32.gmra.mxu1 %v11384_v27  ;;  %v11418_v61 = vsub.f32 %v399_v13, %v11410_v1  ;;  %v609_v16 = vsub.f32 %v11399_v45, %v15652_v49  ;;  %v16067_v13 = vand.u32 4294901760, %v11212_v30 }
  0x3d   : > { %9271 = vmatprep.mubr.f32.mxu0 %v580_v37  ;;  %v600_v50 = vand.u32 4294901760, %v599_v57  ;;  %9313 = vmatprep.mubr.f32.mxu1 %v11386_v15  ;;  %v619_v35 = vsub.f32 %v11402_v18, %v618_v14  ;;  %v291_v49 = vmax.f32 %v11175_v40, 0.0  ;;  %v11436_v15 = vsel %vm352_vm1, %v292_v8, 0 }
  0x3e   : > { %v15655_v46 = vand.u32 4294901760, %v11418_v61  ;;  %v610_v37 = vand.u32 4294901760, %v609_v16  ;;  %v16069_v40 = vand.u32 4294901760, %v11229_v43 }
  0x3f   : > { %9272 = vmatmul.mubr.f32.gmra.mxu0 %v590_v33  ;;  %v620_v57 = vand.u32 4294901760, %v619_v35  ;;  %v344_v33 = vld [vmem:[%s15620_s1 + $0x28] sm:$0x3]  ;;  %v11444_v35 = vsel %vm352_vm1, %v291_v49, 0  ;;  %v295_v49 = vmax.f32 %v11188_v53, 0.0  ;;  %v298_v53 = vmax.f32 %v11196_v59, 0.0 }
  0x40   : > { %9314 = vmatmul.mubr.f32.gmra.mxu1 %v11410_v1  ;;  %9274 = vmatprep.mubr.f32.mxu0 %v600_v50  ;;  %v629_v41 = vsub.f32 %v11418_v61, %v15655_v46  ;;  %v16068_v50 = vand.u32 4294901760, %v11216_v31  ;;  %v293_v46 = vmax.f32 %v11183_v51, 0.0  ;;  %v1610_v8 = vsel %vm401_vm0, %v344_v33, 0 }
  0x41   : > { %9364 = vmatprep.mubr.f32.mxu1 %v16067_v13  ;;  %v16070_v51 = vand.u32 4294901760, %v11234_v39  ;;  %v11467_v13 = vand.u32 4294901760, %v1610_v8  ;;  %v297_v33 = vmax.f32 %v11192_v55, 0.0  ;;  %v16073_v55 = vand.u32 4294901760, %v11260_v60 }
  0x42   : > { %v630_v16 = vand.u32 4294901760, %v629_v41  ;;  %v294_v41 = vmax.f32 %v11186_v52, 0.0  ;;  %v299_v59 = vmax.f32 %v11293_v63, 0.0  ;;  %v16074_v63 = vand.u32 4294901760, %v11277_v26 }
  0x43   : > { %9275 = vmatmul.mubr.f32.gmra.mxu0 %v610_v37  ;;  %v11453_v37 = vsel %vm352_vm1, %v293_v46, 0  ;;  %v16071_v46 = vand.u32 4294901760, %v11251_v56 }
  0x44   : > { %9365 = vmatmul.mubr.f32.vlgmr.msra.gmra.mxu1 %v16068_v50  ;;  %9277 = vmatprep.mubr.f32.mxu0 %v620_v57  ;;  %v296_v57 = vmax.f32 %v11190_v54, 0.0  ;;  %v16072_v54 = vand.u32 4294901760, %v11257_v58  ;;  %v302_v50 = vmax.f32 %v11309_v36, 0.0  ;;  %v16077_v36 = vand.u32 4294901760, %v11357_v29 }
  0x45   : > { %9425 = vmatpush3.msra.mxu1 %v11104_v9  ;;  %9367 = vmatprep.mubr.f32.mxu1 %v16069_v40  ;;  %v11460_v9 = vsel %vm352_vm1, %v294_v41, 0  ;;  %v303_v41 = vmax.f32 %v11313_v48, 0.0 }
  0x46   : > { %9426 = vmatprep.subr.mxu1 %v11091_v4  ;;  %v11474_v52 = vsel %vm352_vm1, %v296_v57, 0 }
  0x47   : > { %9427 = vmatpush3.msra.mxu1 %v11091_v4  ;;  %9278 = vmatmul.mubr.f32.gmra.mxu0 %v630_v16  ;;  %v11471_v4 = vsel %vm352_vm1, %v295_v49, 0  ;;  %v11486_v16 = vsel %vm352_vm1, %v298_v53, 0  ;;  %v305_v49 = vmax.f32 %v11320_v2, 0.0  ;;  %v11566_v48 = vsel %vm352_vm1, %v303_v41, 0 }
  0x48   : > { %9368 = vmatmul.mubr.f32.gmra.mxu1 %v16070_v51  ;;  %9328 = vmatprep.mubr.f32.mxu0 %v11212_v30  ;;  %v11483_v30 = vsel %vm352_vm1, %v297_v33, 0  ;;  %v304_v51 = vmax.f32 %v11318_v25, 0.0 }
  0x49   : > { %9370 = vmatprep.mubr.f32.mxu1 %v16071_v46  ;;  %9428 = vmatprep.subr.mxu1 %v11093_v5  ;;  %v306_v46 = vmax.f32 %v11336_v62, 0.0 }
  0x4a   : > { %9429 = vmatpush3.msra.mxu1 %v11093_v5  ;;  %v11494_v5 = vsub.f32 %v1610_v8, %v11467_v13  ;;  %v11569_v25 = vsel %vm352_vm1, %v304_v51, 0  ;;  %v11677_v51 = vand.u32 4294901760, %v11436_v15 }
  0x4b   : > { %9329 = vmatmul.mubr.f32.vlgmr.msra.gmra.mxu0 %v11216_v31  ;;  %9430 = vmatprep.subr.mxu1 %v11106_v10  ;;  %v300_v31 = vmax.f32 %v11295_v0, 0.0  ;;  %v16075_v0 = vand.u32 4294901760, %v11339_v3  ;;  %v11584_v33 = vsel %vm352_vm1, %v306_v46, 0  ;;  %v11686_v46 = vand.u32 4294901760, %v11453_v37 }
  0x4c   : > { %9371 = vmatmul.mubr.f32.gmra.mxu1 %v16072_v54  ;;  %9389 = vmatpush3.msra.mxu0 %v11139_v21  ;;  %v11503_v21 = vsel %vm352_vm1, %v299_v59, 0  ;;  %v16080_v54 = vand.u32 4294901760, %v11399_v45  ;;  %v16081_v59 = vand.u32 4294901760, %v11418_v61 }
  0x4d   : > { %9331 = vmatprep.mubr.f32.mxu0 %v11229_v43  ;;  %9390 = vmatprep.subr.mxu0 %v11133_v19  ;;  %v343_v43 = vld [vmem:[%s15620_s1 + $0x20] sm:$0xff] }
  0x4e   : > { %9373 = vmatprep.mubr.f32.mxu1 %v16073_v55  ;;  %9391 = vmatpush3.msra.mxu0 %v11133_v19  ;;  %v11511_v19 = vsel %vm352_vm1, %v300_v31, 0  ;;  %v11529_v40 = vand.u32 4294901760, %v343_v43 }
  0x4f   : > { %9332 = vmatmul.mubr.f32.gmra.mxu0 %v11234_v39  ;;  %9392 = vmatprep.subr.mxu0 %v11136_v20  ;;  %v11517_v39 = vand.u32 4294901760, %v11494_v5 }
  0x50   : > { %9334 = vmatprep.mubr.f32.mxu0 %v11251_v56  ;;  %9393 = vmatpush3.msra.mxu0 %v11136_v20  ;;  %v342_v20 = vld [vmem:[%s15620_s1 + $0x18] sm:$0xff]  ;;  %v301_v56 = vmax.f32 %v11306_v28, 0.0  ;;  %v11540_v28 = vsel %vm352_vm1, %v302_v50, 0 }
  0x51   : > { %9374 = vmatmul.mubr.f32.gmra.mxu1 %v16074_v63  ;;  %9394 = vmatprep.subr.mxu0 %v11143_v22 }
  0x52   : > { %9376 = vmatprep.mubr.f32.mxu1 %v16075_v0  ;;  %9395 = vmatpush3.msra.mxu0 %v11143_v22  ;;  %v341_v22 = vld [vmem:[%s15620_s1 + $0x10] sm:$0xff]  ;;  %v11537_v8 = vsel %vm352_vm1, %v301_v56, 0 }
  0x53   : > { %9335 = vmatmul.mubr.f32.gmra.mxu0 %v11257_v58  ;;  %9431 = vmatpush3.msra.mxu1 %v11106_v10  ;;  %v16076_v58 = vand.u32 4294901760, %v11343_v38  ;;  %v1867_v10 = vsub.f32 %v11494_v5, %v11517_v39  ;;  %v11560_v57 = vand.u32 4294901760, %v341_v22 }
  0x54   : > { %9337 = vmatprep.mubr.f32.mxu0 %v11260_v60  ;;  %9396 = vmatprep.subr.mxu0 %v11146_v23  ;;  %v11547_v60 = vand.u32 4294901760, %v342_v20 }
  0x55   : > { %9377 = vmatmul.mubr.f32.gmra.mxu1 %v16076_v58  ;;  %9397 = vmatpush3.msra.mxu0 %v11146_v23  ;;  %v11558_v23 = vsub.f32 %v343_v43, %v11529_v40  ;;  %v1868_v2 = vand.u32 4294901760, %v1867_v10 }
  0x56   : > { %9379 = vmatprep.mubr.f32.mxu1 %v16077_v36  ;;  %9432 = vmatprep.subr.mxu1 %v11108_v11  ;;  %v11578_v62 = vsub.f32 %v342_v20, %v11547_v60  ;;  %v16087_v36 = vld [vmem:[#allocation7_spill] sm:$0xff] }
  0x57   : > { %9338 = vmatmul.mubr.f32.gmra.mxu0 %v11277_v26  ;;  %9433 = vmatpush3.msra.mxu1 %v11108_v11  ;;  %v11572_v26 = vsel %vm352_vm1, %v305_v49, 0  ;;  %v16078_v11 = vand.u32 4294901760, %v11363_v42  ;;  %v11589_v53 = vand.u32 4294901760, %v11558_v23 }
  0x58   : > { %9340 = vmatprep.mubr.f32.mxu0 %v11339_v3  ;;  %9398 = vmatprep.subr.mxu0 %v11149_v24  ;;  %v16079_v3 = vand.u32 4294901760, %v11378_v17  ;;  %v11599_v55 = vand.u32 4294901760, %v11578_v62 }
  0x59   : > { %9380 = vmatmul.mubr.f32.gmra.mxu1 %v16078_v11  ;;  %9399 = vmatpush3.msra.mxu0 %v11149_v24  ;;  %v11592_v24 = vsub.f32 %v341_v22, %v11560_v57  ;;  %v16088_v11 = vld [vmem:[#allocation8_spill] sm:$0xff] }
  0x5a   : > { %9382 = vmatprep.mubr.f32.mxu1 %v16079_v3  ;;  %9434 = vmatprep.subr.mxu1 %v11110_v12 }
  0x5b   : > { %9341 = vmatmul.mubr.f32.gmra.mxu0 %v11343_v38  ;;  %9435 = vmatpush3.msra.mxu1 %v11110_v12  ;;  %v1874_v12 = vsub.f32 %v11558_v23, %v11589_v53  ;;  %v11607_v38 = vand.u32 4294901760, %v11592_v24 }
  0x5c   : > { %9343 = vmatprep.mubr.f32.mxu0 %v11357_v29  ;;  %9460 = vmatprep.subr.mxu0 %v11467_v13  ;;  %v340_v29 = vld [vmem:[%s15620_s1 + $0x8] sm:$0xff] }
  0x5d   : > { %9383 = vmatmul.mubr.f32.gmra.mxu1 %v16080_v54  ;;  %9496 = vmatprep.subr.mxu1 %v1868_v2  ;;  %v1875_v31 = vand.u32 4294901760, %v1874_v12  ;;  %v1888_v43 = vsub.f32 %v11592_v24, %v11607_v38  ;;  %v11704_v54 = vsub.f32 %v11453_v37, %v11686_v46  ;;  %v11707_v12 = vand.u32 4294901760, %v11471_v4 }
  0x5e   : > { %9385 = vmatprep.mubr.f32.mxu1 %v618_v14  ;;  %v1881_v14 = vsub.f32 %v11578_v62, %v11599_v55 }
  0x5f   : > { %9344 = vmatmul.mubr.f32.gmra.mxu0 %v11363_v42  ;;  %v11618_v42 = vand.u32 4294901760, %v340_v29  ;;  %v1889_v20 = vand.u32 4294901760, %v1888_v43  ;;  %v1705_v43 = vand.u32 4294901760, %v11704_v54 }
  0x60   : > { %9346 = vmatprep.mubr.f32.mxu0 %v11378_v17  ;;  %v339_v17 = vld [vmem:[%s15620_s1] sm:$0xff]  ;;  %v1882_v63 = vand.u32 4294901760, %v1881_v14  ;;  %v11722_v14 = vand.u32 4294901760, %v11483_v30 }
  0x61   : > { %9386 = vmatmul.mubr.f32.gmra.mxu1 %v16081_v59  ;;  %v11630_v0 = vsub.f32 %v340_v29, %v11618_v42  ;;  %v11713_v29 = vand.u32 4294901760, %v11474_v52 }
  0x62   : > { %9436 = vmatprep.mubr.f32.mxu1 %v11206_v6 }
  0x63   : > { %9347 = vmatmul.mubr.f32.gmra.mxu0 %v11399_v45  ;;  %v11632_v45 = vand.u32 4294901760, %v339_v17 }
  0x64   : > { %9349 = vmatprep.mubr.f32.mxu0 %v11402_v18  ;;  %v11639_v18 = vand.u32 4294901760, %v11630_v0 }
  0x65   : > { %9437 = vmatmul.mubr.f32.vlgmr.msra.gmra.mxu1 %v11208_v7  ;;  %v11642_v56 = vsub.f32 %v339_v17, %v11632_v45  ;;  %v11731_v17 = vsub.f32 %v11471_v4, %v11707_v12 }
  0x66   : > { %9497 = vmatpush3.msra.mxu1 %v1868_v2  ;;  %9439 = vmatprep.mubr.f32.mxu1 %v11218_v32  ;;  %v1895_v50 = vsub.f32 %v11630_v0, %v11639_v18  ;;  %v11694_v2 = vsub.f32 %v11436_v15, %v11677_v51  ;;  %v16089_v15 = vld [vmem:[#allocation9_spill] sm:$0xff] }
  0x67   : > { %9350 = vmatmul.mubr.f32.gmra.mxu0 %v11418_v61  ;;  %9498 = vmatprep.subr.mxu1 %v1875_v31  ;;  %v16083_v61 = vld [vmem:[#allocation3_spill] sm:$0xff]  ;;  %v11654_v22 = vand.u32 4294901760, %v11642_v56 }
  0x68   : > { %9400 = vmatprep.mubr.f32.mxu0 %v11206_v6  ;;  %9499 = vmatpush3.msra.mxu1 %v1875_v31  ;;  %v16082_v6 = vld [vmem:[#allocation2_spill] sm:$0xff]  ;;  %v1896_v58 = vand.u32 4294901760, %v1895_v50  ;;  %v1695_v59 = vand.u32 4294901760, %v11694_v2 }
  0x69   : > { %9440 = vmatmul.mubr.f32.gmra.mxu1 %v11221_v34  ;;  %9500 = vmatprep.subr.mxu1 %v1882_v63  ;;  %v1902_v10 = vsub.f32 %v11642_v56, %v11654_v22 }
  0x6a   : > { %9442 = vmatprep.mubr.f32.mxu1 %v11231_v44  ;;  %9501 = vmatpush3.msra.mxu1 %v1882_v63  ;;  %v1696_v63 = vsub.f32 %v11694_v2, %v1695_v59 }
  0x6b   : > { %9401 = vmatmul.mubr.f32.vlgmr.msra.gmra.mxu0 %v11208_v7  ;;  %9502 = vmatprep.subr.mxu1 %v1889_v20  ;;  %v16084_v7 = vld [vmem:[#allocation4_spill] sm:$0xff]  ;;  %v1903_v41 = vand.u32 4294901760, %v1902_v10  ;;  %v11774_v10 = vand.u32 4294901760, %v11511_v19 }
  0x6c   : > { %9461 = vmatpush3.msra.mxu0 %v11467_v13  ;;  %9403 = vmatprep.mubr.f32.mxu0 %v11218_v32  ;;  %v16085_v32 = vld [vmem:[#allocation5_spill] sm:$0xff] }
  0x6d   : > { %9462 = vmatprep.subr.mxu0 %v11529_v40  ;;  %9443 = vmatmul.mubr.f32.gmra.mxu1 %v16082_v6 }
  0x6e   : > { %9463 = vmatpush3.msra.mxu0 %v11529_v40  ;;  %9445 = vmatprep.mubr.f32.mxu1 %v16083_v61 }
  0x6f   : > { %9404 = vmatmul.mubr.f32.gmra.mxu0 %v11221_v34  ;;  %9464 = vmatprep.subr.mxu0 %v11547_v60  ;;  %v11670_v34 = vand.u32 4294901760, %v11444_v35 }
  0x70   : > { %9406 = vmatprep.mubr.f32.mxu0 %v11231_v44  ;;  %9465 = vmatpush3.msra.mxu0 %v11547_v60  ;;  %v16086_v44 = vld [vmem:[#allocation6_spill] sm:$0xff] }
  0x71   : > { %9446 = vmatmul.mubr.f32.gmra.mxu1 %v16084_v7  ;;  %9466 = vmatprep.subr.mxu0 %v11560_v57  ;;  %v11683_v49 = vsub.f32 %v11444_v35, %v11670_v34  ;;  %v11697_v35 = vand.u32 4294901760, %v11460_v9 }
  0x72   : > { %9448 = vmatprep.mubr.f32.mxu1 %v16085_v32  ;;  %9467 = vmatpush3.msra.mxu0 %v11560_v57 }
  0x73   : > { %9407 = vmatmul.mubr.f32.gmra.mxu0 %v16082_v6  ;;  %9503 = vmatpush3.msra.mxu1 %v1889_v20  ;;  %v1685_v3 = vand.u32 4294901760, %v11683_v49  ;;  %v11719_v37 = vsub.f32 %v11460_v9, %v11697_v35  ;;  %v11737_v9 = vsub.f32 %v11474_v52, %v11713_v29  ;;  %v11749_v20 = vsub.f32 %v11483_v30, %v11722_v14 }
  0x74   : > { %9409 = vmatprep.mubr.f32.mxu0 %v16083_v61  ;;  %9468 = vmatprep.subr.mxu0 %v11618_v42  ;;  %v1706_v52 = vsub.f32 %v11704_v54, %v1705_v43  ;;  %v1725_v61 = vand.u32 4294901760, %v11731_v17 }
  0x75   : > { %9449 = vmatmul.mubr.f32.gmra.mxu1 %v16086_v44  ;;  %9469 = vmatpush3.msra.mxu0 %v11618_v42  ;;  %v1686_v31 = vsub.f32 %v11683_v49, %v1685_v3  ;;  %v1715_v4 = vand.u32 4294901760, %v11719_v37  ;;  %v1735_v30 = vand.u32 4294901760, %v11737_v9 }
  0x76   : > { %9451 = vmatprep.mubr.f32.mxu1 %v16087_v36  ;;  %9504 = vmatprep.subr.mxu1 %v1896_v58 }
  0x77   : > { %9410 = vmatmul.mubr.f32.gmra.mxu0 %v16084_v7  ;;  %9505 = vmatpush3.msra.mxu1 %v1896_v58  ;;  %v1687_v6 = vand.u32 4294901760, %v1686_v31  ;;  %v1697_v7 = vand.u32 4294901760, %v1696_v63  ;;  %v15656_v58 = vand.u32 4294901760, %v11749_v20  ;;  %v11800_v31 = vsub.f32 %v11511_v19, %v11774_v10 }
  0x78   : > { %9412 = vmatprep.mubr.f32.mxu0 %v16085_v32  ;;  %9470 = vmatprep.subr.mxu0 %v11632_v45  ;;  %v1716_v32 = vsub.f32 %v11719_v37, %v1715_v4  ;;  %v11804_v63 = vand.u32 4294901760, %v11540_v28 }
  0x79   : > { %9452 = vmatmul.mubr.f32.gmra.mxu1 %v16088_v11  ;;  %9471 = vmatpush3.msra.mxu0 %v11632_v45 }
  0x7a   : > { %9454 = vmatprep.mubr.f32.mxu1 %v11360_v47  ;;  %9506 = vmatprep.subr.mxu1 %v1903_v41 }
  0x7b   : > { %9413 = vmatmul.mubr.f32.gmra.mxu0 %v16086_v44  ;;  %9507 = vmatpush3.msra.mxu1 %v1903_v41  ;;  %v1707_v44 = vand.u32 4294901760, %v1706_v52  ;;  %v1736_v41 = vsub.f32 %v11737_v9, %v1735_v30 }
  0x7c   : > { %9415 = vmatprep.mubr.f32.mxu0 %v16087_v36  ;;  %9532 = vmatprep.subr.mxu0 %v11494_v5  ;;  %v11785_v36 = vand.u32 4294901760, %v11537_v8 }
  0x7d   : > { %9455 = vmatmul.mubr.f32.gmra.mxu1 %v11384_v27  ;;  %9568 = vmatprep.subr.mxu1 %v11467_v13  ;;  %v1737_v19 = vand.u32 4294901760, %v1736_v41 }
  0x7e   : > { %9457 = vmatprep.mubr.f32.mxu1 %v16089_v15 }
  0x7f   : > { %9416 = vmatmul.mubr.f32.gmra.mxu0 %v16088_v11 }
  0x80   : > { %9418 = vmatprep.mubr.f32.mxu0 %v11360_v47  ;;  %v11740_v47 = vand.u32 4294901760, %v11486_v16 }
  0x81   : > { %9458 = vmatmul.mubr.f32.gmra.mxu1 %v11410_v1 }
  0x82   : > { %9508 = vmatprep.mubr.f32.mxu1 %v11670_v34  ;;  %v11765_v50 = vsub.f32 %v11486_v16, %v11740_v47  ;;  %v1726_v16 = vsub.f32 %v11731_v17, %v1725_v61 }
  0x83   : > { %9419 = vmatmul.mubr.f32.gmra.mxu0 %v11384_v27  ;;  %v11757_v27 = vand.u32 4294901760, %v11503_v21 }
  0x84   : > { %9421 = vmatprep.mubr.f32.mxu0 %v16089_v15  ;;  %v1755_v11 = vand.u32 4294901760, %v11765_v50  ;;  %v1746_v15 = vsub.f32 %v11749_v20, %v15656_v58  ;;  %v11829_v58 = vand.u32 4294901760, %v11569_v25 }
  0x85   : > { %9509 = vmatmul.mubr.f32.vlgmr.msra.gmra.mxu1 %v11677_v51 }
  0x86   : > { %9569 = vmatpush3.msra.mxu1 %v11467_v13  ;;  %9511 = vmatprep.mubr.f32.mxu1 %v11686_v46 }
  0x87   : > { %9422 = vmatmul.mubr.f32.gmra.mxu0 %v11410_v1  ;;  %9570 = vmatprep.subr.mxu1 %v11529_v40  ;;  %v11782_v1 = vsub.f32 %v11503_v21, %v11757_v27  ;;  %v1717_v21 = vand.u32 4294901760, %v1716_v32  ;;  %v11813_v32 = vand.u32 4294901760, %v11566_v48 }
  0x88   : > { %9472 = vmatprep.mubr.f32.mxu0 %v1687_v6  ;;  %9571 = vmatpush3.msra.mxu1 %v11529_v40  ;;  %v1727_v6 = vand.u32 4294901760, %v1726_v16  ;;  %v11826_v16 = vsub.f32 %v11540_v28, %v11804_v63 }
  0x89   : > { %9512 = vmatmul.mubr.f32.gmra.mxu1 %v11697_v35  ;;  %9572 = vmatprep.subr.mxu1 %v11547_v60  ;;  %v15657_v52 = vand.u32 4294901760, %v11782_v1 }
  0x8a   : > { %9514 = vmatprep.mubr.f32.mxu1 %v11707_v12  ;;  %9573 = vmatpush3.msra.mxu1 %v11547_v60 }
  0x8b   : > { %9473 = vmatmul.mubr.f32.vlgmr.msra.gmra.mxu0 %v1697_v7  ;;  %9574 = vmatprep.subr.mxu1 %v11560_v57  ;;  %v11810_v7 = vsub.f32 %v11537_v8, %v11785_v36  ;;  %v1747_v8 = vand.u32 4294901760, %v1746_v15  ;;  %v11841_v15 = vand.u32 4294901760, %v11572_v26 }
  0x8c   : > { %9533 = vmatpush3.msra.mxu0 %v11494_v5  ;;  %9475 = vmatprep.mubr.f32.mxu0 %v1707_v44  ;;  %v1756_v5 = vsub.f32 %v11765_v50, %v1755_v11  ;;  %v15658_v44 = vand.u32 4294901760, %v11800_v31 }
  0x8d   : > { %9534 = vmatprep.subr.mxu0 %v11558_v23  ;;  %9515 = vmatmul.mubr.f32.gmra.mxu1 %v11713_v29  ;;  %v15659_v41 = vand.u32 4294901760, %v11810_v7 }
  0x8e   : > { %9535 = vmatpush3.msra.mxu0 %v11558_v23  ;;  %9517 = vmatprep.mubr.f32.mxu1 %v11722_v14  ;;  %v1766_v23 = vsub.f32 %v11782_v1, %v15657_v52  ;;  %v1757_v28 = vand.u32 4294901760, %v1756_v5  ;;  %v11857_v52 = vand.u32 4294901760, %v11584_v33 }
  0x8f   : > { %9476 = vmatmul.mubr.f32.gmra.mxu0 %v1717_v21  ;;  %9536 = vmatprep.subr.mxu0 %v11578_v62  ;;  %v11838_v21 = vsub.f32 %v11566_v48, %v11813_v32  ;;  %v1795_v48 = vand.u32 4294901760, %v11826_v16 }
  0x90   : > { %9478 = vmatprep.mubr.f32.mxu0 %v1727_v6  ;;  %9537 = vmatpush3.msra.mxu0 %v11578_v62  ;;  %v1776_v62 = vsub.f32 %v11800_v31, %v15658_v44  ;;  %v11854_v6 = vsub.f32 %v11569_v25, %v11829_v58  ;;  %v1767_v5 = vand.u32 4294901760, %v1766_v23  ;;  %v11866_v44 = vsub.f32 %v11572_v26, %v11841_v15 }
  0x91   : > { %9518 = vmatmul.mubr.f32.gmra.mxu1 %v11740_v47  ;;  %9538 = vmatprep.subr.mxu0 %v11592_v24  ;;  %v11879_v26 = vsub.f32 %v11584_v33, %v11857_v52 }
  0x92   : > { %9520 = vmatprep.mubr.f32.mxu1 %v11757_v27  ;;  %9539 = vmatpush3.msra.mxu0 %v11592_v24  ;;  %v1786_v24 = vsub.f32 %v11810_v7, %v15659_v41  ;;  %v1777_v25 = vand.u32 4294901760, %v1776_v62  ;;  %v1815_v23 = vand.u32 4294901760, %v11854_v6 }
  0x93   : > { %9479 = vmatmul.mubr.f32.gmra.mxu0 %v1737_v19  ;;  %9575 = vmatpush3.msra.mxu1 %v11560_v57  ;;  %v1805_v19 = vand.u32 4294901760, %v11838_v21 }
  0x94   : > { %9481 = vmatprep.mubr.f32.mxu0 %v1747_v8  ;;  %9540 = vmatprep.subr.mxu0 %v11630_v0  ;;  %v1796_v8 = vsub.f32 %v11826_v16, %v1795_v48  ;;  %v1816_v62 = vsub.f32 %v11854_v6, %v1815_v23 }
  0x95   : > { %9521 = vmatmul.mubr.f32.gmra.mxu1 %v11774_v10  ;;  %9541 = vmatpush3.msra.mxu0 %v11630_v0  ;;  %v1787_v0 = vand.u32 4294901760, %v1786_v24  ;;  %v1806_v41 = vsub.f32 %v11838_v21, %v1805_v19 }
  0x96   : > { %9523 = vmatprep.mubr.f32.mxu1 %v11785_v36  ;;  %9576 = vmatprep.subr.mxu1 %v11618_v42  ;;  %v1797_v33 = vand.u32 4294901760, %v1796_v8 }
  0x97   : > { %9482 = vmatmul.mubr.f32.gmra.mxu0 %v1757_v28  ;;  %9577 = vmatpush3.msra.mxu1 %v11618_v42  ;;  %v1825_v28 = vand.u32 4294901760, %v11866_v44  ;;  %v1807_v24 = vand.u32 4294901760, %v1806_v41 }
  0x98   : > { %9484 = vmatprep.mubr.f32.mxu0 %v1767_v5  ;;  %9542 = vmatprep.subr.mxu0 %v11642_v56  ;;  %v1835_v5 = vand.u32 4294901760, %v11879_v26 }
  0x99   : > { %9524 = vmatmul.mubr.f32.gmra.mxu1 %v11804_v63  ;;  %9543 = vmatpush3.msra.mxu0 %v11642_v56  ;;  %v1826_v56 = vsub.f32 %v11866_v44, %v1825_v28 }
  0x9a   : > { %9526 = vmatprep.mubr.f32.mxu1 %v11813_v32  ;;  %9578 = vmatprep.subr.mxu1 %v11632_v45  ;;  %v1836_v8 = vsub.f32 %v11879_v26, %v1835_v5 }
  0x9b   : > { %9485 = vmatmul.mubr.f32.gmra.mxu0 %v1777_v25  ;;  %9579 = vmatpush3.msra.mxu1 %v11632_v45  ;;  %v1817_v25 = vand.u32 4294901760, %v1816_v62  ;;  %v1827_v41 = vand.u32 4294901760, %v1826_v56 }
  0x9c   : > { %9487 = vmatprep.mubr.f32.mxu0 %v1787_v0  ;;  %9604 = vmatprep.subr.mxu0 %v11517_v39  ;;  %v1837_v0 = vand.u32 4294901760, %v1836_v8 }
  0x9d   : > { %9527 = vmatmul.mubr.f32.gmra.mxu1 %v11829_v58  ;;  %9640 = vmatprep.subr.mxu1 %v11467_v13 }
  0x9e   : > { %9529 = vmatprep.mubr.f32.mxu1 %v11841_v15 }
  0x9f   : > { %9488 = vmatmul.mubr.f32.gmra.mxu0 %v1797_v33 }
  0xa0   : > { %9490 = vmatprep.mubr.f32.mxu0 %v1807_v24 }
  0xa1   : > { %9530 = vmatmul.mubr.f32.gmra.mxu1 %v11857_v52 }
  0xa2   : > { %9580 = vmatprep.mubr.f32.mxu1 %v1685_v3 }
  0xa3   : > { %9491 = vmatmul.mubr.f32.gmra.mxu0 %v1817_v25 }
  0xa4   : > { %9493 = vmatprep.mubr.f32.mxu0 %v1827_v41 }
  0xa5   : > { %9581 = vmatmul.mubr.f32.vlgmr.msra.gmra.mxu1 %v1695_v59 }
  0xa6   : > { %9641 = vmatpush3.msra.mxu1 %v11467_v13  ;;  %9583 = vmatprep.mubr.f32.mxu1 %v1705_v43  ;;  %v16090_v13 = vand.u32 4294901760, %v11749_v20 }
  0xa7   : > { %9494 = vmatmul.mubr.f32.gmra.mxu0 %v1837_v0  ;;  %9642 = vmatprep.subr.mxu1 %v11529_v40  ;;  %v2813_v0 = vld [vmem:[%s15621_s2 + $0x40] sm:$0xff] }
  0xa8   : > { %9544 = vmatprep.mubr.f32.mxu0 %v11683_v49  ;;  %9643 = vmatpush3.msra.mxu1 %v11529_v40  ;;  %v16092_v40 = vand.u32 4294901760, %v11800_v31 }
  0xa9   : > { %9584 = vmatmul.mubr.f32.gmra.mxu1 %v1715_v4  ;;  %9644 = vmatprep.subr.mxu1 %v11547_v60 }
  0xaa   : > { %9586 = vmatprep.mubr.f32.mxu1 %v1725_v61  ;;  %9645 = vmatpush3.msra.mxu1 %v11547_v60  ;;  %v16093_v60 = vand.u32 4294901760, %v11810_v7 }
  0xab   : > { %9545 = vmatmul.mubr.f32.vlgmr.msra.gmra.mxu0 %v11694_v2  ;;  %9646 = vmatprep.subr.mxu1 %v11560_v57  ;;  %v2820_v2 = vld [vmem:[%s15621_s2 + $0x78] sm:$0xff] }
  0xac   : > { %9605 = vmatpush3.msra.mxu0 %v11517_v39  ;;  %9547 = vmatprep.mubr.f32.mxu0 %v11704_v54  ;;  %v16091_v39 = vand.u32 4294901760, %v11782_v1  ;;  %v12025_v3 = vand.u32 4294901760, %v2820_v2 }
  0xad   : > { %9606 = vmatprep.subr.mxu0 %v11589_v53  ;;  %9587 = vmatmul.mubr.f32.gmra.mxu1 %v1735_v30 }
  0xae   : > { %9607 = vmatpush3.msra.mxu0 %v11589_v53  ;;  %9589 = vmatprep.mubr.f32.mxu1 %v16090_v13  ;;  %16094 = vst [vmem:[#allocation2_spill] sm:$0xff] %v12025_v3 }
  0xaf   : > { %9548 = vmatmul.mubr.f32.gmra.mxu0 %v11719_v37  ;;  %9608 = vmatprep.subr.mxu0 %v11599_v55  ;;  %v12035_v37 = vsub.f32 %v2820_v2, %v12025_v3 }
  0xb0   : > { %9550 = vmatprep.mubr.f32.mxu0 %v11731_v17  ;;  %9609 = vmatpush3.msra.mxu0 %v11599_v55  ;;  %v2818_v17 = vld [vmem:[%s15621_s2 + $0x68] sm:$0xff] }
  0xb1   : > { %9590 = vmatmul.mubr.f32.gmra.mxu1 %v1755_v11  ;;  %9610 = vmatprep.subr.mxu0 %v11607_v38  ;;  %16095 = vst [vmem:[#allocation3_spill] sm:$0xff] %v12035_v37  ;;  %v2816_v11 = vld [vmem:[%s15621_s2 + $0x58] sm:$0xff] }
  0xb2   : > { %9592 = vmatprep.mubr.f32.mxu1 %v16091_v39  ;;  %9611 = vmatpush3.msra.mxu0 %v11607_v38 }
  0xb3   : > { %9551 = vmatmul.mubr.f32.gmra.mxu0 %v11737_v9  ;;  %9647 = vmatpush3.msra.mxu1 %v11560_v57 }
  0xb4   : > { %9553 = vmatprep.mubr.f32.mxu0 %v11749_v20  ;;  %9612 = vmatprep.subr.mxu0 %v11639_v18  ;;  %v12052_v20 = vand.u32 4294901760, %v2818_v17 }
  0xb5   : > { %9593 = vmatmul.mubr.f32.gmra.mxu1 %v16092_v40  ;;  %9613 = vmatpush3.msra.mxu0 %v11639_v18 }
  0xb6   : > { %9595 = vmatprep.mubr.f32.mxu1 %v16093_v60  ;;  %9648 = vmatprep.subr.mxu1 %v11618_v42  ;;  %16099 = vst [vmem:[#allocation7_spill] sm:$0xff] %v12052_v20 }
  0xb7   : > { %9554 = vmatmul.mubr.f32.gmra.mxu0 %v11765_v50  ;;  %9649 = vmatpush3.msra.mxu1 %v11618_v42 }
  0xb8   : > { %9556 = vmatprep.mubr.f32.mxu0 %v11782_v1  ;;  %9614 = vmatprep.subr.mxu0 %v11654_v22  ;;  %v12069_v1 = vsub.f32 %v2818_v17, %v12052_v20 }
  0xb9   : > { %9596 = vmatmul.mubr.f32.gmra.mxu1 %v1795_v48  ;;  %9615 = vmatpush3.msra.mxu0 %v11654_v22 }
  0xba   : > { %9598 = vmatprep.mubr.f32.mxu1 %v1805_v19  ;;  %9650 = vmatprep.subr.mxu1 %v11632_v45  ;;  %16101 = vst [vmem:[#allocation9_spill] sm:$0xff] %v12069_v1 }
  0xbb   : > { %9557 = vmatmul.mubr.f32.gmra.mxu0 %v11800_v31  ;;  %9651 = vmatpush3.msra.mxu1 %v11632_v45 }
  0xbc   : > { %9559 = vmatprep.mubr.f32.mxu0 %v11810_v7  ;;  %9676 = vmatprep.subr.mxu0 %v12025_v3 }
  0xbd   : > { %9599 = vmatmul.mubr.f32.gmra.mxu1 %v1815_v23 }
  0xbe   : > { %9601 = vmatprep.mubr.f32.mxu1 %v1825_v28  ;;  %v2814_v28 = vld [vmem:[%s15621_s2 + $0x48] sm:$0xff] }
  0xbf   : > { %9560 = vmatmul.mubr.f32.gmra.mxu0 %v11826_v16  ;;  %v12088_v16 = vand.u32 4294901760, %v2816_v11  ;;  %v12114_v56 = vand.u32 4294901760, %v2814_v28 }
  0xc0   : > { %9562 = vmatprep.mubr.f32.mxu0 %v11838_v21  ;;  %v2815_v21 = vld [vmem:[%s15621_s2 + $0x50] sm:$0xff] }
  0xc1   : > { %9602 = vmatmul.mubr.f32.gmra.mxu1 %v1835_v5  ;;  %16105 = vst [vmem:[#allocation13_spill] sm:$0xff] %v12088_v16  ;;  %v12098_v19 = vand.u32 4294901760, %v2815_v21  ;;  %16110 = vst [vmem:[#allocation18_spill] sm:$0xff] %v12114_v56  ;;  %v12136_v60 = vsub.f32 %v2814_v28, %v12114_v56 }
  0xc2   : > { %9652 = vmatprep.mubr.f32.mxu1 %v11670_v34 }
  0xc3   : > { %9563 = vmatmul.mubr.f32.gmra.mxu0 %v11854_v6  ;;  %16106 = vst [vmem:[#allocation14_spill] sm:$0xff] %v12098_v19  ;;  %v12112_v24 = vsub.f32 %v2815_v21, %v12098_v19  ;;  %16113 = vst [vmem:[#allocation21_spill] sm:$0xff] %v12136_v60 }
  0xc4   : > { %9565 = vmatprep.mubr.f32.mxu0 %v11866_v44 }
  0xc5   : > { %9653 = vmatmul.mubr.f32.vlgmr.msra.gmra.mxu1 %v11677_v51  ;;  %16109 = vst [vmem:[#allocation17_spill] sm:$0xff] %v12112_v24  ;;  %v12133_v40 = vand.u32 4294901760, %v12112_v24 }
  0xc6   : > { %9655 = vmatprep.mubr.f32.mxu1 %v11686_v46 }
  0xc7   : > { %9566 = vmatmul.mubr.f32.gmra.mxu0 %v11879_v26  ;;  %v12105_v26 = vsub.f32 %v2816_v11, %v12088_v16  ;;  %16112 = vst [vmem:[#allocation20_spill] sm:$0xff] %v12133_v40 }
  0xc8   : > { %9616 = vmatprep.mubr.f32.mxu0 %v11670_v34 }
  0xc9   : > { %9656 = vmatmul.mubr.f32.gmra.mxu1 %v11697_v35  ;;  %16108 = vst [vmem:[#allocation16_spill] sm:$0xff] %v12105_v26  ;;  %v12122_v41 = vand.u32 4294901760, %v12105_v26 }
  0xca   : > { %9658 = vmatprep.mubr.f32.mxu1 %v11707_v12 }
  0xcb   : > { %9617 = vmatmul.mubr.f32.vlgmr.msra.gmra.mxu0 %v11677_v51  ;;  %16111 = vst [vmem:[#allocation19_spill] sm:$0xff] %v12122_v41 }
  0xcc   : > { %9619 = vmatprep.mubr.f32.mxu0 %v11686_v46  ;;  %9677 = vmatpush3.msra.mxu0 %v12025_v3 }
  0xcd   : > { %9659 = vmatmul.mubr.f32.gmra.mxu1 %v11713_v29 }
  0xce   : > { %9661 = vmatprep.mubr.f32.mxu1 %v11722_v14 }
  0xcf   : > { %9620 = vmatmul.mubr.f32.gmra.mxu0 %v11697_v35 }
  0xd0   : > { %9622 = vmatprep.mubr.f32.mxu0 %v11707_v12  ;;  %v2819_v12 = vld [vmem:[%s15621_s2 + $0x70] sm:$0xff] }
  0xd1   : > { %9662 = vmatmul.mubr.f32.gmra.mxu1 %v11740_v47 }
  0xd2   : > { %9664 = vmatprep.mubr.f32.mxu1 %v11757_v27 }
  0xd3   : > { %9623 = vmatmul.mubr.f32.gmra.mxu0 %v11713_v29 }
  0xd4   : > { %9625 = vmatprep.mubr.f32.mxu0 %v11722_v14  ;;  %v12037_v14 = vand.u32 4294901760, %v2819_v12 }
  0xd5   : > { %9665 = vmatmul.mubr.f32.gmra.mxu1 %v11774_v10 }
  0xd6   : > { %9667 = vmatprep.mubr.f32.mxu1 %v11785_v36  ;;  %16096 = vst [vmem:[#allocation4_spill] sm:$0xff] %v12037_v14  ;;  %v12050_v4 = vsub.f32 %v2819_v12, %v12037_v14  ;;  %9678 = vmatprep.subr.mxu0 %v12037_v14 }
  0xd7   : > { %9626 = vmatmul.mubr.f32.gmra.mxu0 %v11740_v47  ;;  %v12047_v47 = vand.u32 4294901760, %v12035_v37 }
  0xd8   : > { %9628 = vmatprep.mubr.f32.mxu0 %v11757_v27  ;;  %16098 = vst [vmem:[#allocation6_spill] sm:$0xff] %v12050_v4  ;;  %v2817_v27 = vld [vmem:[%s15621_s2 + $0x60] sm:$0xff]  ;;  %9679 = vmatpush3.msra.mxu0 %v12037_v14 }
  0xd9   : > { %9668 = vmatmul.mubr.f32.gmra.mxu1 %v11804_v63  ;;  %16097 = vst [vmem:[#allocation5_spill] sm:$0xff] %v12047_v47  ;;  %9680 = vmatprep.subr.mxu0 %v12052_v20 }
  0xda   : > { %9670 = vmatprep.mubr.f32.mxu1 %v11813_v32  ;;  %9681 = vmatpush3.msra.mxu0 %v12052_v20 }
  0xdb   : > { %9629 = vmatmul.mubr.f32.gmra.mxu0 %v11774_v10  ;;  %v12066_v10 = vand.u32 4294901760, %v12050_v4 }
  0xdc   : > { %9631 = vmatprep.mubr.f32.mxu0 %v11785_v36  ;;  %v12072_v36 = vand.u32 4294901760, %v2817_v27 }
  0xdd   : > { %9671 = vmatmul.mubr.f32.gmra.mxu1 %v11829_v58  ;;  %16100 = vst [vmem:[#allocation8_spill] sm:$0xff] %v12066_v10  ;;  %v3078_v7 = vsub.f32 %v12050_v4, %v12066_v10 }
  0xde   : > { %9673 = vmatprep.mubr.f32.mxu1 %v11841_v15  ;;  %16102 = vst [vmem:[#allocation10_spill] sm:$0xff] %v12072_v36  ;;  %v12086_v44 = vsub.f32 %v2817_v27, %v12072_v36  ;;  %9682 = vmatprep.subr.mxu0 %v12072_v36  ;;  %v2811_v27 = vld [vmem:[%s15621_s2 + $0x30] sm:$0xff] }
  0xdf   : > { %9632 = vmatmul.mubr.f32.gmra.mxu0 %v11804_v63  ;;  %v3079_v48 = vand.u32 4294901760, %v3078_v7 }
  0xe0   : > { %9634 = vmatprep.mubr.f32.mxu0 %v11813_v32  ;;  %v12083_v32 = vand.u32 4294901760, %v12069_v1  ;;  %16104 = vst [vmem:[#allocation12_spill] sm:$0xff] %v12086_v44  ;;  %9683 = vmatpush3.msra.mxu0 %v12072_v36  ;;  %v12102_v23 = vand.u32 4294901760, %v12086_v44 }
  0xe1   : > { %9674 = vmatmul.mubr.f32.gmra.mxu1 %v11857_v52  ;;  %9684 = vmatprep.subr.mxu0 %v12088_v16 }
  0xe2   : > { %16103 = vst [vmem:[#allocation11_spill] sm:$0xff] %v12083_v32  ;;  %v3085_v6 = vsub.f32 %v12069_v1, %v12083_v32  ;;  %16107 = vst [vmem:[#allocation15_spill] sm:$0xff] %v12102_v23  ;;  %9685 = vmatpush3.msra.mxu0 %v12088_v16  ;;  %v3092_v8 = vsub.f32 %v12086_v44, %v12102_v23 }
  0xe3   : > { %9635 = vmatmul.mubr.f32.gmra.mxu0 %v11829_v58  ;;  %v9294_v57 = vpop.f32.mrf.mxu1  ;;  %v3071_v58 = vsub.f32 %v12035_v37, %v12047_v47  ;;  %9686 = vmatprep.subr.mxu0 %v12098_v19 }
  0xe4   : > { %9637 = vmatprep.mubr.f32.mxu0 %v11841_v15  ;;  %v3086_v5 = vand.u32 4294901760, %v3085_v6  ;;  %9687 = vmatpush3.msra.mxu0 %v12098_v19  ;;  %v2810_v6 = vld [vmem:[%s15621_s2 + $0x28] sm:$0xff] }
  0xe5   : > { %v12007_v53 = vpop.f32.mrf.mxu1  ;;  %9688 = vmatprep.subr.mxu0 %v12114_v56 }
  0xe6   : > { %9689 = vmatpush3.msra.mxu0 %v12114_v56 }
  0xe7   : > { %9638 = vmatmul.mubr.f32.gmra.mxu0 %v11857_v52  ;;  %v9297_v55 = vpop.f32.mrf.mxu1  ;;  %v3072_v52 = vand.u32 4294901760, %v3071_v58 }
  0xe8   : > { %v9258_v38 = vpop.f32.mrf.mxu0 }
  0xe9   : > { %v12010_v42 = vadd.f32 %v9294_v57, %v9258_v38  ;;  %v12012_v45 = vpop.f32.mrf.mxu1  ;;  %9732 = vmatprep.subr.mxu1 %v3072_v52  ;;  %v12138_v57 = vand.u32 4294901760, %v2813_v0  ;;  %v3099_v38 = vsub.f32 %v12105_v26, %v12122_v41 }
  0xea   : > { %v12014_v18 = vpop.f32.mrf.mxu0  ;;  %9733 = vmatpush3.msra.mxu1 %v3072_v52 }
  0xeb   : > { %v9300_v22 = vpop.f32.mrf.mxu1  ;;  %9734 = vmatprep.subr.mxu1 %v3079_v48  ;;  %16114 = vst [vmem:[#allocation22_spill] sm:$0xff] %v12138_v57  ;;  %v12153_v12 = vsub.f32 %v2813_v0, %v12138_v57  ;;  %9690 = vmatprep.subr.mxu0 %v12138_v57 }
  0xec   : > { %v9261_v34 = vpop.f32.mrf.mxu0  ;;  %9735 = vmatpush3.msra.mxu1 %v3079_v48  ;;  %9691 = vmatpush3.msra.mxu0 %v12138_v57  ;;  %v12177_v48 = vand.u32 4294901760, %v2811_v27 }
  0xed   : > { %v12016_v51 = vadd.f32 %v9297_v55, %v9261_v34  ;;  %v12018_v49 = vpop.f32.mrf.mxu1  ;;  %9736 = vmatprep.subr.mxu1 %v3086_v5  ;;  %v3093_v55 = vand.u32 4294901760, %v3092_v8  ;;  %16116 = vst [vmem:[#allocation24_spill] sm:$0xff] %v12153_v12 }
  0xee   : > { %v12020_v46 = vpop.f32.mrf.mxu0  ;;  %9737 = vmatpush3.msra.mxu1 %v3086_v5  ;;  %16120 = vst [vmem:[#allocation28_spill] sm:$0xff] %v12177_v48 }
  0xef   : > { %v9303_v35 = vpop.f32.mrf.mxu1  ;;  %9738 = vmatprep.subr.mxu1 %v3093_v55 }
  0xf0   : > { %v9264_v54 = vpop.f32.mrf.mxu0  ;;  %9739 = vmatpush3.msra.mxu1 %v3093_v55  ;;  %v12190_v55 = vand.u32 4294901760, %v2810_v6 }
  0xf1   : > { %v12030_v29 = vadd.f32 %v9300_v22, %v9264_v54  ;;  %v12032_v59 = vpop.f32.mrf.mxu1  ;;  %v2812_v22 = vld [vmem:[%s15621_s2 + $0x38] sm:$0xff]  ;;  %v12150_v54 = vand.u32 4294901760, %v12136_v60 }
  0xf2   : > { %v12040_v43 = vpop.f32.mrf.mxu0  ;;  %v12155_v17 = vand.u32 4294901760, %v2812_v22  ;;  %16122 = vst [vmem:[#allocation30_spill] sm:$0xff] %v12190_v55 }
  0xf3   : > { %v9306_v9 = vpop.f32.mrf.mxu1  ;;  %16115 = vst [vmem:[#allocation23_spill] sm:$0xff] %v12150_v54  ;;  %v3113_v7 = vsub.f32 %v12136_v60, %v12150_v54  ;;  %v2808_v54 = vld [vmem:[%s15621_s2 + $0x18] sm:$0xff] }
  0xf4   : > { %v9267_v61 = vpop.f32.mrf.mxu0  ;;  %16117 = vst [vmem:[#allocation25_spill] sm:$0xff] %v12155_v17  ;;  %v12174_v21 = vsub.f32 %v2812_v22, %v12155_v17  ;;  %9692 = vmatprep.subr.mxu0 %v12155_v17  ;;  %v12196_v22 = vsub.f32 %v2811_v27, %v12177_v48  ;;  %v12227_v41 = vand.u32 4294901760, %v2808_v54 }
  0xf5   : > { %v12059_v30 = vadd.f32 %v9303_v35, %v9267_v61  ;;  %v12061_v50 = vpop.f32.mrf.mxu1  ;;  %v3106_v35 = vsub.f32 %v12112_v24, %v12133_v40  ;;  %v3100_v61 = vand.u32 4294901760, %v3099_v38  ;;  %v3114_v5 = vand.u32 4294901760, %v3113_v7  ;;  %9693 = vmatpush3.msra.mxu0 %v12155_v17 }
  0xf6   : > { %v12078_v31 = vpop.f32.mrf.mxu0  ;;  %16119 = vst [vmem:[#allocation27_spill] sm:$0xff] %v12174_v21  ;;  %v12188_v0 = vand.u32 4294901760, %v12174_v21  ;;  %16123 = vst [vmem:[#allocation31_spill] sm:$0xff] %v12196_v22  ;;  %9694 = vmatprep.subr.mxu0 %v12177_v48 }
  0xf7   : > { %v9309_v63 = vpop.f32.mrf.mxu1  ;;  %v3107_v52 = vand.u32 4294901760, %v3106_v35  ;;  %9740 = vmatprep.subr.mxu1 %v3100_v61  ;;  %9695 = vmatpush3.msra.mxu0 %v12177_v48  ;;  %16129 = vst [vmem:[#allocation37_spill] sm:$0xff] %v12227_v41 }
  0xf8   : > { %9741 = vmatpush3.msra.mxu1 %v3100_v61  ;;  %16121 = vst [vmem:[#allocation29_spill] sm:$0xff] %v12188_v0  ;;  %9696 = vmatprep.subr.mxu0 %v12190_v55 }
  0xf9   : > { %v12094_v15 = vpop.f32.mrf.mxu1  ;;  %9742 = vmatprep.subr.mxu1 %v3107_v52  ;;  %9697 = vmatpush3.msra.mxu0 %v12190_v55 }
  0xfa   : > { %9743 = vmatpush3.msra.mxu1 %v3107_v52 }
  0xfb   : > { %v9270_v33 = vpop.f32.mrf.mxu0  ;;  %9744 = vmatprep.subr.mxu1 %v3114_v5 }
  0xfc   : > { %v9312_v62 = vpop.f32.mrf.mxu1  ;;  %v12117_v25 = vadd.f32 %v9306_v9, %v9270_v33  ;;  %9745 = vmatpush3.msra.mxu1 %v3114_v5 }
  0xfd   : > { %v12128_v13 = vpop.f32.mrf.mxu0 }
  0xfe   : > { %v12130_v39 = vpop.f32.mrf.mxu1 }
  0xff   : > { %v9273_v34 = vpop.f32.mrf.mxu0 }
 0x100   : > { %v9315_v2 = vpop.f32.mrf.mxu1  ;;  %v12158_v9 = vadd.f32 %v9309_v63, %v9273_v34  ;;  %v12171_v63 = vand.u32 4294901760, %v12153_v12  ;;  %v2809_v34 = vld [vmem:[%s15621_s2 + $0x20] sm:$0xff] }
 0x101   : > { %v12164_v58 = vpop.f32.mrf.mxu0  ;;  %v12211_v27 = vand.u32 4294901760, %v2809_v34 }
 0x102   : > { %v12166_v11 = vpop.f32.mrf.mxu1  ;;  %16118 = vst [vmem:[#allocation26_spill] sm:$0xff] %v12171_v63  ;;  %v3120_v8 = vsub.f32 %v12153_v12, %v12171_v63  ;;  %v12215_v63 = vand.u32 4294901760, %v12196_v22 }
 0x103   : > { %v9276_v28 = vpop.f32.mrf.mxu0  ;;  %16125 = vst [vmem:[#allocation33_spill] sm:$0xff] %v12211_v27  ;;  %v12225_v40 = vsub.f32 %v2809_v34, %v12211_v27  ;;  %9698 = vmatprep.subr.mxu0 %v12211_v27 }
 0x104   : > { %v12183_v33 = vpop.f32.mrf.mxu1  ;;  %v12193_v38 = vadd.f32 %v9312_v62, %v9276_v28  ;;  %v3121_v7 = vand.u32 4294901760, %v3120_v8  ;;  %v3127_v62 = vsub.f32 %v12174_v21, %v12188_v0  ;;  %v12209_v28 = vsub.f32 %v2810_v6, %v12190_v55  ;;  %16126 = vst [vmem:[#allocation34_spill] sm:$0xff] %v12215_v63  ;;  %9699 = vmatpush3.msra.mxu0 %v12211_v27  ;;  %v2806_v21 = vld [vmem:[%s15621_s2 + $0x8] sm:$0xff] }
 0x105   : > { %v12202_v35 = vpop.f32.mrf.mxu0  ;;  %16128 = vst [vmem:[#allocation36_spill] sm:$0xff] %v12225_v40  ;;  %v3134_v32 = vsub.f32 %v12196_v22, %v12215_v63  ;;  %v12242_v10 = vand.u32 4294901760, %v12225_v40  ;;  %9700 = vmatprep.subr.mxu0 %v12227_v41 }
 0x106   : > { %v12204_v61 = vpop.f32.mrf.mxu1  ;;  %16124 = vst [vmem:[#allocation32_spill] sm:$0xff] %v12209_v28  ;;  %v3128_v0 = vand.u32 4294901760, %v3127_v62  ;;  %v12222_v6 = vand.u32 4294901760, %v12209_v28  ;;  %9746 = vmatprep.subr.mxu1 %v3121_v7  ;;  %9701 = vmatpush3.msra.mxu0 %v12227_v41 }
 0x107   : > { %v9279_v52 = vpop.f32.mrf.mxu0  ;;  %9747 = vmatpush3.msra.mxu1 %v3121_v7  ;;  %16130 = vst [vmem:[#allocation38_spill] sm:$0xff] %v12242_v10  ;;  %v3135_v63 = vand.u32 4294901760, %v3134_v32 }
 0x108   : > { %v9369_v8 = vpop.f32.mrf.mxu1  ;;  %16127 = vst [vmem:[#allocation35_spill] sm:$0xff] %v12222_v6  ;;  %v12230_v23 = vadd.f32 %v9315_v2, %v9279_v52  ;;  %v3141_v34 = vsub.f32 %v12209_v28, %v12222_v6  ;;  %v12245_v2 = vsub.f32 %v2808_v54, %v12227_v41  ;;  %v2807_v52 = vld [vmem:[%s15621_s2 + $0x10] sm:$0xff]  ;;  %9748 = vmatprep.subr.mxu1 %v3128_v0 }
 0x109   : > { %v12235_v5 = vpop.f32.mrf.mxu0  ;;  %v12251_v47 = vand.u32 4294901760, %v2807_v52  ;;  %9749 = vmatpush3.msra.mxu1 %v3128_v0  ;;  %v3148_v54 = vsub.f32 %v12225_v40, %v12242_v10  ;;  %v12267_v0 = vand.u32 4294901760, %v2806_v21 }
 0x10a   : > { %v12237_v62 = vpop.f32.mrf.mxu1  ;;  %16131 = vst [vmem:[#allocation39_spill] sm:$0xff] %v12245_v2  ;;  %v3142_v28 = vand.u32 4294901760, %v3141_v34  ;;  %v12257_v22 = vand.u32 4294901760, %v12245_v2  ;;  %9750 = vmatprep.subr.mxu1 %v3135_v63 }
 0x10b   : > { %16132 = vst [vmem:[#allocation40_spill] sm:$0xff] %v12251_v47  ;;  %v9330_v7 = vpop.f32.mrf.mxu0  ;;  %v12265_v27 = vsub.f32 %v2807_v52, %v12251_v47  ;;  %16135 = vst [vmem:[#allocation43_spill] sm:$0xff] %v12267_v0  ;;  %9702 = vmatprep.subr.mxu0 %v12251_v47  ;;  %9751 = vmatpush3.msra.mxu1 %v3135_v63  ;;  %v3149_v40 = vand.u32 4294901760, %v3148_v54  ;;  %v12287_v41 = vsub.f32 %v2806_v21, %v12267_v0 }
 0x10c   : > { %v9372_v6 = vpop.f32.mrf.mxu1  ;;  %16133 = vst [vmem:[#allocation41_spill] sm:$0xff] %v12257_v22  ;;  %v915_v32 = vadd.f32 %v9330_v7, %v12010_v42  ;;  %v3155_v12 = vsub.f32 %v12245_v2, %v12257_v22  ;;  %v2805_v42 = vld [vmem:[%s15621_s2] sm:$0xff]  ;;  %9703 = vmatpush3.msra.mxu0 %v12251_v47  ;;  %9752 = vmatprep.subr.mxu1 %v3142_v28 }
 0x10d   : > { %16134 = vst [vmem:[#allocation42_spill] sm:$0xff] %v12265_v27  ;;  %v12270_v34 = vpop.f32.mrf.mxu0  ;;  %v12284_v7 = vand.u32 4294901760, %v12265_v27  ;;  %16137 = vst [vmem:[#allocation45_spill] sm:$0xff] %v12287_v41  ;;  %9704 = vmatprep.subr.mxu0 %v12267_v0  ;;  %9753 = vmatpush3.msra.mxu1 %v3142_v28  ;;  %v12290_v22 = vand.u32 4294901760, %v2805_v42 }
 0x10e   : > { %v12272_v10 = vpop.f32.mrf.mxu1  ;;  %v12281_v52 = vadd.f32 %v12183_v33, %v915_v32  ;;  %v3156_v54 = vand.u32 4294901760, %v3155_v12  ;;  %9705 = vmatpush3.msra.mxu0 %v12267_v0  ;;  %9754 = vmatprep.subr.mxu1 %v3149_v40  ;;  %v12297_v32 = vand.u32 4294901760, %v12287_v41 }
 0x10f   : > { %16136 = vst [vmem:[#allocation44_spill] sm:$0xff] %v12284_v7  ;;  %v9333_v63 = vpop.f32.mrf.mxu0  ;;  %16138 = vst [vmem:[#allocation46_spill] sm:$0xff] %v12290_v22  ;;  %v3162_v33 = vsub.f32 %v12265_v27, %v12284_v7  ;;  %9755 = vmatpush3.msra.mxu1 %v3149_v40  ;;  %v12302_v28 = vsub.f32 %v2805_v42, %v12290_v22  ;;  %9706 = vmatprep.subr.mxu0 %v12290_v22 }
 0x110   : > { %v929_v2 = vadd.f32 %v9333_v63, %v12016_v51  ;;  %16139 = vst [vmem:[#allocation47_spill] sm:$0xff] %v12297_v32  ;;  %9756 = vmatprep.subr.mxu1 %v3156_v54  ;;  %v3169_v51 = vsub.f32 %v12287_v41, %v12297_v32  ;;  %9707 = vmatpush3.msra.mxu0 %v12290_v22 }
 0x111   : > { %v12299_v21 = vpop.f32.mrf.mxu0  ;;  %v9375_v47 = vpop.f32.mrf.mxu1  ;;  %16140 = vst [vmem:[#allocation48_spill] sm:$0xff] %v12302_v28  ;;  %v3163_v0 = vand.u32 4294901760, %v3162_v33  ;;  %9757 = vmatpush3.msra.mxu1 %v3156_v54  ;;  %v12311_v27 = vand.u32 4294901760, %v12302_v28  ;;  %9788 = vmatprep.subr.mxu0 %v12035_v37 }
 0x112   : > { %v1116_v12 = vadd.f32 %v9369_v8, %v929_v2  ;;  %v3170_v8 = vand.u32 4294901760, %v3169_v51 }
 0x113   : > { %v9336_v63 = vpop.f32.mrf.mxu0  ;;  %v12308_v7 = vpop.f32.mrf.mxu1  ;;  %16141 = vst [vmem:[#allocation49_spill] sm:$0xff] %v12311_v27  ;;  %9758 = vmatprep.subr.mxu1 %v3163_v0  ;;  %v3176_v33 = vsub.f32 %v12302_v28, %v12311_v27 }
 0x114   : > { %v943_v40 = vadd.f32 %v9336_v63, %v12030_v29  ;;  %9759 = vmatpush3.msra.mxu1 %v3163_v0 }
 0x115   : > { %v12315_v2 = vpop.f32.mrf.mxu0  ;;  %v9378_v42 = vpop.f32.mrf.mxu1  ;;  %9760 = vmatprep.subr.mxu1 %v3170_v8  ;;  %v3177_v22 = vand.u32 4294901760, %v3176_v33 }
 0x116   : > { %v1132_v32 = vadd.f32 %v9372_v6, %v943_v40  ;;  %9761 = vmatpush3.msra.mxu1 %v3170_v8 }
 0x117   : > { %v9339_v41 = vpop.f32.mrf.mxu0  ;;  %v12319_v54 = vpop.f32.mrf.mxu1  ;;  %9762 = vmatprep.subr.mxu1 %v3177_v22 }
 0x118   : > { %v957_v55 = vadd.f32 %v9339_v41, %v12059_v30  ;;  %9763 = vmatpush3.msra.mxu1 %v3177_v22 }
 0x119   : > { %v12322_v60 = vpop.f32.mrf.mxu0  ;;  %v9381_v29 = vpop.f32.mrf.mxu1  ;;  %9844 = vmatprep.subr.mxu1 %v12025_v3 }
 0x11a   : > { %v1148_v51 = vadd.f32 %v9375_v47, %v957_v55 }
 0x11b   : > { %v9342_v63 = vpop.f32.mrf.mxu0  ;;  %v12324_v0 = vpop.f32.mrf.mxu1 }
 0x11c   : > { %v971_v6 = vadd.f32 %v9342_v63, %v12117_v25 }
 0x11d   : > { %v12328_v40 = vpop.f32.mrf.mxu0  ;;  %v9384_v27 = vpop.f32.mrf.mxu1 }
 0x11e   : > { %v1164_v8 = vadd.f32 %v9378_v42, %v971_v6 }
 0x11f   : > { %v9345_v33 = vpop.f32.mrf.mxu0  ;;  %v12330_v28 = vpop.f32.mrf.mxu1 }
 0x120   : > { %v985_v30 = vadd.f32 %v9345_v33, %v12158_v9 }
 0x121   : > { %v12333_v41 = vpop.f32.mrf.mxu0  ;;  %v9387_v47 = vpop.f32.mrf.mxu1 }
 0x122   : > { %v1180_v55 = vadd.f32 %v9381_v29, %v985_v30 }
 0x123   : > { %v9348_v22 = vpop.f32.mrf.mxu0  ;;  %v12335_v48 = vpop.f32.mrf.mxu1 }
 0x124   : > { %v999_v24 = vadd.f32 %v9348_v22, %v12193_v38 }
 0x125   : > { %v12338_v17 = vpop.f32.mrf.mxu0  ;;  %v9438_v25 = vpop.f32.mrf.mxu1 }
 0x126   : > { %v1196_v63 = vadd.f32 %v9384_v27, %v999_v24 }
 0x127   : > { %v9351_v26 = vpop.f32.mrf.mxu0  ;;  %v12340_v42 = vpop.f32.mrf.mxu1 }
 0x128   : > { %v1013_v6 = vadd.f32 %v9351_v26, %v12230_v23 }
 0x129   : > { %v12343_v57 = vpop.f32.mrf.mxu0  ;;  %v9441_v9 = vpop.f32.mrf.mxu1 }
 0x12a   : > { %v1212_v33 = vadd.f32 %v9387_v47, %v1013_v6 }
 0x12b   : > { %v9402_v44 = vpop.f32.mrf.mxu0  ;;  %v12345_v29 = vpop.f32.mrf.mxu1 }
 0x12c   : > { %v1307_v30 = vadd.f32 %v9402_v44, %v12281_v52 }
 0x12d   : > { %v12348_v56 = vpop.f32.mrf.mxu0  ;;  %v9444_v38 = vpop.f32.mrf.mxu1 }
 0x12e   : > { %v12350_v22 = vadd.f32 %v9438_v25, %v1307_v30 }
 0x12f   : > { %v9405_v24 = vpop.f32.mrf.mxu0  ;;  %v12352_v27 = vpop.f32.mrf.mxu1 }
 0x130   : > { %16142 = vst [vmem:[#allocation50_spill] sm:$0xff] %v12352_v27  ;;  %v1319_v1 = vadd.f32 %v9405_v24, %v1116_v12 }
 0x131   : > { %v12354_v19 = vpop.f32.mrf.mxu0  ;;  %v9447_v23 = vpop.f32.mrf.mxu1 }
 0x132   : > { %v12356_v26 = vadd.f32 %v9441_v9, %v1319_v1 }
 0x133   : > { %v9408_v47 = vpop.f32.mrf.mxu0  ;;  %v12358_v6 = vpop.f32.mrf.mxu1 }
 0x134   : > { %16143 = vst [vmem:[#allocation51_spill] sm:$0xff] %v12356_v26  ;;  %16144 = vst [vmem:[#allocation52_spill] sm:$0xff] %v12358_v6  ;;  %v1331_v4 = vadd.f32 %v9408_v47, %v1132_v32 }
 0x135   : > { %v12360_v16 = vpop.f32.mrf.mxu0  ;;  %v9450_v44 = vpop.f32.mrf.mxu1 }
 0x136   : > { %v12362_v52 = vadd.f32 %v9444_v38, %v1331_v4 }
 0x137   : > { %v9411_v25 = vpop.f32.mrf.mxu0  ;;  %v12364_v30 = vpop.f32.mrf.mxu1 }
 0x138   : > { %16145 = vst [vmem:[#allocation53_spill] sm:$0xff] %v12362_v52  ;;  %16146 = vst [vmem:[#allocation54_spill] sm:$0xff] %v12364_v30  ;;  %v1343_v37 = vadd.f32 %v9411_v25, %v1148_v51 }
 0x139   : > { %v12366_v36 = vpop.f32.mrf.mxu0  ;;  %v9453_v12 = vpop.f32.mrf.mxu1 }
 0x13a   : > { %v12368_v24 = vadd.f32 %v9447_v23, %v1343_v37 }
 0x13b   : > { %v9414_v1 = vpop.f32.mrf.mxu0  ;;  %v12370_v9 = vpop.f32.mrf.mxu1 }
 0x13c   : > { %16147 = vst [vmem:[#allocation55_spill] sm:$0xff] %v12368_v24  ;;  %16148 = vst [vmem:[#allocation56_spill] sm:$0xff] %v12370_v9  ;;  %v1355_v20 = vadd.f32 %v9414_v1, %v1164_v8 }
 0x13d   : > { %v12372_v14 = vpop.f32.mrf.mxu0  ;;  %v9456_v32 = vpop.f32.mrf.mxu1 }
 0x13e   : > { %v1522_v47 = vadd.f32 %v9450_v44, %v1355_v20 }
 0x13f   : > { %v9417_v3 = vpop.f32.mrf.mxu0  ;;  %v12374_v4 = vpop.f32.mrf.mxu1 }
 0x140   : > { %16149 = vst [vmem:[#allocation57_spill] sm:$0xff] %v12374_v4  ;;  %v1367_v38 = vadd.f32 %v9417_v3, %v1180_v55 }
 0x141   : > { %v12376_v52 = vpop.f32.mrf.mxu0  ;;  %v9459_v51 = vpop.f32.mrf.mxu1 }
 0x142   : > { %v1534_v25 = vadd.f32 %v9453_v12, %v1367_v38 }
 0x143   : > { %v9420_v30 = vpop.f32.mrf.mxu0  ;;  %v12378_v6 = vpop.f32.mrf.mxu1 }
 0x144   : > { %16150 = vst [vmem:[#allocation58_spill] sm:$0xff] %v12378_v6  ;;  %v1379_v37 = vadd.f32 %v9420_v30, %v1196_v63 }
 0x145   : > { %v12380_v23 = vpop.f32.mrf.mxu0  ;;  %v12382_v24 = vpop.f32.mrf.mxu1 }
 0x146   : > { %16151 = vst [vmem:[#allocation59_spill] sm:$0xff] %v12380_v23  ;;  %16152 = vst [vmem:[#allocation60_spill] sm:$0xff] %v12382_v24  ;;  %v1546_v8 = vadd.f32 %v9456_v32, %v1379_v37 }
 0x147   : > { %v9423_v1 = vpop.f32.mrf.mxu0  ;;  %v12384_v9 = vpop.f32.mrf.mxu1 }
 0x148   : > { %16153 = vst [vmem:[#allocation61_spill] sm:$0xff] %v12384_v9  ;;  %v1391_v20 = vadd.f32 %v9423_v1, %v1212_v33 }
 0x149   : > { %v12386_v44 = vpop.f32.mrf.mxu0  ;;  %v12388_v3 = vpop.f32.mrf.mxu1 }
 0x14a   : > { %16154 = vst [vmem:[#allocation62_spill] sm:$0xff] %v12386_v44  ;;  %16155 = vst [vmem:[#allocation63_spill] sm:$0xff] %v12388_v3  ;;  %v1558_v55 = vadd.f32 %v9459_v51, %v1391_v20 }
 0x14b   : > { %v12390_v4 = vpop.f32.mrf.mxu0  ;;  %v12392_v12 = vpop.f32.mrf.mxu1 }
 0x14c   : > { %16156 = vst [vmem:[#allocation64_spill] sm:$0xff] %v12392_v12 }
 0x14d   : > { %v12394_v38 = vpop.f32.mrf.mxu0  ;;  %v12396_v63 = vpop.f32.mrf.mxu1 }
 0x14e   : > { %16157 = vst [vmem:[#allocation65_spill] sm:$0xff] %v12396_v63 }
 0x14f   : > { %v12398_v30 = vpop.f32.mrf.mxu0  ;;  %v12400_v32 = vpop.f32.mrf.mxu1 }
 0x150   : > { %16158 = vst [vmem:[#allocation66_spill] sm:$0xff] %v12398_v30  ;;  %16159 = vst [vmem:[#allocation67_spill] sm:$0xff] %v12400_v32 }
 0x151   : > { %v12402_v37 = vpop.f32.mrf.mxu0  ;;  %v12404_v33 = vpop.f32.mrf.mxu1 }
 0x152   : > { %16160 = vst [vmem:[#allocation68_spill] sm:$0xff] %v12402_v37  ;;  %16161 = vst [vmem:[#allocation69_spill] sm:$0xff] %v12404_v33 }
 0x153   : > { %v12406_v1 = vpop.f32.mrf.mxu0  ;;  %v12408_v3 = vpop.f32.mrf.mxu1 }
 0x154   : > { %16162 = vst [vmem:[#allocation70_spill] sm:$0xff] %v12406_v1  ;;  %16163 = vst [vmem:[#allocation71_spill] sm:$0xff] %v12408_v3 }
 0x155   : > { %v12410_v51 = vpop.f32.mrf.mxu0  ;;  %v9522_v20 = vpop.f32.mrf.mxu1 }
 0x156   : > { %16164 = vst [vmem:[#allocation72_spill] sm:$0xff] %v12410_v51 }
 0x157   : > { %v12412_v12 = vpop.f32.mrf.mxu0  ;;  %v12414_v6 = vpop.f32.mrf.mxu1 }
 0x158   : > { %16165 = vst [vmem:[#allocation73_spill] sm:$0xff] %v12412_v12  ;;  %16166 = vst [vmem:[#allocation74_spill] sm:$0xff] %v12414_v6 }
 0x159   : > { %v12416_v63 = vpop.f32.mrf.mxu0  ;;  %v9525_v9 = vpop.f32.mrf.mxu1 }
 0x15a   : > { %16167 = vst [vmem:[#allocation75_spill] sm:$0xff] %v12416_v63 }
 0x15b   : > { %v9486_v30 = vpop.f32.mrf.mxu0  ;;  %v12418_v32 = vpop.f32.mrf.mxu1 }
 0x15c   : > { %16168 = vst [vmem:[#allocation76_spill] sm:$0xff] %v12418_v32  ;;  %v1780_v37 = vadd.f32 %v9486_v30, %v1522_v47 }
 0x15d   : > { %v12420_v26 = vpop.f32.mrf.mxu0  ;;  %v9528_v33 = vpop.f32.mrf.mxu1 }
 0x15e   : > { %v12422_v1 = vadd.f32 %v9522_v20, %v1780_v37 }
 0x15f   : > { %v9489_v3 = vpop.f32.mrf.mxu0  ;;  %v12424_v24 = vpop.f32.mrf.mxu1 }
 0x160   : > { %16169 = vst [vmem:[#allocation77_spill] sm:$0xff] %v12422_v1  ;;  %v1800_v51 = vadd.f32 %v9489_v3, %v1534_v25 }
 0x161   : > { %v12426_v27 = vpop.f32.mrf.mxu0  ;;  %v9531_v12 = vpop.f32.mrf.mxu1 }
 0x162   : > { %v12428_v6 = vadd.f32 %v9525_v9, %v1800_v51 }
 0x163   : > { %v9492_v63 = vpop.f32.mrf.mxu0  ;;  %v12430_v44 = vpop.f32.mrf.mxu1 }
 0x164   : > { %16170 = vst [vmem:[#allocation78_spill] sm:$0xff] %v12428_v6  ;;  %16171 = vst [vmem:[#allocation79_spill] sm:$0xff] %v12430_v44  ;;  %v1820_v23 = vadd.f32 %v9492_v63, %v1546_v8 }
 0x165   : > { %v12432_v32 = vpop.f32.mrf.mxu0  ;;  %v12434_v47 = vpop.f32.mrf.mxu1 }
 0x166   : > { %v12436_v30 = vadd.f32 %v9528_v33, %v1820_v23 }
 0x167   : > { %v9495_v37 = vpop.f32.mrf.mxu0  ;;  %v12438_v20 = vpop.f32.mrf.mxu1 }
 0x168   : > { %16172 = vst [vmem:[#allocation80_spill] sm:$0xff] %v12436_v30  ;;  %v1840_v1 = vadd.f32 %v9495_v37, %v1558_v55 }
 0x169   : > { %v12440_v25 = vpop.f32.mrf.mxu0  ;;  %v12442_v3 = vpop.f32.mrf.mxu1 }
 0x16a   : > { %16173 = vst [vmem:[#allocation81_spill] sm:$0xff] %v12442_v3  ;;  %v12444_v9 = vadd.f32 %v9531_v12, %v1840_v1  ;;  %v734_v1 = vadd.f32 %v12007_v53, %v12014_v18  ;;  %v770_v53 = vadd.f32 %v12032_v59, %v12078_v31  ;;  %v818_v59 = vadd.f32 %v12166_v11, %v12235_v5 }
 0x16b   : > { %v12446_v51 = vpop.f32.mrf.mxu0  ;;  %v12448_v6 = vpop.f32.mrf.mxu1 }
 0x16c   : > { %16174 = vst [vmem:[#allocation82_spill] sm:$0xff] %v12444_v9  ;;  %16175 = vst [vmem:[#allocation83_spill] sm:$0xff] %v12448_v6 }
 0x16d   : > { %v12450_v8 = vpop.f32.mrf.mxu0  ;;  %v12452_v63 = vpop.f32.mrf.mxu1 }
 0x16e   : > { %16176 = vst [vmem:[#allocation84_spill] sm:$0xff] %v12452_v63  ;;  %v746_v63 = vadd.f32 %v12012_v45, %v12020_v46  ;;  %v782_v45 = vadd.f32 %v12061_v50, %v12128_v13 }
 0x16f   : > { %v12454_v23 = vpop.f32.mrf.mxu0  ;;  %v12456_v33 = vpop.f32.mrf.mxu1 }
 0x170   : > { %16177 = vst [vmem:[#allocation85_spill] sm:$0xff] %v12456_v33  ;;  %v908_v33 = vadd.f32 %v12270_v34, %v734_v1  ;;  %v794_v1 = vadd.f32 %v12094_v15, %v12164_v58  ;;  %v964_v13 = vadd.f32 %v12328_v40, %v782_v45 }
 0x171   : > { %v12458_v30 = vpop.f32.mrf.mxu0  ;;  %v12460_v55 = vpop.f32.mrf.mxu1 }
 0x172   : > { %16178 = vst [vmem:[#allocation86_spill] sm:$0xff] %v12460_v55  ;;  %v758_v55 = vadd.f32 %v12018_v49, %v12040_v43  ;;  %v1092_v46 = vadd.f32 %v12204_v61, %v908_v33  ;;  %v806_v49 = vadd.f32 %v12130_v39, %v12202_v35  ;;  %v950_v43 = vadd.f32 %v12322_v60, %v770_v53 }
 0x173   : > { %v12462_v37 = vpop.f32.mrf.mxu0  ;;  %v12464_v12 = vpop.f32.mrf.mxu1  ;;  %v978_v15 = vadd.f32 %v12333_v41, %v794_v1  ;;  %v1006_v39 = vadd.f32 %v12343_v57, %v818_v59  ;;  %v1700_v41 = vadd.f32 %v12390_v4, %v12350_v22  ;;  %v16181_v4 = vld [vmem:[#allocation59_spill] sm:$0xff] }
 0x174   : > { %16179 = vst [vmem:[#allocation87_spill] sm:$0xff] %v12464_v12  ;;  %v922_v12 = vadd.f32 %v12299_v21, %v746_v63  ;;  %v936_v34 = vadd.f32 %v12315_v2, %v758_v55  ;;  %v1301_v61 = vadd.f32 %v12348_v56, %v1092_v46  ;;  %v992_v58 = vadd.f32 %v12338_v17, %v806_v49  ;;  %v16184_v46 = vld [vmem:[#allocation60_spill] sm:$0xff]  ;;  %v16185_v1 = vld [vmem:[#allocation51_spill] sm:$0xff] }
 0x175   : > { %v12468_v9 = vpop.f32.mrf.mxu0  ;;  %v12470_v6 = vpop.f32.mrf.mxu1  ;;  %v1156_v56 = vadd.f32 %v12319_v54, %v964_v13  ;;  %v1172_v63 = vadd.f32 %v12324_v0, %v978_v15 }
 0x176   : > { %16180 = vst [vmem:[#allocation88_spill] sm:$0xff] %v12470_v6  ;;  %v1108_v50 = vadd.f32 %v12237_v62, %v922_v12  ;;  %v1124_v60 = vadd.f32 %v12272_v10, %v936_v34  ;;  %v1140_v62 = vadd.f32 %v12308_v7, %v950_v43  ;;  %v1468_v17 = vadd.f32 %v12340_v42, %v1301_v61  ;;  %v16182_v12 = vld [vmem:[#allocation62_spill] sm:$0xff] }
 0x177   : > { %v12475_v3 = vpop.f32.mrf.mxu0  ;;  %v12477_v44 = vpop.f32.mrf.mxu1  ;;  %v1188_v10 = vadd.f32 %v12330_v28, %v992_v58  ;;  %v1349_v42 = vadd.f32 %v12372_v14, %v1156_v56  ;;  %v1361_v22 = vadd.f32 %v12376_v52, %v1172_v63  ;;  %v1947_v34 = vadd.f32 %v16184_v46, %v1700_v41  ;;  %v16187_v14 = vld [vmem:[#allocation68_spill] sm:$0xff]  ;;  %v16189_v52 = vld [vmem:[#allocation53_spill] sm:$0xff]  ;;  %v16191_v58 = vld [vmem:[#allocation54_spill] sm:$0xff] }
 0x178   : > { %v1313_v5 = vadd.f32 %v12354_v19, %v1108_v50  ;;  %v1325_v57 = vadd.f32 %v12360_v16, %v1124_v60  ;;  %v1204_v19 = vadd.f32 %v12335_v48, %v1006_v39  ;;  %v1337_v7 = vadd.f32 %v12366_v36, %v1140_v62  ;;  %v16183_v36 = vld [vmem:[#allocation50_spill] sm:$0xff]  ;;  %v16192_v60 = vld [vmem:[#allocation61_spill] sm:$0xff]  ;;  %v16193_v62 = vld [vmem:[#allocation72_spill] sm:$0xff] }
 0x179   : > { %v12484_v18 = vpop.f32.mrf.mxu0  ;;  %v12486_v6 = vpop.f32.mrf.mxu1  ;;  %v1690_v16 = vadd.f32 %v12394_v38, %v1468_v17  ;;  %v1373_v0 = vadd.f32 %v16181_v4, %v1188_v10  ;;  %v16188_v38 = vld [vmem:[#allocation52_spill] sm:$0xff]  ;;  %v16190_v50 = vld [vmem:[#allocation70_spill] sm:$0xff]  ;;  %v1516_v39 = vadd.f32 %v16191_v58, %v1349_v42  ;;  %v2122_v17 = vadd.f32 %v12446_v51, %v1947_v34  ;;  %v16195_v63 = vld [vmem:[#allocation57_spill] sm:$0xff] }
 0x17a   : > { %v1480_v54 = vadd.f32 %v12345_v29, %v1313_v5  ;;  %v1385_v28 = vadd.f32 %v16182_v12, %v1204_v19  ;;  %v1492_v45 = vadd.f32 %v16183_v36, %v1325_v57  ;;  %v16186_v29 = vld [vmem:[#allocation66_spill] sm:$0xff]  ;;  %v1504_v43 = vadd.f32 %v16188_v38, %v1337_v7  ;;  %v16194_v57 = vld [vmem:[#allocation56_spill] sm:$0xff]  ;;  %v16198_v4 = vld [vmem:[#allocation73_spill] sm:$0xff] }
 0x17b   : > { %v12499_v31 = vpop.f32.mrf.mxu0  ;;  %v12501_v21 = vpop.f32.mrf.mxu1  ;;  %v1720_v49 = vadd.f32 %v16186_v29, %v16185_v1  ;;  %v1740_v13 = vadd.f32 %v16190_v50, %v16189_v52  ;;  %v1941_v5 = vadd.f32 %v16192_v60, %v1690_v16  ;;  %v1528_v41 = vadd.f32 %v16194_v57, %v1361_v22  ;;  %v16196_v19 = vld [vmem:[#allocation58_spill] sm:$0xff]  ;;  %v16199_v1 = vld [vmem:[#allocation63_spill] sm:$0xff]  ;;  %v16200_v29 = vld [vmem:[#allocation64_spill] sm:$0xff] }
 0x17c   : > { %v1710_v59 = vadd.f32 %v16187_v14, %v1480_v54  ;;  %v1730_v56 = vadd.f32 %v16193_v62, %v1492_v45  ;;  %v1540_v10 = vadd.f32 %v16195_v63, %v1373_v0  ;;  %v1552_v7 = vadd.f32 %v16196_v19, %v1385_v28  ;;  %v16197_v54 = vld [vmem:[#allocation55_spill] sm:$0xff]  ;;  %v16202_v34 = vld [vmem:[#allocation65_spill] sm:$0xff] }
 0x17d   : > { %v12509_v35 = vpop.f32.mrf.mxu0  ;;  %v12511_v11 = vpop.f32.mrf.mxu1  ;;  %v1760_v12 = vadd.f32 %v16198_v4, %v16197_v54  ;;  %v1959_v42 = vadd.f32 %v16199_v1, %v1720_v49  ;;  %v16201_v14 = vld [vmem:[#allocation75_spill] sm:$0xff]  ;;  %v2115_v51 = vadd.f32 %v12450_v8, %v1941_v5  ;;  %v1971_v22 = vadd.f32 %v16202_v34, %v1740_v13  ;;  %v16204_v8 = vld [vmem:[#allocation69_spill] sm:$0xff] }
 0x17e   : > { %v1953_v16 = vadd.f32 %v16200_v29, %v1710_v59  ;;  %v1750_v45 = vadd.f32 %v16201_v14, %v1504_v43  ;;  %v1770_v0 = vadd.f32 %v12420_v26, %v1516_v39  ;;  %v1790_v28 = vadd.f32 %v12426_v27, %v1528_v41  ;;  %v16203_v58 = vld [vmem:[#allocation67_spill] sm:$0xff]  ;;  %v16211_v29 = vld [vmem:[#allocation84_spill] sm:$0xff]  ;;  %v16213_v34 = vld [vmem:[#allocation85_spill] sm:$0xff] }
 0x17f   : > { %v12516_v2 = vpop.f32.mrf.mxu0  ;;  %v12518_v40 = vpop.f32.mrf.mxu1  ;;  %v1810_v38 = vadd.f32 %v12432_v32, %v1540_v10  ;;  %v1965_v60 = vadd.f32 %v16203_v58, %v1730_v56  ;;  %v1830_v49 = vadd.f32 %v12440_v25, %v1552_v7  ;;  %v2307_v59 = vadd.f32 %v12434_v47, %v2122_v17  ;;  %v16205_v32 = vld [vmem:[#allocation71_spill] sm:$0xff]  ;;  %v16206_v25 = vld [vmem:[#allocation74_spill] sm:$0xff]  ;;  %v16207_v47 = vld [vmem:[#allocation76_spill] sm:$0xff] }
 0x180   : > { %v2136_v43 = vadd.f32 %v12454_v23, %v1959_v42  ;;  %v1983_v5 = vadd.f32 %v16204_v8, %v1760_v12  ;;  %v2129_v13 = vadd.f32 %v12458_v30, %v1953_v16  ;;  %v2150_v26 = vadd.f32 %v12462_v37, %v1971_v22  ;;  %v12591_v30 = vld [vmem:[%s15622_s3] ss:$0 sm:$0xff]  ;;  %v16208_v7 = vld [vmem:[#allocation79_spill] sm:$0xff]  ;;  %v16212_v16 = vld [vmem:[#allocation77_spill] sm:$0xff] }
 0x181   : > { %v12529_v33 = vpop.f32.mrf.mxu0  ;;  %v12531_v55 = vpop.f32.mrf.mxu1  ;;  %v1977_v62 = vadd.f32 %v16205_v32, %v1750_v45  ;;  %v2299_v57 = vadd.f32 %v12438_v20, %v2115_v51  ;;  %v2143_v56 = vadd.f32 %v12468_v9, %v1965_v60  ;;  %v1989_v63 = vadd.f32 %v16206_v25, %v1770_v0  ;;  %v16209_v9 = vld [vmem:[#allocation81_spill] sm:$0xff]  ;;  %v16210_v1 = vld [vmem:[#allocation83_spill] sm:$0xff]  ;;  %v16214_v58 = vld [vmem:[#allocation86_spill] sm:$0xff] }
 0x182   : > { %v2001_v17 = vadd.f32 %v16207_v47, %v1790_v28  ;;  %v2013_v23 = vadd.f32 %v12424_v24, %v1810_v38  ;;  %v2164_v10 = vadd.f32 %v12475_v3, %v1983_v5  ;;  %v12594_v20 = vadd.f32 %v16208_v7, %v1830_v49  ;;  %v16215_v49 = vld [vmem:[#allocation78_spill] sm:$0xff] }
 0x183   : > { %v12539_v53 = vpop.f32.mrf.mxu0  ;;  %v12541_v48 = vpop.f32.mrf.mxu1  ;;  %v2323_v54 = vadd.f32 %v16209_v9, %v2136_v43  ;;  %v2315_v42 = vadd.f32 %v16210_v1, %v2129_v13  ;;  %v2339_v24 = vadd.f32 %v16211_v29, %v2150_v26  ;;  %v2157_v3 = vadd.f32 %v12484_v18, %v1977_v62 }
 0x184   : > { %v2178_v14 = vadd.f32 %v12499_v31, %v16212_v16  ;;  %v2331_v22 = vadd.f32 %v16213_v34, %v2143_v56  ;;  %v2171_v60 = vadd.f32 %v12509_v35, %v1989_v63  ;;  %v2185_v18 = vadd.f32 %v12529_v33, %v2001_v17 }
 0x185   : > { %v12551_v61 = vpop.f32.mrf.mxu0  ;;  %v9654_v15 = vpop.f32.mrf.mxu1 }
 0x186   : > { %v2199_v35 = vadd.f32 %v12551_v61, %v2013_v23 }
 0x187   : > { %v12562_v36 = vpop.f32.mrf.mxu0  ;;  %v2674_v46 = vpop.f32.mrf.mxu1 }
 0x189   : > { %v12572_v52 = vpop.f32.mrf.mxu0  ;;  %v9657_v50 = vpop.f32.mrf.mxu1 }
 0x18b   : > { %v9618_v27 = vpop.f32.mrf.mxu0  ;;  %v2686_v39 = vpop.f32.mrf.mxu1 }
 0x18c   : > { %v2514_v41 = vadd.f32 %v9618_v27, %v2307_v59  ;;  %v2192_v59 = vadd.f32 %v12516_v2, %v16215_v49  ;;  %v16216_v27 = vld [vmem:[#allocation87_spill] sm:$0xff] }
 0x18d   : > { %v2507_v37 = vpop.f32.mrf.mxu0  ;;  %v9660_v19 = vpop.f32.mrf.mxu1  ;;  %v2347_v32 = vadd.f32 %v16216_v27, %v2157_v3  ;;  %v16219_v3 = vld [vmem:[#allocation82_spill] sm:$0xff]  ;;  %v16222_v27 = vld [vmem:[#allocation7_spill] sm:$0xff] }
 0x18e   : > { %v2681_v4 = vadd.f32 %v9654_v15, %v2514_v41  ;;  %v2508_v12 = vadd.f32 %v2507_v37, %v2299_v57  ;;  %v2355_v15 = vadd.f32 %v16214_v58, %v2164_v10  ;;  %v16218_v57 = vld [vmem:[#allocation80_spill] sm:$0xff]  ;;  %v12620_v17 = vadd.f32 %v12486_v6, %v2192_v59 }
 0x18f   : > { %v9621_v45 = vpop.f32.mrf.mxu0  ;;  %v2698_v51 = vpop.f32.mrf.mxu1  ;;  %v2206_v56 = vadd.f32 %v12539_v53, %v16218_v57  ;;  %v12623_v10 = vadd.f32 %v12501_v21, %v2185_v18  ;;  %v12635_v6 = vadd.f32 %v12518_v40, %v2199_v35 }
 0x190   : > { %v2774_v0 = vadd.f32 %v12591_v30, %v2681_v4  ;;  %v2675_v28 = vadd.f32 %v2674_v46, %v2508_v12  ;;  %v2526_v38 = vadd.f32 %v9621_v45, %v2323_v54  ;;  %v16217_v46 = vld [vmem:[#allocation88_spill] sm:$0xff] }
 0x191   : > { %v2519_v43 = vpop.f32.mrf.mxu0  ;;  %v9663_v8 = vpop.f32.mrf.mxu1  ;;  %v2371_v62 = vadd.f32 %v16217_v46, %v2178_v14 }
 0x192   : > { %v2790_v31 = vmax.f32 %v2774_v0, 0.0  ;;  %v2773_v5 = vadd.f32 %v12591_v30, %v2675_v28  ;;  %v2693_v13 = vadd.f32 %v9657_v50, %v2526_v38  ;;  %v2520_v26 = vadd.f32 %v2519_v43, %v2315_v42  ;;  %v16220_v38 = vld [vmem:[#allocation2_spill] sm:$0xff] }
 0x193   : > { %v9624_v41 = vpop.f32.mrf.mxu0  ;;  %v2710_v2 = vpop.f32.mrf.mxu1  ;;  %v2363_v50 = vadd.f32 %v12477_v44, %v2171_v60  ;;  %v16221_v60 = vld [vmem:[#allocation4_spill] sm:$0xff] }
 0x194   : > { %v12615_v25 = vand.u32 4294901760, %v2790_v31  ;;  %v2789_v33 = vmax.f32 %v2773_v5, 0.0  ;;  %v2776_v63 = vadd.f32 %v12591_v30, %v2693_v13  ;;  %v2687_v47 = vadd.f32 %v2686_v39, %v2520_v26 }
 0x195   : > { %v2538_v37 = vadd.f32 %v9624_v41, %v2339_v24  ;;  %v2531_v53 = vpop.f32.mrf.mxu0  ;;  %v9666_v7 = vpop.f32.mrf.mxu1  ;;  %v12632_v39 = vadd.f32 %v12511_v11, %v2206_v56  ;;  %v2220_v11 = vadd.f32 %v12562_v36, %v16219_v3 }
 0x196   : > { %v12626_v61 = vsub.f32 %v2790_v31, %v12615_v25  ;;  %v12628_v23 = vand.u32 4294901760, %v2789_v33  ;;  %v2792_v9 = vmax.f32 %v2776_v63, 0.0  ;;  %v2775_v54 = vadd.f32 %v12591_v30, %v2687_v47  ;;  %v16223_v63 = vld [vmem:[#allocation10_spill] sm:$0xff] }
 0x197   : > { %v2705_v44 = vadd.f32 %v9660_v19, %v2538_v37  ;;  %v2532_v21 = vadd.f32 %v2531_v53, %v2331_v22  ;;  %v9627_v4 = vpop.f32.mrf.mxu0  ;;  %v2722_v12 = vpop.f32.mrf.mxu1 }
 0x198   : > { %v2919_v1 = vand.u32 4294901760, %v12626_v61  ;;  %v12639_v42 = vsub.f32 %v2789_v33, %v12628_v23  ;;  %v12641_v29 = vand.u32 4294901760, %v2792_v9  ;;  %v2791_v24 = vmax.f32 %v2775_v54, 0.0  ;;  %9764 = vmatprep.mubr.f32.mxu1 %v12628_v23 }
 0x199   : > { %v2778_v40 = vadd.f32 %v12591_v30, %v2705_v44  ;;  %v2699_v16 = vadd.f32 %v2698_v51, %v2532_v21  ;;  %v2550_v19 = vadd.f32 %v9627_v4, %v2355_v15  ;;  %v2543_v14 = vpop.f32.mrf.mxu0  ;;  %9765 = vmatmul.mubr.f32.vlgmr.msra.gmra.mxu1 %v12615_v25  ;;  %v9669_v45 = vpop.f32.mrf.mxu1  ;;  %v12688_v54 = vadd.f32 %v12531_v55, %v2220_v11 }
 0x19a   : > { %v2920_v34 = vsub.f32 %v12626_v61, %v2919_v1  ;;  %v12652_v22 = vsub.f32 %v2792_v9, %v12641_v29  ;;  %v12654_v0 = vand.u32 4294901760, %v2791_v24  ;;  %v2544_v28 = vadd.f32 %v2543_v14, %v2347_v32  ;;  %9845 = vmatpush3.msra.mxu1 %v16220_v38 }
 0x19b   : > { %v2794_v36 = vmax.f32 %v2778_v40, 0.0  ;;  %v2777_v51 = vadd.f32 %v12591_v30, %v2699_v16  ;;  %v2717_v58 = vadd.f32 %v9663_v8, %v2550_v19  ;;  %v9630_v15 = vpop.f32.mrf.mxu0  ;;  %9846 = vmatprep.subr.mxu1 %v16221_v60  ;;  %v2909_v49 = vand.u32 4294901760, %v12639_v42  ;;  %v2734_v31 = vpop.f32.mrf.mxu1  ;;  %v16224_v16 = vld [vmem:[#allocation3_spill] sm:$0xff]  ;;  %v16225_v19 = vld [vmem:[#allocation13_spill] sm:$0xff] }
 0x19c   : > { %v12661_v59 = vsub.f32 %v2791_v24, %v12654_v0  ;;  %v2711_v18 = vadd.f32 %v2710_v2, %v2544_v28  ;;  %v2562_v43 = vadd.f32 %v9630_v15, %v2371_v62  ;;  %9767 = vmatprep.mubr.f32.mxu1 %v12654_v0  ;;  %9847 = vmatpush3.msra.mxu1 %v16221_v60  ;;  %v2921_v5 = vand.u32 4294901760, %v2920_v34 }
 0x19d   : > { %v2793_v13 = vmax.f32 %v2777_v51, 0.0  ;;  %v12666_v26 = vadd.f32 %v12591_v30, %v2717_v58  ;;  %v2555_v8 = vpop.f32.mrf.mxu0  ;;  %9768 = vmatmul.mubr.f32.gmra.mxu1 %v12641_v29  ;;  %9848 = vmatprep.subr.mxu1 %v16222_v27  ;;  %v2910_v32 = vsub.f32 %v12639_v42, %v2909_v49  ;;  %v12676_v35 = vand.u32 4294901760, %v2794_v36  ;;  %v9672_v9 = vpop.f32.mrf.mxu1 }
 0x19e   : > { %v2779_v46 = vadd.f32 %v12591_v30, %v2711_v18  ;;  %v2729_v62 = vadd.f32 %v9666_v7, %v2562_v43  ;;  %v2556_v57 = vadd.f32 %v2555_v8, %v2363_v50  ;;  %9849 = vmatpush3.msra.mxu1 %v16222_v27  ;;  %v2929_v56 = vand.u32 4294901760, %v12661_v59 }
 0x19f   : > { %v12678_v41 = vand.u32 4294901760, %v2793_v13  ;;  %v2796_v2 = vmax.f32 %v12666_v26, 0.0  ;;  %v9633_v33 = vpop.f32.mrf.mxu0  ;;  %9850 = vmatprep.subr.mxu1 %v16223_v63  ;;  %v2911_v47 = vand.u32 4294901760, %v2910_v32  ;;  %v12704_v11 = vsub.f32 %v2794_v36, %v12676_v35  ;;  %v2746_v15 = vpop.f32.mrf.mxu1 }
 0x1a0   : > { %v2795_v37 = vmax.f32 %v2779_v46, 0.0  ;;  %v12683_v53 = vadd.f32 %v12591_v30, %v2729_v62  ;;  %v2723_v7 = vadd.f32 %v2722_v12, %v2556_v57  ;;  %v2574_v50 = vadd.f32 %v9633_v33, %v12620_v17  ;;  %9851 = vmatpush3.msra.mxu1 %v16223_v63  ;;  %v16228_v62 = vld [vmem:[#allocation9_spill] sm:$0xff] }
 0x1a1   : > { %v12691_v44 = vsub.f32 %v2793_v13, %v12678_v41  ;;  %9708 = vmatprep.mubr.f32.mxu0 %v2911_v47  ;;  %9770 = vmatprep.mubr.f32.mxu1 %v12678_v41  ;;  %v2567_v21 = vpop.f32.mrf.mxu0  ;;  %v2930_v4 = vsub.f32 %v12661_v59, %v2929_v56  ;;  %v2939_v12 = vand.u32 4294901760, %v12652_v22  ;;  %v12714_v51 = vand.u32 4294901760, %v2796_v2 }
 0x1a2   : > { %v12698_v17 = vand.u32 4294901760, %v2795_v37  ;;  %v2798_v24 = vmax.f32 %v12683_v53, 0.0  ;;  %v2781_v55 = vadd.f32 %v12591_v30, %v2723_v7  ;;  %v2741_v3 = vadd.f32 %v9669_v45, %v2574_v50  ;;  %9709 = vmatmul.mubr.f32.vlgmr.msra.gmra.mxu0 %v2921_v5  ;;  %9771 = vmatmul.mubr.f32.gmra.mxu1 %v12676_v35  ;;  %v9675_v50 = vpop.f32.mrf.mxu1 }
 0x1a3   : > { %v2568_v40 = vadd.f32 %v2567_v21, %v12623_v10  ;;  %9789 = vmatpush3.msra.mxu0 %v16224_v16  ;;  %9852 = vmatprep.subr.mxu1 %v16225_v19  ;;  %v9636_v14 = vpop.f32.mrf.mxu0  ;;  %v2931_v34 = vand.u32 4294901760, %v2930_v4  ;;  %v2940_v28 = vsub.f32 %v12652_v22, %v2939_v12  ;;  %v2213_v45 = vadd.f32 %v12572_v52, %v12594_v20  ;;  %v16226_v10 = vld [vmem:[#allocation6_spill] sm:$0xff] }
 0x1a4   : > { %v2797_v58 = vmax.f32 %v2781_v55, 0.0  ;;  %v12717_v36 = vadd.f32 %v12591_v30, %v2741_v3  ;;  %9790 = vmatprep.subr.mxu0 %v16226_v10  ;;  %9853 = vmatpush3.msra.mxu1 %v16225_v19  ;;  %v12722_v18 = vsub.f32 %v2795_v37, %v12698_v17  ;;  %v2586_v5 = vadd.f32 %v9636_v14, %v12632_v39  ;;  %v16227_v52 = vld [vmem:[#allocation14_spill] sm:$0xff] }
 0x1a5   : > { %v2735_v43 = vadd.f32 %v2734_v31, %v2568_v40  ;;  %9791 = vmatpush3.msra.mxu0 %v16226_v10  ;;  %9854 = vmatprep.subr.mxu1 %v16227_v52  ;;  %v2579_v20 = vpop.f32.mrf.mxu0  ;;  %v2949_v13 = vand.u32 4294901760, %v12691_v44  ;;  %v12728_v26 = vand.u32 4294901760, %v2798_v24  ;;  %v2941_v46 = vand.u32 4294901760, %v2940_v28  ;;  %v16229_v4 = vld [vmem:[#allocation18_spill] sm:$0xff]  ;;  %v16230_v40 = vld [vmem:[#allocation12_spill] sm:$0xff] }
 0x1a6   : > { %v12730_v8 = vand.u32 4294901760, %v2797_v58  ;;  %9711 = vmatprep.mubr.f32.mxu0 %v2931_v34  ;;  %9773 = vmatprep.mubr.f32.mxu1 %v12698_v17  ;;  %v2580_v32 = vadd.f32 %v2579_v20, %v12635_v6  ;;  %v2753_v39 = vadd.f32 %v9672_v9, %v2586_v5  ;;  %v2959_v47 = vand.u32 4294901760, %v12704_v11  ;;  %v16232_v20 = vld [vmem:[#allocation16_spill] sm:$0xff] }
 0x1a7   : > { %v2783_v31 = vadd.f32 %v12591_v30, %v2735_v43  ;;  %9792 = vmatprep.subr.mxu0 %v16228_v62  ;;  %9855 = vmatpush3.msra.mxu1 %v16227_v52  ;;  %v9639_v57 = vpop.f32.mrf.mxu0  ;;  %v2950_v33 = vsub.f32 %v12691_v44, %v2949_v13  ;;  %v2411_v37 = vadd.f32 %v12541_v48, %v2213_v45  ;;  %v2800_v6 = vmax.f32 %v12717_v36, 0.0 }
 0x1a8   : > { %v12743_v53 = vsub.f32 %v2796_v2, %v12714_v51  ;;  %v2747_v7 = vadd.f32 %v2746_v15, %v2580_v32  ;;  %9712 = vmatmul.mubr.f32.gmra.mxu0 %v2941_v46  ;;  %9774 = vmatmul.mubr.f32.gmra.mxu1 %v12714_v51  ;;  %v12748_v9 = vsub.f32 %v2797_v58, %v12730_v8  ;;  %v2969_v14 = vand.u32 4294901760, %v12722_v18  ;;  %v16231_v58 = vld [vmem:[#allocation22_spill] sm:$0xff]  ;;  %v2758_v15 = vpop.f32.mrf.mxu1 }
 0x1a9   : > { %v2799_v21 = vmax.f32 %v2783_v31, 0.0  ;;  %9793 = vmatpush3.msra.mxu0 %v16228_v62  ;;  %9856 = vmatprep.subr.mxu1 %v16229_v4  ;;  %v2951_v55 = vand.u32 4294901760, %v2950_v33  ;;  %v2591_v48 = vpop.f32.mrf.mxu0  ;;  %v2960_v2 = vsub.f32 %v12704_v11, %v2959_v47  ;;  %v2598_v16 = vadd.f32 %v9639_v57, %v12688_v54 }
 0x1aa   : > { %v2785_v3 = vadd.f32 %v12591_v30, %v2747_v7  ;;  %9794 = vmatprep.subr.mxu0 %v16230_v40  ;;  %9857 = vmatpush3.msra.mxu1 %v16229_v4  ;;  %v12761_v34 = vsub.f32 %v2798_v24, %v12728_v26  ;;  %v2786_v45 = vadd.f32 %v12591_v30, %v2753_v39  ;;  %v15762_v43 = vand.u32 4294901760, %v12743_v53 }
 0x1ab   : > { %v12763_v28 = vand.u32 4294901760, %v2799_v21  ;;  %9795 = vmatpush3.msra.mxu0 %v16230_v40  ;;  %9858 = vmatprep.subr.mxu1 %v16231_v58  ;;  %v2592_v36 = vadd.f32 %v2591_v48, %v2411_v37  ;;  %v2961_v54 = vand.u32 4294901760, %v2960_v2  ;;  %v2970_v24 = vsub.f32 %v12722_v18, %v2969_v14  ;;  %v16233_v37 = vld [vmem:[#allocation25_spill] sm:$0xff] }
 0x1ac   : > { %v2801_v10 = vmax.f32 %v2785_v3, 0.0  ;;  %9714 = vmatprep.mubr.f32.mxu0 %v2951_v55  ;;  %9776 = vmatprep.mubr.f32.mxu1 %v12730_v8  ;;  %v12773_v5 = vand.u32 4294901760, %v2800_v6  ;;  %v15758_v46 = vand.u32 4294901760, %v12748_v9  ;;  %v2765_v39 = vadd.f32 %v9675_v50, %v2598_v16  ;;  %v16235_v3 = vld [vmem:[#allocation28_spill] sm:$0xff] }
 0x1ad   : > { %9796 = vmatprep.subr.mxu0 %v16232_v20  ;;  %9859 = vmatpush3.msra.mxu1 %v16231_v58  ;;  %v2759_v32 = vadd.f32 %v2758_v15, %v2592_v36  ;;  %v12779_v31 = vsub.f32 %v2799_v21, %v12763_v28  ;;  %v2971_v62 = vand.u32 4294901760, %v2970_v24  ;;  %v2980_v57 = vsub.f32 %v12743_v53, %v15762_v43  ;;  %v16234_v21 = vld [vmem:[#allocation17_spill] sm:$0xff] }
 0x1ae   : > { %9715 = vmatmul.mubr.f32.gmra.mxu0 %v2961_v54  ;;  %9777 = vmatmul.mubr.f32.gmra.mxu1 %v12728_v26  ;;  %v2802_v7 = vmax.f32 %v2786_v45, 0.0  ;;  %v12788_v55 = vand.u32 4294901760, %v2801_v10  ;;  %v2990_v50 = vsub.f32 %v12748_v9, %v15758_v46  ;;  %v15757_v48 = vand.u32 4294901760, %v12761_v34  ;;  %v16236_v15 = vld [vmem:[#allocation21_spill] sm:$0xff]  ;;  %v16244_v46 = vld [vmem:[#allocation32_spill] sm:$0xff] }
 0x1af   : > { %v2787_v33 = vadd.f32 %v12591_v30, %v2759_v32  ;;  %9797 = vmatpush3.msra.mxu0 %v16232_v20  ;;  %9860 = vmatprep.subr.mxu1 %v16233_v37  ;;  %v12797_v2 = vsub.f32 %v2800_v6, %v12773_v5  ;;  %v2788_v40 = vadd.f32 %v12591_v30, %v2765_v39  ;;  %v2981_v45 = vand.u32 4294901760, %v2980_v57  ;;  %v16237_v20 = vld [vmem:[#allocation30_spill] sm:$0xff] }
 0x1b0   : > { %9798 = vmatprep.subr.mxu0 %v16234_v21  ;;  %9861 = vmatpush3.msra.mxu1 %v16233_v37  ;;  %v15755_v36 = vand.u32 4294901760, %v12779_v31  ;;  %v12806_v54 = vand.u32 4294901760, %v2802_v7  ;;  %v12809_v6 = vsub.f32 %v2801_v10, %v12788_v55  ;;  %v2991_v30 = vand.u32 4294901760, %v2990_v50 }
 0x1b1   : > { %9799 = vmatpush3.msra.mxu0 %v16234_v21  ;;  %9862 = vmatprep.subr.mxu1 %v16235_v3  ;;  %v2803_v16 = vmax.f32 %v2787_v33, 0.0  ;;  %v3000_v24 = vsub.f32 %v12761_v34, %v15757_v48  ;;  %v2804_v32 = vmax.f32 %v2788_v40, 0.0  ;;  %v15756_v57 = vand.u32 4294901760, %v12797_v2  ;;  %v16239_v33 = vld [vmem:[#allocation33_spill] sm:$0xff] }
 0x1b2   : > { %9717 = vmatprep.mubr.f32.mxu0 %v2971_v62  ;;  %9779 = vmatprep.mubr.f32.mxu1 %v12763_v28  ;;  %v16238_v62 = vld [vmem:[#allocation24_spill] sm:$0xff]  ;;  %v3010_v10 = vsub.f32 %v12779_v31, %v15755_v36  ;;  %v12828_v21 = vsub.f32 %v2802_v7, %v12806_v54  ;;  %v15759_v40 = vand.u32 4294901760, %v12809_v6 }
 0x1b3   : > { %9800 = vmatprep.subr.mxu0 %v16236_v15  ;;  %9863 = vmatpush3.msra.mxu1 %v16235_v3  ;;  %v12817_v39 = vand.u32 4294901760, %v2803_v16  ;;  %v3001_v50 = vand.u32 4294901760, %v3000_v24  ;;  %v16241_v24 = vld [vmem:[#allocation37_spill] sm:$0xff] }
 0x1b4   : > { %9718 = vmatmul.mubr.f32.gmra.mxu0 %v2981_v45  ;;  %9780 = vmatmul.mubr.f32.gmra.mxu1 %v12773_v5  ;;  %v16240_v45 = vld [vmem:[#allocation27_spill] sm:$0xff]  ;;  %v3011_v7 = vand.u32 4294901760, %v3010_v10  ;;  %v16243_v10 = vld [vmem:[#allocation40_spill] sm:$0xff] }
 0x1b5   : > { %9801 = vmatpush3.msra.mxu0 %v16236_v15  ;;  %9864 = vmatprep.subr.mxu1 %v16237_v20  ;;  %v12834_v15 = vand.u32 4294901760, %v2804_v32  ;;  %v12837_v36 = vsub.f32 %v2803_v16, %v12817_v39  ;;  %v3030_v16 = vsub.f32 %v12809_v6, %v15759_v40 }
 0x1b6   : > { %9802 = vmatprep.subr.mxu0 %v16238_v62  ;;  %9865 = vmatpush3.msra.mxu1 %v16237_v20 }
 0x1b7   : > { %9803 = vmatpush3.msra.mxu0 %v16238_v62  ;;  %9866 = vmatprep.subr.mxu1 %v16239_v33  ;;  %v16242_v62 = vld [vmem:[#allocation31_spill] sm:$0xff]  ;;  %v15761_v48 = vand.u32 4294901760, %v12837_v36  ;;  %v3031_v40 = vand.u32 4294901760, %v3030_v16  ;;  %v16247_v16 = vld [vmem:[#allocation46_spill] sm:$0xff] }
 0x1b8   : > { %9720 = vmatprep.mubr.f32.mxu0 %v2991_v30  ;;  %9782 = vmatprep.mubr.f32.mxu1 %v12788_v55  ;;  %v3020_v30 = vsub.f32 %v12797_v2, %v15756_v57  ;;  %v12854_v57 = vsub.f32 %v2804_v32, %v12834_v15  ;;  %v16245_v32 = vld [vmem:[#allocation43_spill] sm:$0xff] }
 0x1b9   : > { %9804 = vmatprep.subr.mxu0 %v16240_v45  ;;  %9867 = vmatpush3.msra.mxu1 %v16239_v33 }
 0x1ba   : > { %9721 = vmatmul.mubr.f32.gmra.mxu0 %v3001_v50  ;;  %9783 = vmatmul.mubr.f32.gmra.mxu1 %v12806_v54  ;;  %v15760_v50 = vand.u32 4294901760, %v12828_v21 }
 0x1bb   : > { %9805 = vmatpush3.msra.mxu0 %v16240_v45  ;;  %9868 = vmatprep.subr.mxu1 %v16241_v24  ;;  %v3021_v45 = vand.u32 4294901760, %v3020_v30  ;;  %v3050_v30 = vsub.f32 %v12837_v36, %v15761_v48 }
 0x1bc   : > { %9806 = vmatprep.subr.mxu0 %v16242_v62  ;;  %9869 = vmatpush3.msra.mxu1 %v16241_v24 }
 0x1bd   : > { %9807 = vmatpush3.msra.mxu0 %v16242_v62  ;;  %9870 = vmatprep.subr.mxu1 %v16243_v10  ;;  %v3040_v62 = vsub.f32 %v12828_v21, %v15760_v50  ;;  %v16248_v50 = vld [vmem:[#allocation39_spill] sm:$0xff]  ;;  %v3051_v48 = vand.u32 4294901760, %v3050_v30  ;;  %v8183_v30 = vld [vmem:[%s15621_s2 + $0xc0] sm:$0xff] }
 0x1be   : > { %9723 = vmatprep.mubr.f32.mxu0 %v3011_v7  ;;  %9785 = vmatprep.mubr.f32.mxu1 %v12817_v39  ;;  %v16246_v7 = vld [vmem:[#allocation36_spill] sm:$0xff] }
 0x1bf   : > { %9808 = vmatprep.subr.mxu0 %v16244_v46  ;;  %9871 = vmatpush3.msra.mxu1 %v16243_v10 }
 0x1c0   : > { %9724 = vmatmul.mubr.f32.gmra.mxu0 %v3021_v45  ;;  %9786 = vmatmul.mubr.f32.gmra.mxu1 %v12834_v15  ;;  %v3059_v45 = vand.u32 4294901760, %v12854_v57 }
 0x1c1   : > { %9809 = vmatpush3.msra.mxu0 %v16244_v46  ;;  %9872 = vmatprep.subr.mxu1 %v16245_v32  ;;  %v3041_v46 = vand.u32 4294901760, %v3040_v62 }
 0x1c2   : > { %9810 = vmatprep.subr.mxu0 %v16246_v7  ;;  %9873 = vmatpush3.msra.mxu1 %v16245_v32  ;;  %v3060_v43 = vsub.f32 %v12854_v57, %v3059_v45 }
 0x1c3   : > { %9876 = vmatprep.mubr.f32.mxu1 %v2909_v49  ;;  %9811 = vmatpush3.msra.mxu0 %v16246_v7  ;;  %v16249_v49 = vld [vmem:[#allocation42_spill] sm:$0xff] }
 0x1c4   : > { %9874 = vmatprep.subr.mxu1 %v16247_v16  ;;  %9726 = vmatprep.mubr.f32.mxu0 %v3031_v40  ;;  %v16250_v40 = vld [vmem:[#allocation45_spill] sm:$0xff] }
 0x1c5   : > { %9812 = vmatprep.subr.mxu0 %v16248_v50  ;;  %9875 = vmatpush3.msra.mxu1 %v16247_v16 }
 0x1c6   : > { %9727 = vmatmul.mubr.f32.gmra.mxu0 %v3041_v46  ;;  %9877 = vmatmul.mubr.f32.vlgmr.msra.gmra.mxu1 %v2919_v1  ;;  %v3061_v1 = vand.u32 4294901760, %v3060_v43  ;;  %v16274_v43 = vld [vmem:[#allocation47_spill] sm:$0xff] }
 0x1c7   : > { %9813 = vmatpush3.msra.mxu0 %v16248_v50  ;;  %9956 = vmatprep.subr.mxu1 %v16220_v38 }
 0x1c8   : > { %9814 = vmatprep.subr.mxu0 %v16249_v49  ;;  %9879 = vmatprep.mubr.f32.mxu1 %v2929_v56  ;;  %v16251_v56 = vld [vmem:[#allocation48_spill] sm:$0xff] }
 0x1c9   : > { %9957 = vmatpush3.msra.mxu1 %v16220_v38  ;;  %9815 = vmatpush3.msra.mxu0 %v16249_v49  ;;  %v16252_v38 = vld [vmem:[#allocation5_spill] sm:$0xff]  ;;  %v13126_v49 = vand.u32 4294901760, %v8183_v30 }
 0x1ca   : > { %9958 = vmatprep.subr.mxu1 %v16221_v60  ;;  %9729 = vmatprep.mubr.f32.mxu0 %v3051_v48  ;;  %v8186_v48 = vld [vmem:[%s15621_s2 + $0xd8] sm:$0xff] }
 0x1cb   : > { %9816 = vmatprep.subr.mxu0 %v16250_v40  ;;  %9959 = vmatpush3.msra.mxu1 %v16221_v60  ;;  %v16255_v60 = vand.u32 4294901760, %v12743_v53  ;;  %16294 = vst [vmem:[#allocation63_spill] sm:$0xff] %v13126_v49 }
 0x1cc   : > { %9730 = vmatmul.mubr.f32.gmra.mxu0 %v3061_v1  ;;  %9880 = vmatmul.mubr.f32.gmra.mxu1 %v2939_v12  ;;  %v16261_v12 = vld [vmem:[#allocation20_spill] sm:$0xff] }
 0x1cd   : > { %9817 = vmatpush3.msra.mxu0 %v16250_v40  ;;  %9960 = vmatprep.subr.mxu1 %v16222_v27  ;;  %v8182_v40 = vld [vmem:[%s15621_s2 + $0xb8] sm:$0xff] }
 0x1ce   : > { %9818 = vmatprep.subr.mxu0 %v16251_v56  ;;  %9820 = vmatprep.mubr.f32.mxu0 %v12639_v42  ;;  %v16253_v42 = vld [vmem:[#allocation8_spill] sm:$0xff] }
 0x1cf   : > { %9882 = vmatprep.mubr.f32.mxu1 %v2949_v13  ;;  %9961 = vmatpush3.msra.mxu1 %v16222_v27  ;;  %v16257_v27 = vld [vmem:[#allocation15_spill] sm:$0xff]  ;;  %v16266_v13 = vld [vmem:[#allocation29_spill] sm:$0xff] }
 0x1d0   : > { %9819 = vmatpush3.msra.mxu0 %v16251_v56  ;;  %9962 = vmatprep.subr.mxu1 %v16223_v63 }
 0x1d1   : > { %9900 = vmatprep.subr.mxu0 %v16252_v38  ;;  %9963 = vmatpush3.msra.mxu1 %v16223_v63  ;;  %v16259_v63 = vand.u32 4294901760, %v12761_v34 }
 0x1d2   : > { %9821 = vmatmul.mubr.f32.vlgmr.msra.gmra.mxu0 %v12626_v61  ;;  %9883 = vmatmul.mubr.f32.gmra.mxu1 %v2959_v47  ;;  %v16254_v61 = vld [vmem:[#allocation11_spill] sm:$0xff]  ;;  %v16267_v47 = vand.u32 4294901760, %v12828_v21 }
 0x1d3   : > { %9901 = vmatpush3.msra.mxu0 %v16252_v38  ;;  %9964 = vmatprep.subr.mxu1 %v16225_v19 }
 0x1d4   : > { %9823 = vmatprep.mubr.f32.mxu0 %v12661_v59  ;;  %9885 = vmatprep.mubr.f32.mxu1 %v2969_v14  ;;  %v16256_v59 = vand.u32 4294901760, %v12748_v9  ;;  %v16271_v14 = vld [vmem:[#allocation38_spill] sm:$0xff] }
 0x1d5   : > { %9902 = vmatprep.subr.mxu0 %v16253_v42  ;;  %9965 = vmatpush3.msra.mxu1 %v16225_v19  ;;  %v16263_v19 = vand.u32 4294901760, %v12797_v2 }
 0x1d6   : > { %9903 = vmatpush3.msra.mxu0 %v16253_v42  ;;  %9966 = vmatprep.subr.mxu1 %v16227_v52  ;;  %v13141_v42 = vsub.f32 %v8183_v30, %v13126_v49 }
 0x1d7   : > { %9904 = vmatprep.subr.mxu0 %v16254_v61  ;;  %9967 = vmatpush3.msra.mxu1 %v16227_v52  ;;  %v16265_v52 = vld [vmem:[#allocation26_spill] sm:$0xff] }
 0x1d8   : > { %9824 = vmatmul.mubr.f32.gmra.mxu0 %v12652_v22  ;;  %9886 = vmatmul.mubr.f32.gmra.mxu1 %v16255_v60  ;;  %v16258_v22 = vld [vmem:[#allocation19_spill] sm:$0xff]  ;;  %16296 = vst [vmem:[#allocation75_spill] sm:$0xff] %v13141_v42 }
 0x1d9   : > { %9905 = vmatpush3.msra.mxu0 %v16254_v61  ;;  %9968 = vmatprep.subr.mxu1 %v16229_v4  ;;  %v13143_v61 = vand.u32 4294901760, %v8182_v40 }
 0x1da   : > { %9826 = vmatprep.mubr.f32.mxu0 %v12691_v44  ;;  %9888 = vmatprep.mubr.f32.mxu1 %v16256_v59  ;;  %v16260_v44 = vand.u32 4294901760, %v12779_v31  ;;  %v8181_v59 = vld [vmem:[%s15621_s2 + $0xb0] sm:$0xff] }
 0x1db   : > { %9906 = vmatprep.subr.mxu0 %v16257_v27  ;;  %9969 = vmatpush3.msra.mxu1 %v16229_v4  ;;  %v16270_v4 = vld [vmem:[#allocation35_spill] sm:$0xff]  ;;  %16297 = vst [vmem:[#allocation65_spill] sm:$0xff] %v13143_v61 }
 0x1dc   : > { %9907 = vmatpush3.msra.mxu0 %v16257_v27  ;;  %9970 = vmatprep.subr.mxu1 %v16231_v58 }
 0x1dd   : > { %9908 = vmatprep.subr.mxu0 %v16258_v22  ;;  %9971 = vmatpush3.msra.mxu1 %v16231_v58  ;;  %v16273_v58 = vld [vmem:[#allocation44_spill] sm:$0xff] }
 0x1de   : > { %9827 = vmatmul.mubr.f32.gmra.mxu0 %v12704_v11  ;;  %9889 = vmatmul.mubr.f32.gmra.mxu1 %v16259_v63  ;;  %v16262_v11 = vld [vmem:[#allocation23_spill] sm:$0xff]  ;;  %v13153_v63 = vand.u32 4294901760, %v13141_v42 }
 0x1df   : > { %9909 = vmatpush3.msra.mxu0 %v16258_v22  ;;  %9972 = vmatprep.subr.mxu1 %v16233_v37 }
 0x1e0   : > { %9829 = vmatprep.mubr.f32.mxu0 %v12722_v18  ;;  %9891 = vmatprep.mubr.f32.mxu1 %v16260_v44  ;;  %v16264_v18 = vand.u32 4294901760, %v12809_v6  ;;  %16298 = vst [vmem:[#allocation67_spill] sm:$0xff] %v13153_v63  ;;  %v13156_v44 = vsub.f32 %v8182_v40, %v13143_v61 }
 0x1e1   : > { %9910 = vmatprep.subr.mxu0 %v16261_v12  ;;  %9973 = vmatpush3.msra.mxu1 %v16233_v37 }
 0x1e2   : > { %9911 = vmatpush3.msra.mxu0 %v16261_v12  ;;  %9974 = vmatprep.subr.mxu1 %v16235_v3  ;;  %16299 = vst [vmem:[#allocation69_spill] sm:$0xff] %v13156_v44  ;;  %v13159_v12 = vand.u32 4294901760, %v8181_v59 }
 0x1e3   : > { %9912 = vmatprep.subr.mxu0 %v16262_v11  ;;  %9975 = vmatpush3.msra.mxu1 %v16235_v3 }
 0x1e4   : > { %9830 = vmatmul.mubr.f32.gmra.mxu0 %v12743_v53  ;;  %9892 = vmatmul.mubr.f32.gmra.mxu1 %v16263_v19  ;;  %v16268_v53 = vand.u32 4294901760, %v12837_v36  ;;  %16300 = vst [vmem:[#allocation71_spill] sm:$0xff] %v13159_v12 }
 0x1e5   : > { %9913 = vmatpush3.msra.mxu0 %v16262_v11  ;;  %9976 = vmatprep.subr.mxu1 %v16237_v20  ;;  %v8180_v11 = vld [vmem:[%s15621_s2 + $0xa8] sm:$0xff] }
 0x1e6   : > { %9832 = vmatprep.mubr.f32.mxu0 %v12748_v9  ;;  %9894 = vmatprep.mubr.f32.mxu1 %v16264_v18  ;;  %v16269_v9 = vld [vmem:[#allocation34_spill] sm:$0xff]  ;;  %v4444_v18 = vsub.f32 %v13141_v42, %v13153_v63 }
 0x1e7   : > { %9914 = vmatprep.subr.mxu0 %v16265_v52  ;;  %9977 = vmatpush3.msra.mxu1 %v16237_v20  ;;  %v8185_v20 = vld [vmem:[%s15621_s2 + $0xd0] sm:$0xff] }
 0x1e8   : > { %9915 = vmatpush3.msra.mxu0 %v16265_v52  ;;  %9978 = vmatprep.subr.mxu1 %v16239_v33  ;;  %v13168_v52 = vand.u32 4294901760, %v13156_v44 }
 0x1e9   : > { %9916 = vmatprep.subr.mxu0 %v16266_v13  ;;  %9979 = vmatpush3.msra.mxu1 %v16239_v33 }
 0x1ea   : > { %9833 = vmatmul.mubr.f32.gmra.mxu0 %v12761_v34  ;;  %9895 = vmatmul.mubr.f32.gmra.mxu1 %v16267_v47  ;;  %v16272_v34 = vld [vmem:[#allocation41_spill] sm:$0xff]  ;;  %16301 = vst [vmem:[#allocation74_spill] sm:$0xff] %v13168_v52  ;;  %v13174_v47 = vsub.f32 %v8181_v59, %v13159_v12 }
 0x1eb   : > { %9917 = vmatpush3.msra.mxu0 %v16266_v13  ;;  %9980 = vmatprep.subr.mxu1 %v16241_v24  ;;  %v13170_v13 = vand.u32 4294901760, %v8180_v11 }
 0x1ec   : > { %9835 = vmatprep.mubr.f32.mxu0 %v12779_v31  ;;  %9897 = vmatprep.mubr.f32.mxu1 %v16268_v53  ;;  %v16275_v31 = vld [vmem:[#allocation49_spill] sm:$0xff]  ;;  %16303 = vst [vmem:[#allocation79_spill] sm:$0xff] %v13174_v47  ;;  %v8179_v53 = vld [vmem:[%s15621_s2 + $0xa0] sm:$0xff] }
 0x1ed   : > { %9918 = vmatprep.subr.mxu0 %v16269_v9  ;;  %9981 = vmatpush3.msra.mxu1 %v16241_v24  ;;  %v8184_v24 = vld [vmem:[%s15621_s2 + $0xc8] sm:$0xff]  ;;  %16302 = vst [vmem:[#allocation76_spill] sm:$0xff] %v13170_v13 }
 0x1ee   : > { %9919 = vmatpush3.msra.mxu0 %v16269_v9  ;;  %9982 = vmatprep.subr.mxu1 %v16243_v10  ;;  %v4445_v9 = vand.u32 4294901760, %v4444_v18 }
 0x1ef   : > { %9920 = vmatprep.subr.mxu0 %v16270_v4  ;;  %9983 = vmatpush3.msra.mxu1 %v16243_v10 }
 0x1f0   : > { %9836 = vmatmul.mubr.f32.gmra.mxu0 %v12797_v2  ;;  %9898 = vmatmul.mubr.f32.gmra.mxu1 %v3059_v45 }
 0x1f1   : > { %9921 = vmatpush3.msra.mxu0 %v16270_v4  ;;  %9984 = vmatprep.subr.mxu1 %v16245_v32  ;;  %v4451_v4 = vsub.f32 %v13156_v44, %v13168_v52 }
 0x1f2   : > { %9838 = vmatprep.mubr.f32.mxu0 %v12809_v6  ;;  %9922 = vmatprep.subr.mxu0 %v16271_v14  ;;  %v13085_v6 = vand.u32 4294901760, %v8186_v48 }
 0x1f3   : > { %9985 = vmatpush3.msra.mxu1 %v16245_v32  ;;  %9988 = vmatprep.mubr.f32.mxu1 %v12628_v23  ;;  %v13110_v32 = vand.u32 4294901760, %v8184_v24 }
 0x1f4   : > { %9923 = vmatpush3.msra.mxu0 %v16271_v14  ;;  %9986 = vmatprep.subr.mxu1 %v16247_v16  ;;  %16285 = vst [vmem:[#allocation70_spill] sm:$0xff] %v13085_v6  ;;  %v13183_v14 = vsub.f32 %v8180_v11, %v13170_v13 }
 0x1f5   : > { %9924 = vmatprep.subr.mxu0 %v16272_v34  ;;  %9987 = vmatpush3.msra.mxu1 %v16247_v16  ;;  %16290 = vst [vmem:[#allocation57_spill] sm:$0xff] %v13110_v32  ;;  %v13124_v46 = vsub.f32 %v8184_v24, %v13110_v32 }
 0x1f6   : > { %9839 = vmatmul.mubr.f32.gmra.mxu0 %v12828_v21  ;;  %9989 = vmatmul.mubr.f32.vlgmr.msra.gmra.mxu1 %v12615_v25  ;;  %v13096_v21 = vand.u32 4294901760, %v8185_v20  ;;  %16304 = vst [vmem:[#allocation81_spill] sm:$0xff] %v13183_v14 }
 0x1f7   : > { %9925 = vmatpush3.msra.mxu0 %v16272_v34  ;;  %9841 = vmatprep.mubr.f32.mxu0 %v12837_v36  ;;  %16293 = vst [vmem:[#allocation73_spill] sm:$0xff] %v13124_v46  ;;  %v13138_v38 = vand.u32 4294901760, %v13124_v46  ;;  %v13185_v34 = vand.u32 4294901760, %v8179_v53 }
 0x1f8   : > { %9926 = vmatprep.subr.mxu0 %v16273_v58  ;;  %9991 = vmatprep.mubr.f32.mxu1 %v12654_v0  ;;  %16287 = vst [vmem:[#allocation61_spill] sm:$0xff] %v13096_v21  ;;  %v13108_v62 = vsub.f32 %v8185_v20, %v13096_v21 }
 0x1f9   : > { %9927 = vmatpush3.msra.mxu0 %v16273_v58  ;;  %16295 = vst [vmem:[#allocation64_spill] sm:$0xff] %v13138_v38  ;;  %v4437_v22 = vsub.f32 %v13124_v46, %v13138_v38  ;;  %16305 = vst [vmem:[#allocation83_spill] sm:$0xff] %v13185_v34  ;;  %v13189_v58 = vand.u32 4294901760, %v13174_v47 }
 0x1fa   : > { %9928 = vmatprep.subr.mxu0 %v16274_v43  ;;  %9842 = vmatmul.mubr.f32.gmra.mxu0 %v12854_v57  ;;  %16289 = vst [vmem:[#allocation56_spill] sm:$0xff] %v13108_v62  ;;  %v13121_v16 = vand.u32 4294901760, %v13108_v62 }
 0x1fb   : > { %9929 = vmatpush3.msra.mxu0 %v16274_v43  ;;  %9992 = vmatmul.mubr.f32.gmra.mxu1 %v12641_v29  ;;  %v4438_v19 = vand.u32 4294901760, %v4437_v22  ;;  %16306 = vst [vmem:[#allocation84_spill] sm:$0xff] %v13189_v58  ;;  %v8178_v43 = vld [vmem:[%s15621_s2 + $0x98] sm:$0xff] }
 0x1fc   : > { %9930 = vmatprep.subr.mxu0 %v16275_v31  ;;  %9932 = vmatprep.mubr.f32.mxu0 %v12628_v23  ;;  %16292 = vst [vmem:[#allocation55_spill] sm:$0xff] %v13121_v16  ;;  %v4430_v56 = vsub.f32 %v13108_v62, %v13121_v16 }
 0x1fd   : > { %9994 = vmatprep.mubr.f32.mxu1 %v12678_v41  ;;  %9931 = vmatpush3.msra.mxu0 %v16275_v31  ;;  %v4452_v31 = vand.u32 4294901760, %v4451_v4 }
 0x1fe   : > { %9933 = vmatmul.mubr.f32.vlgmr.msra.gmra.mxu0 %v12615_v25  ;;  %v8190_v25 = vld [vmem:[%s15621_s2 + $0xf8] sm:$0xff]  ;;  %v4431_v27 = vand.u32 4294901760, %v4430_v56 }
 0x1ff   : > { %9995 = vmatmul.mubr.f32.gmra.mxu1 %v12676_v35  ;;  %9935 = vmatprep.mubr.f32.mxu0 %v12654_v0  ;;  %v13033_v23 = vand.u32 4294901760, %v8190_v25 }
 0x200   : > { %9997 = vmatprep.mubr.f32.mxu1 %v12698_v17 }
 0x201   : > { %v13039_v0 = vsub.f32 %v8190_v25, %v13033_v23  ;;  %10012 = vmatprep.subr.mxu0 %v13033_v23  ;;  %v13196_v25 = vand.u32 4294901760, %v13183_v14 }
 0x202   : > { %9936 = vmatmul.mubr.f32.gmra.mxu0 %v12641_v29  ;;  %v8189_v29 = vld [vmem:[%s15621_s2 + $0xf0] sm:$0xff] }
 0x203   : > { %9998 = vmatmul.mubr.f32.gmra.mxu1 %v12714_v51  ;;  %9938 = vmatprep.mubr.f32.mxu0 %v12678_v41  ;;  %16276 = vst [vmem:[#allocation59_spill] sm:$0xff] %v13039_v0  ;;  %v8188_v41 = vld [vmem:[%s15621_s2 + $0xe8] sm:$0xff]  ;;  %16307 = vst [vmem:[#allocation77_spill] sm:$0xff] %v13196_v25 }
 0x204   : > { %10000 = vmatprep.mubr.f32.mxu1 %v12730_v8  ;;  %10013 = vmatpush3.msra.mxu0 %v13033_v23 }
 0x206   : > { %9939 = vmatmul.mubr.f32.gmra.mxu0 %v12676_v35  ;;  %v13041_v35 = vand.u32 4294901760, %v8189_v29 }
 0x207   : > { %10001 = vmatmul.mubr.f32.gmra.mxu1 %v12728_v26  ;;  %9941 = vmatprep.mubr.f32.mxu0 %v12698_v17  ;;  %v13049_v17 = vand.u32 4294901760, %v13039_v0 }
 0x208   : > { %10003 = vmatprep.mubr.f32.mxu1 %v12763_v28  ;;  %10014 = vmatprep.subr.mxu0 %v13041_v35 }
 0x209   : > { %16277 = vst [vmem:[#allocation62_spill] sm:$0xff] %v13049_v17  ;;  %10015 = vmatpush3.msra.mxu0 %v13041_v35 }
 0x20a   : > { %9942 = vmatmul.mubr.f32.gmra.mxu0 %v12714_v51  ;;  %v13052_v51 = vsub.f32 %v8189_v29, %v13041_v35  ;;  %v13199_v29 = vsub.f32 %v8179_v53, %v13185_v34 }
 0x20b   : > { %10004 = vmatmul.mubr.f32.gmra.mxu1 %v12773_v5  ;;  %9944 = vmatprep.mubr.f32.mxu0 %v12730_v8  ;;  %v8187_v8 = vld [vmem:[%s15621_s2 + $0xe0] sm:$0xff] }
 0x20c   : > { %10006 = vmatprep.mubr.f32.mxu1 %v12788_v55  ;;  %16278 = vst [vmem:[#allocation50_spill] sm:$0xff] %v13052_v51  ;;  %16308 = vst [vmem:[#allocation85_spill] sm:$0xff] %v13199_v29 }
 0x20e   : > { %9945 = vmatmul.mubr.f32.gmra.mxu0 %v12728_v26  ;;  %v13054_v26 = vand.u32 4294901760, %v8188_v41 }
 0x20f   : > { %10007 = vmatmul.mubr.f32.gmra.mxu1 %v12806_v54  ;;  %9947 = vmatprep.mubr.f32.mxu0 %v12763_v28  ;;  %v4395_v28 = vsub.f32 %v13039_v0, %v13049_v17 }
 0x210   : > { %10009 = vmatprep.mubr.f32.mxu1 %v12817_v39  ;;  %16279 = vst [vmem:[#allocation60_spill] sm:$0xff] %v13054_v26  ;;  %v13067_v37 = vsub.f32 %v8188_v41, %v13054_v26  ;;  %10016 = vmatprep.subr.mxu0 %v13054_v26  ;;  %v13201_v41 = vand.u32 4294901760, %v8178_v43 }
 0x211   : > { %10017 = vmatpush3.msra.mxu0 %v13054_v26  ;;  %v4396_v2 = vand.u32 4294901760, %v4395_v28  ;;  %v8177_v28 = vld [vmem:[%s15621_s2 + $0x90] sm:$0xff] }
 0x212   : > { %9948 = vmatmul.mubr.f32.gmra.mxu0 %v12773_v5  ;;  %v13064_v5 = vand.u32 4294901760, %v13052_v51  ;;  %16281 = vst [vmem:[#allocation66_spill] sm:$0xff] %v13067_v37  ;;  %v13079_v36 = vand.u32 4294901760, %v13067_v37  ;;  %16309 = vst [vmem:[#allocation86_spill] sm:$0xff] %v13201_v41  ;;  %v13218_v20 = vand.u32 4294901760, %v8177_v28 }
 0x213   : > { %10010 = vmatmul.mubr.f32.gmra.mxu1 %v12834_v15  ;;  %9950 = vmatprep.mubr.f32.mxu0 %v12788_v55  ;;  %v13069_v55 = vand.u32 4294901760, %v8187_v8 }
 0x214   : > { %16280 = vst [vmem:[#allocation51_spill] sm:$0xff] %v13064_v5  ;;  %v4402_v3 = vsub.f32 %v13052_v51, %v13064_v5  ;;  %16283 = vst [vmem:[#allocation52_spill] sm:$0xff] %v13079_v36  ;;  %10068 = vmatprep.subr.mxu1 %v4396_v2  ;;  %v4409_v57 = vsub.f32 %v13067_v37, %v13079_v36  ;;  %v13231_v30 = vsub.f32 %v8177_v28, %v13218_v20 }
 0x215   : > { %16282 = vst [vmem:[#allocation68_spill] sm:$0xff] %v13069_v55  ;;  %10018 = vmatprep.subr.mxu0 %v13069_v55  ;;  %10069 = vmatpush3.msra.mxu1 %v4396_v2  ;;  %v13213_v2 = vand.u32 4294901760, %v13199_v29  ;;  %16312 = vst [vmem:[#allocation88_spill] sm:$0xff] %v13218_v20 }
 0x216   : > { %9951 = vmatmul.mubr.f32.gmra.mxu0 %v12806_v54  ;;  %v13082_v54 = vsub.f32 %v8187_v8, %v13069_v55  ;;  %v4410_v50 = vand.u32 4294901760, %v4409_v57  ;;  %v4458_v8 = vsub.f32 %v13174_v47, %v13189_v58  ;;  %v8176_v57 = vld [vmem:[%s15621_s2 + $0x88] sm:$0xff]  ;;  %16314 = vst [vmem:[#allocation82_spill] sm:$0xff] %v13231_v30 }
 0x217   : > { %9953 = vmatprep.mubr.f32.mxu0 %v12817_v39  ;;  %10019 = vmatpush3.msra.mxu0 %v13069_v55  ;;  %v4403_v39 = vand.u32 4294901760, %v4402_v3  ;;  %16310 = vst [vmem:[#allocation78_spill] sm:$0xff] %v13213_v2  ;;  %v13216_v3 = vsub.f32 %v8178_v43, %v13201_v41 }
 0x218   : > { %16284 = vst [vmem:[#allocation53_spill] sm:$0xff] %v13082_v54  ;;  %v13094_v33 = vand.u32 4294901760, %v13082_v54  ;;  %10020 = vmatprep.subr.mxu0 %v13085_v6 }
 0x219   : > { %10070 = vmatprep.subr.mxu1 %v4403_v39  ;;  %10021 = vmatpush3.msra.mxu0 %v13085_v6  ;;  %16311 = vst [vmem:[#allocation87_spill] sm:$0xff] %v13216_v3 }
 0x21a   : > { %9954 = vmatmul.mubr.f32.gmra.mxu0 %v12834_v15  ;;  %16286 = vst [vmem:[#allocation54_spill] sm:$0xff] %v13094_v33  ;;  %v13099_v15 = vsub.f32 %v8186_v48, %v13085_v6  ;;  %v4416_v10 = vsub.f32 %v13082_v54, %v13094_v33  ;;  %10071 = vmatpush3.msra.mxu1 %v4403_v39  ;;  %v4459_v39 = vand.u32 4294901760, %v4458_v8 }
 0x21b   : > { %10022 = vmatprep.subr.mxu0 %v13096_v21  ;;  %10072 = vmatprep.subr.mxu1 %v4410_v50  ;;  %v4465_v48 = vsub.f32 %v13183_v14, %v13196_v25 }
 0x21c   : > { %16288 = vst [vmem:[#allocation72_spill] sm:$0xff] %v13099_v15  ;;  %v13114_v7 = vand.u32 4294901760, %v13099_v15  ;;  %v4417_v45 = vand.u32 4294901760, %v4416_v10  ;;  %10023 = vmatpush3.msra.mxu0 %v13096_v21  ;;  %10073 = vmatpush3.msra.mxu1 %v4410_v50  ;;  %v4472_v50 = vsub.f32 %v13199_v29, %v13213_v2  ;;  %v13228_v10 = vand.u32 4294901760, %v13216_v3  ;;  %v13311_v2 = vld [vmem:[%s15622_s3 + $0x1] ss:$0 sm:$0xff] }
 0x21d   : > { %10024 = vmatprep.subr.mxu0 %v13110_v32  ;;  %v4466_v24 = vand.u32 4294901760, %v4465_v48 }
 0x21e   : > { %16291 = vst [vmem:[#allocation58_spill] sm:$0xff] %v13114_v7  ;;  %v4423_v1 = vsub.f32 %v13099_v15, %v13114_v7  ;;  %10074 = vmatprep.subr.mxu1 %v4417_v45  ;;  %10025 = vmatpush3.msra.mxu0 %v13110_v32  ;;  %16313 = vst [vmem:[#allocation80_spill] sm:$0xff] %v13228_v10  ;;  %v4473_v40 = vand.u32 4294901760, %v4472_v50  ;;  %v4479_v56 = vsub.f32 %v13216_v3, %v13228_v10 }
 0x21f   : > { %10075 = vmatpush3.msra.mxu1 %v4417_v45  ;;  %10026 = vmatprep.subr.mxu0 %v13126_v49  ;;  %v13234_v45 = vand.u32 4294901760, %v8176_v57 }
 0x220   : > { %v4424_v60 = vand.u32 4294901760, %v4423_v1  ;;  %10027 = vmatpush3.msra.mxu0 %v13126_v49  ;;  %v8175_v1 = vld [vmem:[%s15621_s2 + $0x80] sm:$0xff]  ;;  %v4480_v22 = vand.u32 4294901760, %v4479_v56 }
 0x221   : > { %10028 = vmatprep.subr.mxu0 %v13143_v61  ;;  %16315 = vst [vmem:[#allocation2_spill] sm:$0xff] %v13234_v45  ;;  %v13245_v59 = vand.u32 4294901760, %v8175_v1 }
 0x222   : > { %10076 = vmatprep.subr.mxu1 %v4424_v60  ;;  %10029 = vmatpush3.msra.mxu0 %v13143_v61 }
 0x223   : > { %10077 = vmatpush3.msra.mxu1 %v4424_v60  ;;  %10030 = vmatprep.subr.mxu0 %v13159_v12  ;;  %v13243_v60 = vand.u32 4294901760, %v13231_v30  ;;  %16317 = vst [vmem:[#allocation7_spill] sm:$0xff] %v13245_v59 }
 0x224   : > { %10078 = vmatprep.subr.mxu1 %v4431_v27  ;;  %10031 = vmatpush3.msra.mxu0 %v13159_v12 }
 0x225   : > { %10079 = vmatpush3.msra.mxu1 %v4431_v27  ;;  %10032 = vmatprep.subr.mxu0 %v13170_v13  ;;  %16316 = vst [vmem:[#allocation4_spill] sm:$0xff] %v13243_v60  ;;  %v13249_v27 = vsub.f32 %v8176_v57, %v13234_v45  ;;  %v4486_v11 = vsub.f32 %v13231_v30, %v13243_v60 }
 0x226   : > { %10080 = vmatprep.subr.mxu1 %v4438_v19  ;;  %10033 = vmatpush3.msra.mxu0 %v13170_v13 }
 0x227   : > { %10081 = vmatpush3.msra.mxu1 %v4438_v19  ;;  %10034 = vmatprep.subr.mxu0 %v13185_v34  ;;  %16318 = vst [vmem:[#allocation10_spill] sm:$0xff] %v13249_v27  ;;  %v13255_v19 = vsub.f32 %v8175_v1, %v13245_v59  ;;  %v13259_v18 = vand.u32 4294901760, %v13249_v27  ;;  %v4487_v53 = vand.u32 4294901760, %v4486_v11 }
 0x228   : > { %10082 = vmatprep.subr.mxu1 %v4445_v9  ;;  %10035 = vmatpush3.msra.mxu0 %v13185_v34 }
 0x229   : > { %10083 = vmatpush3.msra.mxu1 %v4445_v9  ;;  %10036 = vmatprep.subr.mxu0 %v13201_v41  ;;  %16319 = vst [vmem:[#allocation3_spill] sm:$0xff] %v13255_v19  ;;  %16320 = vst [vmem:[#allocation13_spill] sm:$0xff] %v13259_v18  ;;  %v13263_v9 = vand.u32 4294901760, %v13255_v19  ;;  %v4493_v4 = vsub.f32 %v13249_v27, %v13259_v18 }
 0x22a   : > { %10084 = vmatprep.subr.mxu1 %v4452_v31  ;;  %10037 = vmatpush3.msra.mxu0 %v13201_v41 }
 0x22b   : > { %10085 = vmatpush3.msra.mxu1 %v4452_v31  ;;  %10038 = vmatprep.subr.mxu0 %v13218_v20  ;;  %16321 = vst [vmem:[#allocation6_spill] sm:$0xff] %v13263_v9  ;;  %v4500_v43 = vsub.f32 %v13255_v19, %v13263_v9  ;;  %v4494_v31 = vand.u32 4294901760, %v4493_v4 }
 0x22c   : > { %10086 = vmatprep.subr.mxu1 %v4459_v39  ;;  %10039 = vmatpush3.msra.mxu0 %v13218_v20 }
 0x22d   : > { %10087 = vmatpush3.msra.mxu1 %v4459_v39  ;;  %10040 = vmatprep.subr.mxu0 %v13234_v45  ;;  %v4501_v8 = vand.u32 4294901760, %v4500_v43 }
 0x22e   : > { %10088 = vmatprep.subr.mxu1 %v4466_v24  ;;  %10041 = vmatpush3.msra.mxu0 %v13234_v45 }
 0x22f   : > { %10089 = vmatpush3.msra.mxu1 %v4466_v24  ;;  %10042 = vmatprep.subr.mxu0 %v13245_v59 }
 0x230   : > { %10090 = vmatprep.subr.mxu1 %v4473_v40  ;;  %10043 = vmatpush3.msra.mxu0 %v13245_v59 }
 0x231   : > { %10091 = vmatpush3.msra.mxu1 %v4473_v40  ;;  %10124 = vmatprep.subr.mxu0 %v13039_v0 }
 0x232   : > { %10092 = vmatprep.subr.mxu1 %v4480_v22 }
 0x233   : > { %10093 = vmatpush3.msra.mxu1 %v4480_v22 }
 0x234   : > { %10094 = vmatprep.subr.mxu1 %v4487_v53 }
 0x235   : > { %10095 = vmatpush3.msra.mxu1 %v4487_v53 }
 0x236   : > { %10096 = vmatprep.subr.mxu1 %v4494_v31 }
 0x237   : > { %10097 = vmatpush3.msra.mxu1 %v4494_v31 }
 0x238   : > { %10098 = vmatprep.subr.mxu1 %v4501_v8 }
 0x239   : > { %10099 = vmatpush3.msra.mxu1 %v4501_v8 }
 0x23a   : > { %10180 = vmatprep.subr.mxu1 %v13033_v23 }
 0x259   : > { %v13272_v28 = vpop.f32.mrf.mxu1 }
 0x25b   : > { %v13274_v48 = vpop.f32.mrf.mxu1 }
 0x25d   : > { %v13276_v39 = vpop.f32.mrf.mxu1 }
 0x25f   : > { %v13278_v57 = vpop.f32.mrf.mxu1 }
 0x262   : > { %v13280_v24 = vpop.f32.mrf.mxu0  ;;  %v13282_v50 = vpop.f32.mrf.mxu1 }
 0x263   : > { %v2924_v21 = vadd.f32 %v13280_v24, %v13311_v2 }
 0x264   : > { %v13284_v1 = vpop.f32.mrf.mxu0  ;;  %v13286_v40 = vpop.f32.mrf.mxu1 }
 0x265   : > { %v2914_v51 = vadd.f32 %v13311_v2, %v13284_v1 }
 0x267   : > { %v3215_v24 = vadd.f32 %v13274_v48, %v2914_v51 }
 0x268   : > { %v13288_v56 = vpop.f32.mrf.mxu0  ;;  %v13290_v22 = vpop.f32.mrf.mxu1 }
 0x26a   : > { %v13292_v11 = vpop.f32.mrf.mxu0  ;;  %v13294_v53 = vpop.f32.mrf.mxu1 }
 0x26e   : > { %v13296_v4 = vpop.f32.mrf.mxu0  ;;  %v9778_v43 = vpop.f32.mrf.mxu1 }
 0x26f   : > { %v2964_v1 = vadd.f32 %v13296_v4, %v13311_v2 }
 0x270   : > { %v13298_v31 = vpop.f32.mrf.mxu0  ;;  %v13300_v8 = vpop.f32.mrf.mxu1 }
 0x274   : > { %v13302_v9 = vpop.f32.mrf.mxu0  ;;  %v9781_v18 = vpop.f32.mrf.mxu1 }
 0x276   : > { %v13304_v60 = vpop.f32.mrf.mxu0  ;;  %v13306_v10 = vpop.f32.mrf.mxu1 }
 0x27a   : > { %v9722_v25 = vpop.f32.mrf.mxu0  ;;  %v9784_v58 = vpop.f32.mrf.mxu1 }
 0x27b   : > { %v3004_v52 = vadd.f32 %v9722_v25, %v13311_v2 }
 0x27c   : > { %v13314_v63 = vpop.f32.mrf.mxu0  ;;  %v13316_v38 = vpop.f32.mrf.mxu1 }
 0x27d   : > { %v13318_v16 = vadd.f32 %v9778_v43, %v3004_v52  ;;  %v2994_v51 = vadd.f32 %v13311_v2, %v13314_v63 }
 0x280   : > { %v9725_v7 = vpop.f32.mrf.mxu0  ;;  %v9787_v33 = vpop.f32.mrf.mxu1 }
 0x281   : > { %v3024_v36 = vadd.f32 %v9725_v7, %v13311_v2 }
 0x282   : > { %v13321_v5 = vpop.f32.mrf.mxu0  ;;  %v13323_v17 = vpop.f32.mrf.mxu1 }
 0x283   : > { %v13325_v19 = vadd.f32 %v9781_v18, %v3024_v36 }
 0x286   : > { %v9728_v27 = vpop.f32.mrf.mxu0  ;;  %v9878_v30 = vpop.f32.mrf.mxu1 }
 0x287   : > { %v3044_v25 = vadd.f32 %v9728_v27, %v13311_v2 }
 0x288   : > { %v3033_v3 = vpop.f32.mrf.mxu0  ;;  %v13328_v59 = vpop.f32.mrf.mxu1 }
 0x289   : > { %v13330_v29 = vadd.f32 %v9784_v58, %v3044_v25 }
 0x28b   : > { %16322 = vst [vmem:[#allocation14_spill] sm:$0xff] %v13330_v29 }
 0x28c   : > { %v9731_v52 = vpop.f32.mrf.mxu0  ;;  %v13332_v43 = vpop.f32.mrf.mxu1 }
 0x28d   : > { %v3064_v7 = vadd.f32 %v9731_v52, %v13311_v2 }
 0x28e   : > { %v3053_v45 = vpop.f32.mrf.mxu0  ;;  %v13335_v14 = vpop.f32.mrf.mxu1 }
 0x28f   : > { %v13337_v20 = vadd.f32 %v9787_v33, %v3064_v7 }
 0x291   : > { %16323 = vst [vmem:[#allocation9_spill] sm:$0xff] %v13337_v20 }
 0x292   : > { %v9822_v36 = vpop.f32.mrf.mxu0  ;;  %v13339_v18 = vpop.f32.mrf.mxu1 }
 0x294   : > { %v3408_v47 = vpop.f32.mrf.mxu0  ;;  %v13341_v27 = vpop.f32.mrf.mxu1 }
 0x298   : > { %v9825_v41 = vpop.f32.mrf.mxu0  ;;  %v13343_v44 = vpop.f32.mrf.mxu1 }
 0x29a   : > { %v3422_v58 = vpop.f32.mrf.mxu0  ;;  %v13345_v25 = vpop.f32.mrf.mxu1 }
 0x29e   : > { %v9828_v34 = vpop.f32.mrf.mxu0  ;;  %v13347_v42 = vpop.f32.mrf.mxu1 }
 0x2a0   : > { %v3436_v52 = vpop.f32.mrf.mxu0  ;;  %v13349_v13 = vpop.f32.mrf.mxu1 }
 0x2a4   : > { %v9831_v33 = vpop.f32.mrf.mxu0  ;;  %v13351_v7 = vpop.f32.mrf.mxu1 }
 0x2a6   : > { %v13353_v46 = vpop.f32.mrf.mxu0  ;;  %v13355_v12 = vpop.f32.mrf.mxu1 }
 0x2aa   : > { %v13357_v62 = vpop.f32.mrf.mxu0  ;;  %v13359_v61 = vpop.f32.mrf.mxu1 }
 0x2ab   : > { %16324 = vst [vmem:[#allocation18_spill] sm:$0xff] %v13359_v61  ;;  %v3221_v61 = vadd.f32 %v13272_v28, %v2924_v21 }
 0x2ac   : > { %v13361_v15 = vpop.f32.mrf.mxu0  ;;  %v13363_v49 = vpop.f32.mrf.mxu1 }
 0x2ad   : > { %16325 = vst [vmem:[#allocation12_spill] sm:$0xff] %v13363_v49  ;;  %v2944_v49 = vadd.f32 %v13288_v56, %v13311_v2  ;;  %v3416_v26 = vadd.f32 %v9822_v36, %v3221_v61  ;;  %v3409_v56 = vadd.f32 %v3408_v47, %v3215_v24  ;;  %v2974_v61 = vadd.f32 %v13311_v2, %v13304_v60 }
 0x2ae   : > { %v3034_v47 = vadd.f32 %v13311_v2, %v3033_v3  ;;  %v3263_v3 = vadd.f32 %v13300_v8, %v2994_v51  ;;  %v3472_v8 = vadd.f32 %v13357_v62, %v13318_v16 }
 0x2af   : > { %v3233_v21 = vadd.f32 %v13276_v39, %v2944_v49  ;;  %v3014_v49 = vadd.f32 %v13311_v2, %v13321_v5  ;;  %v3603_v63 = vadd.f32 %v13328_v59, %v3409_v56 }
 0x2b0   : > { %v13365_v54 = vpop.f32.mrf.mxu0  ;;  %v13367_v32 = vpop.f32.mrf.mxu1  ;;  %v13416_v59 = vadd.f32 %v13316_v38, %v3034_v47 }
 0x2b1   : > { %16326 = vst [vmem:[#allocation22_spill] sm:$0xff] %v13367_v32  ;;  %v3430_v48 = vadd.f32 %v9825_v41, %v3233_v21  ;;  %v3054_v41 = vadd.f32 %v13311_v2, %v3053_v45  ;;  %v3275_v21 = vadd.f32 %v13306_v10, %v3014_v49 }
 0x2b2   : > { %v13369_v37 = vpop.f32.mrf.mxu0  ;;  %v13371_v20 = vpop.f32.mrf.mxu1 }
 0x2b3   : > { %16327 = vst [vmem:[#allocation16_spill] sm:$0xff] %v13371_v20  ;;  %v2934_v20 = vadd.f32 %v13311_v2, %v13292_v11 }
 0x2b5   : > { %v3227_v4 = vadd.f32 %v13278_v57, %v2934_v20 }
 0x2b6   : > { %v13377_v6 = vpop.f32.mrf.mxu0  ;;  %v9990_v0 = vpop.f32.mrf.mxu1 }
 0x2b7   : > { %16328 = vst [vmem:[#allocation25_spill] sm:$0xff] %v13377_v6  ;;  %v2954_v6 = vadd.f32 %v13311_v2, %v13298_v31  ;;  %v3611_v31 = vadd.f32 %v9878_v30, %v3416_v26  ;;  %v3423_v24 = vadd.f32 %v3422_v58, %v3227_v4  ;;  %v3251_v30 = vadd.f32 %v13294_v53, %v2974_v61 }
 0x2b8   : > { %v13382_v55 = vpop.f32.mrf.mxu0  ;;  %v4018_v32 = vpop.f32.mrf.mxu1  ;;  %v3627_v58 = vadd.f32 %v13332_v43, %v3430_v48  ;;  %v13423_v43 = vadd.f32 %v13323_v17, %v3054_v41  ;;  %v3479_v4 = vadd.f32 %v13369_v37, %v3275_v21 }
 0x2b9   : > { %16329 = vst [vmem:[#allocation17_spill] sm:$0xff] %v13382_v55  ;;  %v2984_v55 = vadd.f32 %v13302_v9, %v13311_v2  ;;  %v3245_v9 = vadd.f32 %v13282_v50, %v2964_v1  ;;  %v3239_v60 = vadd.f32 %v13286_v40, %v2954_v6  ;;  %v3619_v53 = vadd.f32 %v13335_v14, %v3423_v24 }
 0x2ba   : > { %v13389_v29 = vpop.f32.mrf.mxu0 }
 0x2bb   : > { %16330 = vst [vmem:[#allocation28_spill] sm:$0xff] %v13389_v29  ;;  %v9993_v28 = vpop.f32.mrf.mxu1  ;;  %v3444_v20 = vadd.f32 %v9828_v34, %v3245_v9  ;;  %v3257_v26 = vadd.f32 %v13290_v22, %v2984_v55  ;;  %v3437_v6 = vadd.f32 %v3436_v52, %v3239_v60 }
 0x2bc   : > { %v13398_v11 = vpop.f32.mrf.mxu0 }
 0x2bd   : > { %16331 = vst [vmem:[#allocation21_spill] sm:$0xff] %v13398_v11  ;;  %v4030_v36 = vpop.f32.mrf.mxu1  ;;  %v3458_v40 = vadd.f32 %v9831_v33, %v3257_v26  ;;  %v3643_v10 = vadd.f32 %v13339_v18, %v3444_v20  ;;  %v3635_v62 = vadd.f32 %v13341_v27, %v3437_v6 }
 0x2be   : > { %v9934_v39 = vpop.f32.mrf.mxu0 }
 0x2bf   : > { %v3848_v11 = vadd.f32 %v9934_v39, %v3611_v31  ;;  %v9996_v29 = vpop.f32.mrf.mxu1  ;;  %v3659_v17 = vadd.f32 %v13343_v44, %v3458_v40 }
 0x2c0   : > { %v3841_v5 = vpop.f32.mrf.mxu0 }
 0x2c1   : > { %v4025_v57 = vadd.f32 %v9990_v0, %v3848_v11  ;;  %v3842_v50 = vadd.f32 %v3841_v5, %v3603_v63  ;;  %v4042_v1 = vpop.f32.mrf.mxu1  ;;  %v3451_v0 = vadd.f32 %v13353_v46, %v3251_v30  ;;  %v3465_v11 = vadd.f32 %v13361_v15, %v3263_v3  ;;  %v16332_v5 = vld [vmem:[#allocation14_spill] sm:$0xff]  ;;  %v16333_v3 = vld [vmem:[#allocation25_spill] sm:$0xff] }
 0x2c2   : > { %v9937_v34 = vpop.f32.mrf.mxu0  ;;  %v3486_v46 = vadd.f32 %v13365_v54, %v13325_v19  ;;  %v3675_v54 = vadd.f32 %v13347_v42, %v3472_v8 }
 0x2c3   : > { %v4113_v2 = vmax.f32 %v4025_v57, 0.0  ;;  %v4019_v55 = vadd.f32 %v4018_v32, %v3842_v50  ;;  %v3860_v45 = vadd.f32 %v9937_v34, %v3627_v58  ;;  %v9999_v22 = vpop.f32.mrf.mxu1  ;;  %v3651_v49 = vadd.f32 %v13345_v25, %v3451_v0 }
 0x2c4   : > { %v3853_v52 = vpop.f32.mrf.mxu0  ;;  %v3667_v25 = vadd.f32 %v13349_v13, %v3465_v11  ;;  %v3691_v42 = vadd.f32 %v13351_v7, %v3486_v46  ;;  %v3683_v7 = vadd.f32 %v13355_v12, %v3479_v4  ;;  %v3500_v57 = vadd.f32 %v16333_v3, %v16332_v5  ;;  %v16334_v12 = vld [vmem:[#allocation60_spill] sm:$0xff] }
 0x2c5   : > { %v13426_v38 = vand.u32 4294901760, %v4113_v2  ;;  %v4112_v33 = vmax.f32 %v4019_v55, 0.0  ;;  %v4037_v56 = vadd.f32 %v9993_v28, %v3860_v45  ;;  %v3854_v32 = vadd.f32 %v3853_v52, %v3619_v53  ;;  %v4054_v61 = vpop.f32.mrf.mxu1 }
 0x2c6   : > { %v9940_v14 = vpop.f32.mrf.mxu0 }
 0x2c7   : > { %v13434_v16 = vsub.f32 %v4113_v2, %v13426_v38  ;;  %v13436_v18 = vand.u32 4294901760, %v4112_v33  ;;  %v4115_v51 = vmax.f32 %v4037_v56, 0.0  ;;  %v4031_v48 = vadd.f32 %v4030_v36, %v3854_v32  ;;  %v10002_v28 = vpop.f32.mrf.mxu1  ;;  %v16335_v56 = vld [vmem:[#allocation68_spill] sm:$0xff] }
 0x2c8   : > { %v3872_v31 = vadd.f32 %v9940_v14, %v3643_v10  ;;  %v3865_v15 = vpop.f32.mrf.mxu0 }
 0x2c9   : > { %v4243_v19 = vand.u32 4294901760, %v13434_v16  ;;  %v13443_v44 = vsub.f32 %v4112_v33, %v13436_v18  ;;  %v13445_v27 = vand.u32 4294901760, %v4115_v51  ;;  %v4114_v47 = vmax.f32 %v4031_v48, 0.0  ;;  %v4066_v9 = vpop.f32.mrf.mxu1  ;;  %10100 = vmatprep.mubr.f32.mxu1 %v13436_v18 }
 0x2ca   : > { %v4049_v36 = vadd.f32 %v9996_v29, %v3872_v31  ;;  %v3866_v39 = vadd.f32 %v3865_v15, %v3635_v62  ;;  %v9943_v37 = vpop.f32.mrf.mxu0  ;;  %10101 = vmatmul.mubr.f32.vlgmr.msra.gmra.mxu1 %v13426_v38  ;;  %v16337_v31 = vld [vmem:[#allocation18_spill] sm:$0xff] }
 0x2cb   : > { %v4244_v24 = vsub.f32 %v13434_v16, %v4243_v19  ;;  %v13455_v60 = vsub.f32 %v4115_v51, %v13445_v27  ;;  %v13457_v63 = vand.u32 4294901760, %v4114_v47  ;;  %v3884_v41 = vadd.f32 %v9943_v37, %v3659_v17  ;;  %v10005_v20 = vpop.f32.mrf.mxu1  ;;  %10181 = vmatpush3.msra.mxu1 %v13033_v23  ;;  %v16336_v17 = vld [vmem:[#allocation17_spill] sm:$0xff]  ;;  %v16339_v37 = vld [vmem:[#allocation70_spill] sm:$0xff] }
 0x2cc   : > { %v4117_v29 = vmax.f32 %v4049_v36, 0.0  ;;  %v4043_v26 = vadd.f32 %v4042_v1, %v3866_v39  ;;  %v3877_v30 = vpop.f32.mrf.mxu0  ;;  %10182 = vmatprep.subr.mxu1 %v13041_v35  ;;  %v4233_v13 = vand.u32 4294901760, %v13443_v44  ;;  %v3493_v51 = vadd.f32 %v16336_v17, %v13416_v59  ;;  %v16338_v39 = vld [vmem:[#allocation59_spill] sm:$0xff] }
 0x2cd   : > { %v4245_v50 = vand.u32 4294901760, %v4244_v24  ;;  %v13466_v58 = vsub.f32 %v4114_v47, %v13457_v63  ;;  %v4061_v6 = vadd.f32 %v9999_v22, %v3884_v41  ;;  %10103 = vmatprep.mubr.f32.mxu1 %v13457_v63  ;;  %10183 = vmatpush3.msra.mxu1 %v13041_v35  ;;  %v3878_v21 = vadd.f32 %v3877_v30, %v3651_v49  ;;  %v4078_v34 = vpop.f32.mrf.mxu1  ;;  %v16340_v30 = vld [vmem:[#allocation50_spill] sm:$0xff] }
 0x2ce   : > { %v13470_v1 = vand.u32 4294901760, %v4117_v29  ;;  %v4116_v40 = vmax.f32 %v4043_v26, 0.0  ;;  %v9946_v2 = vpop.f32.mrf.mxu0  ;;  %10104 = vmatmul.mubr.f32.gmra.mxu1 %v13445_v27  ;;  %10184 = vmatprep.subr.mxu1 %v16334_v12  ;;  %v4234_v55 = vsub.f32 %v13443_v44, %v4233_v13  ;;  %v4263_v45 = vand.u32 4294901760, %v13455_v60 }
 0x2cf   : > { %v4119_v22 = vmax.f32 %v4061_v6, 0.0  ;;  %v3896_v53 = vadd.f32 %v9946_v2, %v3675_v54  ;;  %10185 = vmatpush3.msra.mxu1 %v16334_v12  ;;  %v4253_v0 = vand.u32 4294901760, %v13466_v58  ;;  %v4055_v10 = vadd.f32 %v4054_v61, %v3878_v21  ;;  %v13499_v4 = vpop.f32.mrf.mxu1  ;;  %v16343_v21 = vld [vmem:[#allocation28_spill] sm:$0xff] }
 0x2d0   : > { %v13481_v8 = vsub.f32 %v4117_v29, %v13470_v1  ;;  %v13483_v52 = vand.u32 4294901760, %v4116_v40  ;;  %v3889_v33 = vpop.f32.mrf.mxu0  ;;  %10186 = vmatprep.subr.mxu1 %v16335_v56  ;;  %v4235_v32 = vand.u32 4294901760, %v4234_v55  ;;  %v3707_v15 = vadd.f32 %v16337_v31, %v3500_v57  ;;  %v16344_v55 = vld [vmem:[#allocation21_spill] sm:$0xff] }
 0x2d1   : > { %v13486_v11 = vand.u32 4294901760, %v4119_v22  ;;  %v13488_v46 = vadd.f32 %v10002_v28, %v3896_v53  ;;  %v3890_v14 = vadd.f32 %v3889_v33, %v3667_v25  ;;  %10187 = vmatpush3.msra.mxu1 %v16335_v56  ;;  %v4254_v62 = vsub.f32 %v13466_v58, %v4253_v0  ;;  %v4090_v3 = vpop.f32.mrf.mxu1  ;;  %v16345_v33 = vld [vmem:[#allocation66_spill] sm:$0xff] }
 0x2d2   : > { %v13497_v61 = vsub.f32 %v4116_v40, %v13483_v52  ;;  %v4118_v48 = vmax.f32 %v4055_v10, 0.0  ;;  %10044 = vmatprep.mubr.f32.mxu0 %v4235_v32  ;;  %10106 = vmatprep.mubr.f32.mxu1 %v13483_v52  ;;  %v9949_v28 = vpop.f32.mrf.mxu0  ;;  %v4264_v59 = vsub.f32 %v13455_v60, %v4263_v45  ;;  %v4283_v47 = vand.u32 4294901760, %v13481_v8  ;;  %v16346_v32 = vld [vmem:[#allocation12_spill] sm:$0xff] }
 0x2d3   : > { %v4067_v49 = vadd.f32 %v4066_v9, %v3890_v14  ;;  %v3908_v54 = vadd.f32 %v9949_v28, %v3691_v42  ;;  %10045 = vmatmul.mubr.f32.vlgmr.msra.gmra.mxu0 %v4245_v50  ;;  %10107 = vmatmul.mubr.f32.gmra.mxu1 %v13470_v1  ;;  %v4255_v24 = vand.u32 4294901760, %v4254_v62  ;;  %v13514_v42 = vsub.f32 %v4119_v22, %v13486_v11  ;;  %v16341_v50 = vld [vmem:[#allocation61_spill] sm:$0xff] }
 0x2d4   : > { %v13508_v36 = vand.u32 4294901760, %v4118_v48  ;;  %10125 = vmatpush3.msra.mxu0 %v16338_v39  ;;  %10188 = vmatprep.subr.mxu1 %v16339_v37  ;;  %v3901_v25 = vpop.f32.mrf.mxu0  ;;  %v4273_v9 = vand.u32 4294901760, %v13497_v61  ;;  %v4121_v41 = vmax.f32 %v13488_v46, 0.0  ;;  %v3507_v22 = vadd.f32 %v16344_v55, %v13423_v43 }
 0x2d5   : > { %v4120_v29 = vmax.f32 %v4067_v49, 0.0  ;;  %v13517_v26 = vadd.f32 %v10005_v20, %v3908_v54  ;;  %10126 = vmatprep.subr.mxu0 %v16340_v30  ;;  %10189 = vmatpush3.msra.mxu1 %v16339_v37  ;;  %v3902_v57 = vadd.f32 %v3901_v25, %v3683_v7  ;;  %v16342_v20 = vld [vmem:[#allocation9_spill] sm:$0xff]  ;;  %v4265_v7 = vand.u32 4294901760, %v4264_v59  ;;  %v10011_v49 = vpop.f32.mrf.mxu1 }
 0x2d6   : > { %v13522_v5 = vsub.f32 %v4118_v48, %v13508_v36  ;;  %10127 = vmatpush3.msra.mxu0 %v16340_v30  ;;  %10190 = vmatprep.subr.mxu1 %v16341_v50  ;;  %v9952_v6 = vpop.f32.mrf.mxu0  ;;  %v4274_v40 = vsub.f32 %v13497_v61, %v4273_v9  ;;  %v3514_v2 = vadd.f32 %v16343_v21, %v16342_v20  ;;  %v13543_v17 = vand.u32 4294901760, %v4121_v41  ;;  %v16347_v59 = vld [vmem:[#allocation57_spill] sm:$0xff] }
 0x2d7   : > { %v13533_v53 = vand.u32 4294901760, %v4120_v29  ;;  %10047 = vmatprep.mubr.f32.mxu0 %v4255_v24  ;;  %10109 = vmatprep.mubr.f32.mxu1 %v13508_v36  ;;  %v4079_v10 = vadd.f32 %v4078_v34, %v3902_v57  ;;  %v3699_v46 = vadd.f32 %v16346_v32, %v3493_v51  ;;  %v4284_v62 = vsub.f32 %v13481_v8, %v4283_v47  ;;  %v16348_v24 = vld [vmem:[#allocation53_spill] sm:$0xff]  ;;  %v4102_v32 = vpop.f32.mrf.mxu1 }
 0x2d8   : > { %10128 = vmatprep.subr.mxu0 %v16345_v33  ;;  %10191 = vmatpush3.msra.mxu1 %v16341_v50  ;;  %v3913_v14 = vpop.f32.mrf.mxu0  ;;  %v4293_v43 = vand.u32 4294901760, %v13522_v5  ;;  %v3920_v28 = vadd.f32 %v9952_v6, %v3707_v15  ;;  %v4275_v34 = vand.u32 4294901760, %v4274_v40  ;;  %v15860_v31 = vand.u32 4294901760, %v13514_v42  ;;  %v16349_v15 = vld [vmem:[#allocation16_spill] sm:$0xff]  ;;  %v16350_v6 = vld [vmem:[#allocation63_spill] sm:$0xff]  ;;  %v16351_v40 = vld [vmem:[#allocation22_spill] sm:$0xff] }
 0x2d9   : > { %v13546_v48 = vsub.f32 %v4120_v29, %v13533_v53  ;;  %10048 = vmatmul.mubr.f32.gmra.mxu0 %v4265_v7  ;;  %10110 = vmatmul.mubr.f32.gmra.mxu1 %v13486_v11  ;;  %v4123_v51 = vmax.f32 %v13517_v26, 0.0  ;;  %v4122_v54 = vmax.f32 %v4079_v10, 0.0  ;;  %v3914_v39 = vadd.f32 %v3913_v14, %v3699_v46  ;;  %v16352_v14 = vld [vmem:[#allocation72_spill] sm:$0xff] }
 0x2da   : > { %10129 = vmatpush3.msra.mxu0 %v16345_v33  ;;  %10192 = vmatprep.subr.mxu1 %v16347_v59  ;;  %v9955_v25 = vpop.f32.mrf.mxu0  ;;  %v3715_v29 = vadd.f32 %v16349_v15, %v3507_v22  ;;  %v4294_v30 = vsub.f32 %v13522_v5, %v4293_v43  ;;  %v3723_v20 = vadd.f32 %v16351_v40, %v3514_v2  ;;  %v4285_v21 = vand.u32 4294901760, %v4284_v62 }
 0x2db   : > { %10130 = vmatprep.subr.mxu0 %v16348_v24  ;;  %10193 = vmatpush3.msra.mxu1 %v16347_v59  ;;  %v13559_v57 = vand.u32 4294901760, %v4122_v54  ;;  %v4091_v26 = vadd.f32 %v4090_v3, %v3914_v39  ;;  %v13565_v7 = vsub.f32 %v4121_v41, %v13543_v17  ;;  %v4097_v22 = vadd.f32 %v13499_v4, %v3920_v28 }
 0x2dc   : > { %10131 = vmatpush3.msra.mxu0 %v16348_v24  ;;  %10194 = vmatprep.subr.mxu1 %v16350_v6  ;;  %v3925_v55 = vpop.f32.mrf.mxu0  ;;  %v15857_v33 = vand.u32 4294901760, %v13546_v48  ;;  %v13570_v3 = vand.u32 4294901760, %v4123_v51  ;;  %v4304_v41 = vsub.f32 %v13514_v42, %v15860_v31  ;;  %v3932_v2 = vadd.f32 %v9955_v25, %v3723_v20  ;;  %v16355_v25 = vld [vmem:[#allocation71_spill] sm:$0xff] }
 0x2dd   : > { %10050 = vmatprep.mubr.f32.mxu0 %v4275_v34  ;;  %10112 = vmatprep.mubr.f32.mxu1 %v13533_v53  ;;  %v3926_v10 = vadd.f32 %v3925_v55, %v3715_v29  ;;  %v4124_v46 = vmax.f32 %v4091_v26, 0.0  ;;  %v13578_v4 = vsub.f32 %v4122_v54, %v13559_v57  ;;  %v4295_v28 = vand.u32 4294901760, %v4294_v30  ;;  %v16353_v34 = vld [vmem:[#allocation65_spill] sm:$0xff]  ;;  %v16354_v29 = vld [vmem:[#allocation56_spill] sm:$0xff] }
 0x2de   : > { %10132 = vmatprep.subr.mxu0 %v16352_v14  ;;  %10195 = vmatpush3.msra.mxu1 %v16350_v6  ;;  %v15855_v39 = vand.u32 4294901760, %v13565_v7  ;;  %v4125_v24 = vmax.f32 %v4097_v22, 0.0  ;;  %v4314_v54 = vsub.f32 %v13546_v48, %v15857_v33  ;;  %v4305_v30 = vand.u32 4294901760, %v4304_v41  ;;  %v16356_v55 = vld [vmem:[#allocation73_spill] sm:$0xff] }
 0x2df   : > { %10051 = vmatmul.mubr.f32.gmra.mxu0 %v4285_v21  ;;  %10113 = vmatmul.mubr.f32.gmra.mxu1 %v13543_v17  ;;  %v4103_v62 = vadd.f32 %v4102_v32, %v3926_v10  ;;  %v13584_v15 = vand.u32 4294901760, %v4124_v46  ;;  %v13594_v26 = vsub.f32 %v4123_v51, %v13570_v3  ;;  %v4109_v40 = vadd.f32 %v10011_v49, %v3932_v2  ;;  %v16357_v32 = vld [vmem:[#allocation76_spill] sm:$0xff]  ;;  %v16364_v33 = vld [vmem:[#allocation81_spill] sm:$0xff] }
 0x2e0   : > { %10133 = vmatpush3.msra.mxu0 %v16352_v14  ;;  %10196 = vmatprep.subr.mxu1 %v16353_v34  ;;  %v15854_v21 = vand.u32 4294901760, %v13578_v4  ;;  %v13600_v22 = vand.u32 4294901760, %v4125_v24  ;;  %v4315_v51 = vand.u32 4294901760, %v4314_v54  ;;  %v4324_v49 = vsub.f32 %v13565_v7, %v15855_v39  ;;  %v16362_v39 = vld [vmem:[#allocation79_spill] sm:$0xff] }
 0x2e1   : > { %10134 = vmatprep.subr.mxu0 %v16354_v29  ;;  %10197 = vmatpush3.msra.mxu1 %v16353_v34  ;;  %v4126_v20 = vmax.f32 %v4103_v62, 0.0  ;;  %v13603_v10 = vsub.f32 %v4124_v46, %v13584_v15  ;;  %v15856_v14 = vand.u32 4294901760, %v13594_v26  ;;  %v4127_v41 = vmax.f32 %v4109_v40, 0.0  ;;  %v16358_v62 = vld [vmem:[#allocation75_spill] sm:$0xff]  ;;  %v16360_v40 = vld [vmem:[#allocation69_spill] sm:$0xff] }
 0x2e2   : > { %10135 = vmatpush3.msra.mxu0 %v16354_v29  ;;  %10198 = vmatprep.subr.mxu1 %v16355_v25  ;;  %v4334_v46 = vsub.f32 %v13578_v4, %v15854_v21  ;;  %v13622_v29 = vsub.f32 %v4125_v24, %v13600_v22  ;;  %v4325_v54 = vand.u32 4294901760, %v4324_v49  ;;  %v16361_v49 = vld [vmem:[#allocation86_spill] sm:$0xff] }
 0x2e3   : > { %10053 = vmatprep.mubr.f32.mxu0 %v4295_v28  ;;  %10115 = vmatprep.mubr.f32.mxu1 %v13559_v57  ;;  %v13612_v2 = vand.u32 4294901760, %v4126_v20  ;;  %v16359_v28 = vld [vmem:[#allocation83_spill] sm:$0xff] }
 0x2e4   : > { %10136 = vmatprep.subr.mxu0 %v16356_v55  ;;  %10199 = vmatpush3.msra.mxu1 %v16355_v25  ;;  %v4335_v24 = vand.u32 4294901760, %v4334_v46  ;;  %v16363_v46 = vld [vmem:[#allocation88_spill] sm:$0xff] }
 0x2e5   : > { %10054 = vmatmul.mubr.f32.gmra.mxu0 %v4305_v30  ;;  %10116 = vmatmul.mubr.f32.gmra.mxu1 %v13570_v3  ;;  %v15858_v30 = vand.u32 4294901760, %v13603_v10  ;;  %v13631_v21 = vsub.f32 %v4126_v20, %v13612_v2 }
 0x2e6   : > { %10137 = vmatpush3.msra.mxu0 %v16356_v55  ;;  %10200 = vmatprep.subr.mxu1 %v16357_v32  ;;  %v13628_v55 = vand.u32 4294901760, %v4127_v41 }
 0x2e7   : > { %10138 = vmatprep.subr.mxu0 %v16358_v62  ;;  %10201 = vmatpush3.msra.mxu1 %v16357_v32  ;;  %v4354_v20 = vsub.f32 %v13603_v10, %v15858_v30 }
 0x2e8   : > { %10139 = vmatpush3.msra.mxu0 %v16358_v62  ;;  %10202 = vmatprep.subr.mxu1 %v16359_v28  ;;  %v15859_v62 = vand.u32 4294901760, %v13622_v29 }
 0x2e9   : > { %10056 = vmatprep.mubr.f32.mxu0 %v4315_v51  ;;  %10118 = vmatprep.mubr.f32.mxu1 %v13584_v15  ;;  %v4344_v51 = vsub.f32 %v13594_v26, %v15856_v14  ;;  %v15861_v14 = vand.u32 4294901760, %v13631_v21  ;;  %v4355_v30 = vand.u32 4294901760, %v4354_v20  ;;  %v16367_v20 = vld [vmem:[#allocation7_spill] sm:$0xff] }
 0x2ea   : > { %10140 = vmatprep.subr.mxu0 %v16360_v40  ;;  %10203 = vmatpush3.msra.mxu1 %v16359_v28 }
 0x2eb   : > { %10057 = vmatmul.mubr.f32.gmra.mxu0 %v4325_v54  ;;  %10119 = vmatmul.mubr.f32.gmra.mxu1 %v13600_v22  ;;  %v13648_v54 = vsub.f32 %v4127_v41, %v13628_v55  ;;  %v16365_v41 = vld [vmem:[#allocation2_spill] sm:$0xff] }
 0x2ec   : > { %10141 = vmatpush3.msra.mxu0 %v16360_v40  ;;  %10204 = vmatprep.subr.mxu1 %v16361_v49  ;;  %v4345_v40 = vand.u32 4294901760, %v4344_v51  ;;  %v16366_v51 = vld [vmem:[#allocation85_spill] sm:$0xff] }
 0x2ed   : > { %10142 = vmatprep.subr.mxu0 %v16362_v39  ;;  %10205 = vmatpush3.msra.mxu1 %v16361_v49 }
 0x2ee   : > { %10143 = vmatpush3.msra.mxu0 %v16362_v39  ;;  %10206 = vmatprep.subr.mxu1 %v16363_v46  ;;  %v4364_v39 = vsub.f32 %v13622_v29, %v15859_v62  ;;  %v16368_v62 = vld [vmem:[#allocation87_spill] sm:$0xff] }
 0x2ef   : > { %10059 = vmatprep.mubr.f32.mxu0 %v4335_v24  ;;  %10121 = vmatprep.mubr.f32.mxu1 %v13612_v2  ;;  %v4383_v24 = vand.u32 4294901760, %v13648_v54 }
 0x2f0   : > { %10144 = vmatprep.subr.mxu0 %v16364_v33  ;;  %10207 = vmatpush3.msra.mxu1 %v16363_v46 }
 0x2f1   : > { %10060 = vmatmul.mubr.f32.gmra.mxu0 %v4345_v40  ;;  %10122 = vmatmul.mubr.f32.gmra.mxu1 %v13628_v55  ;;  %v4374_v40 = vsub.f32 %v13631_v21, %v15861_v14  ;;  %v4384_v14 = vsub.f32 %v13648_v54, %v4383_v24 }
 0x2f2   : > { %10145 = vmatpush3.msra.mxu0 %v16364_v33  ;;  %10208 = vmatprep.subr.mxu1 %v16365_v41  ;;  %v4365_v33 = vand.u32 4294901760, %v4364_v39 }
 0x2f3   : > { %10146 = vmatprep.subr.mxu0 %v16366_v51  ;;  %10209 = vmatpush3.msra.mxu1 %v16365_v41  ;;  %v4375_v31 = vand.u32 4294901760, %v4374_v40 }
 0x2f4   : > { %10212 = vmatprep.mubr.f32.mxu1 %v4233_v13  ;;  %10147 = vmatpush3.msra.mxu0 %v16366_v51  ;;  %v16369_v13 = vld [vmem:[#allocation82_spill] sm:$0xff] }
 0x2f5   : > { %10210 = vmatprep.subr.mxu1 %v16367_v20  ;;  %10062 = vmatprep.mubr.f32.mxu0 %v4355_v30  ;;  %v16370_v30 = vld [vmem:[#allocation10_spill] sm:$0xff] }
 0x2f6   : > { %10148 = vmatprep.subr.mxu0 %v16368_v62  ;;  %10211 = vmatpush3.msra.mxu1 %v16367_v20  ;;  %v8200_v51 = vld [vmem:[%s15621_s2 + $0x140] sm:$0xff] }
 0x2f7   : > { %10063 = vmatmul.mubr.f32.gmra.mxu0 %v4365_v33  ;;  %10213 = vmatmul.mubr.f32.vlgmr.msra.gmra.mxu1 %v4243_v19  ;;  %v4385_v19 = vand.u32 4294901760, %v4384_v14  ;;  %v8202_v14 = vld [vmem:[%s15621_s2 + $0x150] sm:$0xff] }
 0x2f8   : > { %10149 = vmatpush3.msra.mxu0 %v16368_v62  ;;  %10292 = vmatprep.subr.mxu1 %v13033_v23  ;;  %v8201_v62 = vld [vmem:[%s15621_s2 + $0x148] sm:$0xff] }
 0x2f9   : > { %10150 = vmatprep.subr.mxu0 %v16369_v13  ;;  %10215 = vmatprep.mubr.f32.mxu1 %v4253_v0  ;;  %v16371_v0 = vld [vmem:[#allocation3_spill] sm:$0xff] }
 0x2fa   : > { %10293 = vmatpush3.msra.mxu1 %v13033_v23  ;;  %10151 = vmatpush3.msra.mxu0 %v16369_v13  ;;  %v16372_v23 = vld [vmem:[#allocation62_spill] sm:$0xff]  ;;  %v13920_v13 = vand.u32 4294901760, %v8200_v51 }
 0x2fb   : > { %10294 = vmatprep.subr.mxu1 %v13041_v35  ;;  %10065 = vmatprep.mubr.f32.mxu0 %v4375_v31  ;;  %v16391_v31 = vld [vmem:[#allocation78_spill] sm:$0xff] }
 0x2fc   : > { %10152 = vmatprep.subr.mxu0 %v16370_v30  ;;  %10295 = vmatpush3.msra.mxu1 %v13041_v35  ;;  %v16373_v35 = vld [vmem:[#allocation51_spill] sm:$0xff]  ;;  %16414 = vst [vmem:[#allocation15_spill] sm:$0xff] %v13920_v13 }
 0x2fd   : > { %10066 = vmatmul.mubr.f32.gmra.mxu0 %v4385_v19  ;;  %10216 = vmatmul.mubr.f32.gmra.mxu1 %v4263_v45  ;;  %v16379_v45 = vand.u32 4294901760, %v13565_v7 }
 0x2fe   : > { %10153 = vmatpush3.msra.mxu0 %v16370_v30  ;;  %10296 = vmatprep.subr.mxu1 %v16334_v12  ;;  %v8199_v30 = vld [vmem:[%s15621_s2 + $0x138] sm:$0xff] }
 0x2ff   : > { %10154 = vmatprep.subr.mxu0 %v16371_v0  ;;  %10156 = vmatprep.mubr.f32.mxu0 %v13443_v44  ;;  %v16375_v44 = vand.u32 4294901760, %v13514_v42 }
 0x300   : > { %10218 = vmatprep.mubr.f32.mxu1 %v4273_v9  ;;  %10297 = vmatpush3.msra.mxu1 %v16334_v12  ;;  %v16377_v12 = vld [vmem:[#allocation54_spill] sm:$0xff]  ;;  %v16385_v9 = vld [vmem:[#allocation67_spill] sm:$0xff] }
 0x301   : > { %10155 = vmatpush3.msra.mxu0 %v16371_v0  ;;  %10298 = vmatprep.subr.mxu1 %v16335_v56 }
 0x302   : > { %10236 = vmatprep.subr.mxu0 %v16372_v23  ;;  %10299 = vmatpush3.msra.mxu1 %v16335_v56  ;;  %v16380_v56 = vand.u32 4294901760, %v13578_v4 }
 0x303   : > { %10157 = vmatmul.mubr.f32.vlgmr.msra.gmra.mxu0 %v13434_v16  ;;  %10219 = vmatmul.mubr.f32.gmra.mxu1 %v4283_v47  ;;  %v16374_v16 = vld [vmem:[#allocation52_spill] sm:$0xff]  ;;  %v16383_v47 = vand.u32 4294901760, %v13594_v26 }
 0x304   : > { %10237 = vmatpush3.msra.mxu0 %v16372_v23  ;;  %10300 = vmatprep.subr.mxu1 %v16339_v37 }
 0x305   : > { %10159 = vmatprep.mubr.f32.mxu0 %v13466_v58  ;;  %10221 = vmatprep.mubr.f32.mxu1 %v4293_v43  ;;  %v16376_v58 = vand.u32 4294901760, %v13546_v48  ;;  %v16389_v43 = vld [vmem:[#allocation84_spill] sm:$0xff] }
 0x306   : > { %10238 = vmatprep.subr.mxu0 %v16373_v35  ;;  %10301 = vmatpush3.msra.mxu1 %v16339_v37  ;;  %v16384_v37 = vand.u32 4294901760, %v13603_v10 }
 0x307   : > { %10239 = vmatpush3.msra.mxu0 %v16373_v35  ;;  %10302 = vmatprep.subr.mxu1 %v16341_v50  ;;  %v13935_v35 = vsub.f32 %v8200_v51, %v13920_v13 }
 0x308   : > { %10240 = vmatprep.subr.mxu0 %v16374_v16  ;;  %10303 = vmatpush3.msra.mxu1 %v16341_v50  ;;  %v16388_v50 = vand.u32 4294901760, %v13631_v21 }
 0x309   : > { %10160 = vmatmul.mubr.f32.gmra.mxu0 %v13455_v60  ;;  %10222 = vmatmul.mubr.f32.gmra.mxu1 %v16375_v44  ;;  %v16378_v60 = vld [vmem:[#allocation58_spill] sm:$0xff]  ;;  %16416 = vst [vmem:[#allocation20_spill] sm:$0xff] %v13935_v35 }
 0x30a   : > { %10241 = vmatpush3.msra.mxu0 %v16374_v16  ;;  %10304 = vmatprep.subr.mxu1 %v16347_v59  ;;  %v13937_v16 = vand.u32 4294901760, %v8199_v30 }
 0x30b   : > { %10162 = vmatprep.mubr.f32.mxu0 %v13497_v61  ;;  %10224 = vmatprep.mubr.f32.mxu1 %v16376_v58  ;;  %v16381_v61 = vld [vmem:[#allocation55_spill] sm:$0xff]  ;;  %v8198_v58 = vld [vmem:[%s15621_s2 + $0x130] sm:$0xff] }
 0x30c   : > { %10242 = vmatprep.subr.mxu0 %v16377_v12  ;;  %10305 = vmatpush3.msra.mxu1 %v16347_v59  ;;  %v16392_v59 = vld [vmem:[#allocation80_spill] sm:$0xff]  ;;  %16417 = vst [vmem:[#allocation23_spill] sm:$0xff] %v13937_v16 }
 0x30d   : > { %10243 = vmatpush3.msra.mxu0 %v16377_v12  ;;  %10306 = vmatprep.subr.mxu1 %v16350_v6 }
 0x30e   : > { %10244 = vmatprep.subr.mxu0 %v16378_v60  ;;  %10307 = vmatpush3.msra.mxu1 %v16350_v6  ;;  %v16393_v6 = vld [vmem:[#allocation4_spill] sm:$0xff] }
 0x30f   : > { %10163 = vmatmul.mubr.f32.gmra.mxu0 %v13481_v8  ;;  %10225 = vmatmul.mubr.f32.gmra.mxu1 %v16379_v45  ;;  %v16382_v8 = vld [vmem:[#allocation64_spill] sm:$0xff]  ;;  %v13947_v45 = vand.u32 4294901760, %v13935_v35 }
 0x310   : > { %10245 = vmatpush3.msra.mxu0 %v16378_v60  ;;  %10308 = vmatprep.subr.mxu1 %v16353_v34 }
 0x311   : > { %10165 = vmatprep.mubr.f32.mxu0 %v13522_v5  ;;  %10227 = vmatprep.mubr.f32.mxu1 %v16380_v56  ;;  %v16387_v5 = vand.u32 4294901760, %v13622_v29  ;;  %16418 = vst [vmem:[#allocation26_spill] sm:$0xff] %v13947_v45  ;;  %v13950_v56 = vsub.f32 %v8199_v30, %v13937_v16 }
 0x312   : > { %10246 = vmatprep.subr.mxu0 %v16381_v61  ;;  %10309 = vmatpush3.msra.mxu1 %v16353_v34 }
 0x313   : > { %10247 = vmatpush3.msra.mxu0 %v16381_v61  ;;  %10310 = vmatprep.subr.mxu1 %v16355_v25  ;;  %16419 = vst [vmem:[#allocation29_spill] sm:$0xff] %v13950_v56  ;;  %v13953_v61 = vand.u32 4294901760, %v8198_v58 }
 0x314   : > { %10248 = vmatprep.subr.mxu0 %v16382_v8  ;;  %10311 = vmatpush3.msra.mxu1 %v16355_v25  ;;  %v8203_v25 = vld [vmem:[%s15621_s2 + $0x158] sm:$0xff] }
 0x315   : > { %10166 = vmatmul.mubr.f32.gmra.mxu0 %v13514_v42  ;;  %10228 = vmatmul.mubr.f32.gmra.mxu1 %v16383_v47  ;;  %v16386_v42 = vld [vmem:[#allocation74_spill] sm:$0xff]  ;;  %16420 = vst [vmem:[#allocation34_spill] sm:$0xff] %v13953_v61 }
 0x316   : > { %10249 = vmatpush3.msra.mxu0 %v16382_v8  ;;  %10312 = vmatprep.subr.mxu1 %v16357_v32  ;;  %v8197_v8 = vld [vmem:[%s15621_s2 + $0x128] sm:$0xff] }
 0x317   : > { %10168 = vmatprep.mubr.f32.mxu0 %v13546_v48  ;;  %10230 = vmatprep.mubr.f32.mxu1 %v16384_v37  ;;  %v16390_v48 = vld [vmem:[#allocation77_spill] sm:$0xff]  ;;  %v5768_v37 = vsub.f32 %v13935_v35, %v13947_v45 }
 0x318   : > { %10250 = vmatprep.subr.mxu0 %v16385_v9  ;;  %10313 = vmatpush3.msra.mxu1 %v16357_v32  ;;  %v13879_v32 = vand.u32 4294901760, %v8203_v25 }
 0x319   : > { %10251 = vmatpush3.msra.mxu0 %v16385_v9  ;;  %10314 = vmatprep.subr.mxu1 %v16359_v28  ;;  %v13962_v9 = vand.u32 4294901760, %v13950_v56 }
 0x31a   : > { %10252 = vmatprep.subr.mxu0 %v16386_v42  ;;  %10315 = vmatpush3.msra.mxu1 %v16359_v28  ;;  %16405 = vst [vmem:[#allocation36_spill] sm:$0xff] %v13879_v32 }
 0x31b   : > { %10169 = vmatmul.mubr.f32.gmra.mxu0 %v13565_v7  ;;  %10231 = vmatmul.mubr.f32.gmra.mxu1 %v16387_v5  ;;  %v16394_v7 = vld [vmem:[#allocation13_spill] sm:$0xff]  ;;  %16421 = vst [vmem:[#allocation35_spill] sm:$0xff] %v13962_v9  ;;  %v13968_v5 = vsub.f32 %v8198_v58, %v13953_v61 }
 0x31c   : > { %10253 = vmatpush3.msra.mxu0 %v16386_v42  ;;  %10316 = vmatprep.subr.mxu1 %v16361_v49  ;;  %v13964_v42 = vand.u32 4294901760, %v8197_v8 }
 0x31d   : > { %10171 = vmatprep.mubr.f32.mxu0 %v13578_v4  ;;  %10233 = vmatprep.mubr.f32.mxu1 %v16388_v50  ;;  %v16395_v4 = vld [vmem:[#allocation6_spill] sm:$0xff]  ;;  %16423 = vst [vmem:[#allocation41_spill] sm:$0xff] %v13968_v5 }
 0x31e   : > { %10254 = vmatprep.subr.mxu0 %v16389_v43  ;;  %10317 = vmatpush3.msra.mxu1 %v16361_v49  ;;  %v13893_v49 = vsub.f32 %v8203_v25, %v13879_v32  ;;  %16422 = vst [vmem:[#allocation38_spill] sm:$0xff] %v13964_v42  ;;  %v8196_v50 = vld [vmem:[%s15621_s2 + $0x120] sm:$0xff] }
 0x31f   : > { %10255 = vmatpush3.msra.mxu0 %v16389_v43  ;;  %10318 = vmatprep.subr.mxu1 %v16363_v46  ;;  %v5769_v43 = vand.u32 4294901760, %v5768_v37 }
 0x320   : > { %10256 = vmatprep.subr.mxu0 %v16390_v48  ;;  %10319 = vmatpush3.msra.mxu1 %v16363_v46  ;;  %16408 = vst [vmem:[#allocation42_spill] sm:$0xff] %v13893_v49 }
 0x321   : > { %10172 = vmatmul.mubr.f32.gmra.mxu0 %v13594_v26  ;;  %10234 = vmatmul.mubr.f32.gmra.mxu1 %v4383_v24  ;;  %v13908_v24 = vand.u32 4294901760, %v13893_v49 }
 0x322   : > { %10257 = vmatpush3.msra.mxu0 %v16390_v48  ;;  %10320 = vmatprep.subr.mxu1 %v16365_v41  ;;  %v5775_v48 = vsub.f32 %v13950_v56, %v13962_v9 }
 0x323   : > { %10174 = vmatprep.mubr.f32.mxu0 %v13603_v10  ;;  %10258 = vmatprep.subr.mxu0 %v16391_v31  ;;  %16411 = vst [vmem:[#allocation5_spill] sm:$0xff] %v13908_v24  ;;  %v5747_v19 = vsub.f32 %v13893_v49, %v13908_v24 }
 0x324   : > { %10321 = vmatpush3.msra.mxu1 %v16365_v41  ;;  %10324 = vmatprep.mubr.f32.mxu1 %v13436_v18  ;;  %v13904_v41 = vand.u32 4294901760, %v8201_v62 }
 0x325   : > { %10259 = vmatpush3.msra.mxu0 %v16391_v31  ;;  %10322 = vmatprep.subr.mxu1 %v16367_v20  ;;  %v5748_v44 = vand.u32 4294901760, %v5747_v19  ;;  %v13977_v31 = vsub.f32 %v8197_v8, %v13964_v42  ;;  %v8192_v19 = vld [vmem:[%s15621_s2 + $0x100] sm:$0xff] }
 0x326   : > { %10260 = vmatprep.subr.mxu0 %v16392_v59  ;;  %10323 = vmatpush3.msra.mxu1 %v16367_v20  ;;  %16410 = vst [vmem:[#allocation48_spill] sm:$0xff] %v13904_v41  ;;  %v13918_v33 = vsub.f32 %v8201_v62, %v13904_v41  ;;  %v14039_v58 = vand.u32 4294901760, %v8192_v19 }
 0x327   : > { %10175 = vmatmul.mubr.f32.gmra.mxu0 %v13622_v29  ;;  %10325 = vmatmul.mubr.f32.vlgmr.msra.gmra.mxu1 %v13426_v38  ;;  %16424 = vst [vmem:[#allocation44_spill] sm:$0xff] %v13977_v31 }
 0x328   : > { %10261 = vmatpush3.msra.mxu0 %v16392_v59  ;;  %10177 = vmatprep.mubr.f32.mxu0 %v13631_v21  ;;  %16413 = vst [vmem:[#allocation11_spill] sm:$0xff] %v13918_v33  ;;  %v13932_v23 = vand.u32 4294901760, %v13918_v33  ;;  %v13979_v59 = vand.u32 4294901760, %v8196_v50  ;;  %16437 = vst [vmem:[#allocation9_spill] sm:$0xff] %v14039_v58 }
 0x329   : > { %10262 = vmatprep.subr.mxu0 %v16393_v6  ;;  %10327 = vmatprep.mubr.f32.mxu1 %v13457_v63 }
 0x32a   : > { %10263 = vmatpush3.msra.mxu0 %v16393_v6  ;;  %16415 = vst [vmem:[#allocation19_spill] sm:$0xff] %v13932_v23  ;;  %v5761_v60 = vsub.f32 %v13918_v33, %v13932_v23  ;;  %16425 = vst [vmem:[#allocation47_spill] sm:$0xff] %v13979_v59  ;;  %v13983_v6 = vand.u32 4294901760, %v13968_v5 }
 0x32b   : > { %10264 = vmatprep.subr.mxu0 %v16394_v7  ;;  %10178 = vmatmul.mubr.f32.gmra.mxu0 %v13648_v54 }
 0x32c   : > { %10265 = vmatpush3.msra.mxu0 %v16394_v7  ;;  %10328 = vmatmul.mubr.f32.gmra.mxu1 %v13445_v27  ;;  %v5762_v47 = vand.u32 4294901760, %v5761_v60  ;;  %16426 = vst [vmem:[#allocation49_spill] sm:$0xff] %v13983_v6  ;;  %v8195_v7 = vld [vmem:[%s15621_s2 + $0x118] sm:$0xff] }
 0x32d   : > { %10266 = vmatprep.subr.mxu0 %v16395_v4  ;;  %10268 = vmatprep.mubr.f32.mxu0 %v13436_v18 }
 0x32e   : > { %10330 = vmatprep.mubr.f32.mxu1 %v13483_v52  ;;  %10267 = vmatpush3.msra.mxu0 %v16395_v4  ;;  %v5776_v4 = vand.u32 4294901760, %v5775_v48 }
 0x32f   : > { %10269 = vmatmul.mubr.f32.vlgmr.msra.gmra.mxu0 %v13426_v38  ;;  %v8207_v38 = vld [vmem:[%s15621_s2 + $0x178] sm:$0xff] }
 0x330   : > { %10331 = vmatmul.mubr.f32.gmra.mxu1 %v13470_v1  ;;  %10271 = vmatprep.mubr.f32.mxu0 %v13457_v63  ;;  %v13827_v18 = vand.u32 4294901760, %v8207_v38 }
 0x331   : > { %10333 = vmatprep.mubr.f32.mxu1 %v13508_v36 }
 0x332   : > { %v13833_v63 = vsub.f32 %v8207_v38, %v13827_v18  ;;  %10348 = vmatprep.subr.mxu0 %v13827_v18  ;;  %v13990_v38 = vand.u32 4294901760, %v13977_v31 }
 0x333   : > { %10272 = vmatmul.mubr.f32.gmra.mxu0 %v13445_v27  ;;  %v8206_v27 = vld [vmem:[%s15621_s2 + $0x170] sm:$0xff] }
 0x334   : > { %10334 = vmatmul.mubr.f32.gmra.mxu1 %v13486_v11  ;;  %10274 = vmatprep.mubr.f32.mxu0 %v13483_v52  ;;  %16396 = vst [vmem:[#allocation30_spill] sm:$0xff] %v13833_v63  ;;  %v8205_v52 = vld [vmem:[%s15621_s2 + $0x168] sm:$0xff]  ;;  %16427 = vst [vmem:[#allocation14_spill] sm:$0xff] %v13990_v38  ;;  %v5789_v25 = vsub.f32 %v13977_v31, %v13990_v38 }
 0x335   : > { %10336 = vmatprep.mubr.f32.mxu1 %v13533_v53  ;;  %10349 = vmatpush3.msra.mxu0 %v13827_v18 }
 0x336   : > { %v5790_v62 = vand.u32 4294901760, %v5789_v25 }
 0x337   : > { %10275 = vmatmul.mubr.f32.gmra.mxu0 %v13470_v1  ;;  %v13835_v1 = vand.u32 4294901760, %v8206_v27 }
 0x338   : > { %10337 = vmatmul.mubr.f32.gmra.mxu1 %v13543_v17  ;;  %10277 = vmatprep.mubr.f32.mxu0 %v13508_v36 }
 0x339   : > { %10339 = vmatprep.mubr.f32.mxu1 %v13559_v57  ;;  %v13846_v36 = vsub.f32 %v8206_v27, %v13835_v1  ;;  %10350 = vmatprep.subr.mxu0 %v13835_v1  ;;  %v13993_v27 = vsub.f32 %v8196_v50, %v13979_v59 }
 0x33a   : > { %10351 = vmatpush3.msra.mxu0 %v13835_v1 }
 0x33b   : > { %10278 = vmatmul.mubr.f32.gmra.mxu0 %v13486_v11  ;;  %v13843_v11 = vand.u32 4294901760, %v13833_v63  ;;  %16398 = vst [vmem:[#allocation33_spill] sm:$0xff] %v13846_v36  ;;  %16428 = vst [vmem:[#allocation25_spill] sm:$0xff] %v13993_v27 }
 0x33c   : > { %10340 = vmatmul.mubr.f32.gmra.mxu1 %v13570_v3  ;;  %10280 = vmatprep.mubr.f32.mxu0 %v13533_v53  ;;  %v13848_v53 = vand.u32 4294901760, %v8205_v52 }
 0x33d   : > { %10342 = vmatprep.mubr.f32.mxu1 %v13584_v15  ;;  %16397 = vst [vmem:[#allocation24_spill] sm:$0xff] %v13843_v11 }
 0x33e   : > { %16399 = vst [vmem:[#allocation27_spill] sm:$0xff] %v13848_v53  ;;  %v13861_v34 = vsub.f32 %v8205_v52, %v13848_v53  ;;  %10352 = vmatprep.subr.mxu0 %v13848_v53  ;;  %v13995_v52 = vand.u32 4294901760, %v8195_v7 }
 0x33f   : > { %10281 = vmatmul.mubr.f32.gmra.mxu0 %v13543_v17  ;;  %v8204_v17 = vld [vmem:[%s15621_s2 + $0x160] sm:$0xff] }
 0x340   : > { %10343 = vmatmul.mubr.f32.gmra.mxu1 %v13600_v22  ;;  %10283 = vmatprep.mubr.f32.mxu0 %v13559_v57  ;;  %v5719_v57 = vsub.f32 %v13833_v63, %v13843_v11  ;;  %16401 = vst [vmem:[#allocation31_spill] sm:$0xff] %v13861_v34  ;;  %16429 = vst [vmem:[#allocation60_spill] sm:$0xff] %v13995_v52 }
 0x341   : > { %10345 = vmatprep.mubr.f32.mxu1 %v13612_v2  ;;  %10353 = vmatpush3.msra.mxu0 %v13848_v53 }
 0x342   : > { %v5720_v26 = vand.u32 4294901760, %v5719_v57  ;;  %v8194_v57 = vld [vmem:[%s15621_s2 + $0x110] sm:$0xff] }
 0x343   : > { %10284 = vmatmul.mubr.f32.gmra.mxu0 %v13570_v3  ;;  %v13858_v3 = vand.u32 4294901760, %v13846_v36 }
 0x344   : > { %10346 = vmatmul.mubr.f32.gmra.mxu1 %v13628_v55  ;;  %10286 = vmatprep.mubr.f32.mxu0 %v13584_v15  ;;  %v13863_v15 = vand.u32 4294901760, %v8204_v17 }
 0x345   : > { %16400 = vst [vmem:[#allocation37_spill] sm:$0xff] %v13858_v3  ;;  %v5726_v21 = vsub.f32 %v13846_v36, %v13858_v3  ;;  %10404 = vmatprep.subr.mxu1 %v5720_v26 }
 0x346   : > { %16402 = vst [vmem:[#allocation40_spill] sm:$0xff] %v13863_v15  ;;  %v13876_v10 = vsub.f32 %v8204_v17, %v13863_v15  ;;  %10354 = vmatprep.subr.mxu0 %v13863_v15  ;;  %10405 = vmatpush3.msra.mxu1 %v5720_v26  ;;  %v5782_v17 = vsub.f32 %v13968_v5, %v13983_v6  ;;  %v14007_v26 = vand.u32 4294901760, %v13993_v27 }
 0x347   : > { %10287 = vmatmul.mubr.f32.gmra.mxu0 %v13600_v22  ;;  %v13873_v22 = vand.u32 4294901760, %v13861_v34 }
 0x348   : > { %10289 = vmatprep.mubr.f32.mxu0 %v13612_v2  ;;  %16404 = vst [vmem:[#allocation43_spill] sm:$0xff] %v13876_v10  ;;  %10355 = vmatpush3.msra.mxu0 %v13863_v15  ;;  %v5727_v2 = vand.u32 4294901760, %v5726_v21  ;;  %v13888_v29 = vand.u32 4294901760, %v13876_v10  ;;  %16430 = vst [vmem:[#allocation68_spill] sm:$0xff] %v14007_v26  ;;  %v14010_v21 = vsub.f32 %v8195_v7, %v13995_v52 }
 0x349   : > { %16403 = vst [vmem:[#allocation32_spill] sm:$0xff] %v13873_v22  ;;  %v5733_v28 = vsub.f32 %v13861_v34, %v13873_v22  ;;  %10356 = vmatprep.subr.mxu0 %v13879_v32 }
 0x34a   : > { %16406 = vst [vmem:[#allocation46_spill] sm:$0xff] %v13888_v29  ;;  %10406 = vmatprep.subr.mxu1 %v5727_v2  ;;  %v5740_v54 = vsub.f32 %v13876_v10, %v13888_v29  ;;  %10357 = vmatpush3.msra.mxu0 %v13879_v32  ;;  %16431 = vst [vmem:[#allocation17_spill] sm:$0xff] %v14010_v21 }
 0x34b   : > { %10290 = vmatmul.mubr.f32.gmra.mxu0 %v13628_v55  ;;  %v13890_v55 = vand.u32 4294901760, %v8202_v14  ;;  %v5734_v46 = vand.u32 4294901760, %v5733_v28  ;;  %10407 = vmatpush3.msra.mxu1 %v5727_v2  ;;  %v5783_v2 = vand.u32 4294901760, %v5782_v17  ;;  %v8193_v28 = vld [vmem:[%s15621_s2 + $0x108] sm:$0xff] }
 0x34c   : > { %v5741_v40 = vand.u32 4294901760, %v5740_v54  ;;  %v14022_v54 = vand.u32 4294901760, %v14010_v21 }
 0x34d   : > { %16407 = vst [vmem:[#allocation39_spill] sm:$0xff] %v13890_v55  ;;  %v13902_v39 = vsub.f32 %v8202_v14, %v13890_v55  ;;  %10358 = vmatprep.subr.mxu0 %v13890_v55  ;;  %10408 = vmatprep.subr.mxu1 %v5734_v46  ;;  %v14012_v14 = vand.u32 4294901760, %v8194_v57 }
 0x34e   : > { %10359 = vmatpush3.msra.mxu0 %v13890_v55  ;;  %10409 = vmatpush3.msra.mxu1 %v5734_v46  ;;  %v5796_v46 = vsub.f32 %v13993_v27, %v14007_v26  ;;  %16433 = vst [vmem:[#allocation59_spill] sm:$0xff] %v14022_v54  ;;  %v14105_v26 = vld [vmem:[%s15622_s3 + $0x2] ss:$0 sm:$0xff] }
 0x34f   : > { %16409 = vst [vmem:[#allocation45_spill] sm:$0xff] %v13902_v39  ;;  %v13915_v20 = vand.u32 4294901760, %v13902_v39  ;;  %10360 = vmatprep.subr.mxu0 %v13904_v41  ;;  %10410 = vmatprep.subr.mxu1 %v5741_v40  ;;  %16432 = vst [vmem:[#allocation18_spill] sm:$0xff] %v14012_v14  ;;  %v14025_v51 = vsub.f32 %v8194_v57, %v14012_v14 }
 0x350   : > { %10361 = vmatpush3.msra.mxu0 %v13904_v41  ;;  %10411 = vmatpush3.msra.mxu1 %v5741_v40  ;;  %v14028_v40 = vand.u32 4294901760, %v8193_v28  ;;  %v5797_v30 = vand.u32 4294901760, %v5796_v46 }
 0x351   : > { %16412 = vst [vmem:[#allocation8_spill] sm:$0xff] %v13915_v20  ;;  %v5754_v0 = vsub.f32 %v13902_v39, %v13915_v20  ;;  %10362 = vmatprep.subr.mxu0 %v13920_v13  ;;  %10412 = vmatprep.subr.mxu1 %v5748_v44  ;;  %16434 = vst [vmem:[#allocation70_spill] sm:$0xff] %v14025_v51 }
 0x352   : > { %10363 = vmatpush3.msra.mxu0 %v13920_v13  ;;  %10413 = vmatpush3.msra.mxu1 %v5748_v44  ;;  %16435 = vst [vmem:[#allocation50_spill] sm:$0xff] %v14028_v40  ;;  %v14037_v44 = vand.u32 4294901760, %v14025_v51 }
 0x353   : > { %v5755_v12 = vand.u32 4294901760, %v5754_v0  ;;  %10364 = vmatprep.subr.mxu0 %v13937_v16  ;;  %v5803_v0 = vsub.f32 %v14010_v21, %v14022_v54 }
 0x354   : > { %10365 = vmatpush3.msra.mxu0 %v13937_v16  ;;  %16436 = vst [vmem:[#allocation61_spill] sm:$0xff] %v14037_v44  ;;  %v5810_v8 = vsub.f32 %v14025_v51, %v14037_v44 }
 0x355   : > { %10414 = vmatprep.subr.mxu1 %v5755_v12  ;;  %10366 = vmatprep.subr.mxu0 %v13953_v61  ;;  %v5804_v60 = vand.u32 4294901760, %v5803_v0 }
 0x356   : > { %10415 = vmatpush3.msra.mxu1 %v5755_v12  ;;  %10367 = vmatpush3.msra.mxu0 %v13953_v61  ;;  %v14043_v12 = vsub.f32 %v8193_v28, %v14028_v40  ;;  %v5811_v50 = vand.u32 4294901760, %v5810_v8 }
 0x357   : > { %10416 = vmatprep.subr.mxu1 %v5762_v47  ;;  %10368 = vmatprep.subr.mxu0 %v13964_v42 }
 0x358   : > { %10417 = vmatpush3.msra.mxu1 %v5762_v47  ;;  %10369 = vmatpush3.msra.mxu0 %v13964_v42  ;;  %16438 = vst [vmem:[#allocation28_spill] sm:$0xff] %v14043_v12  ;;  %v14049_v47 = vsub.f32 %v8192_v19, %v14039_v58  ;;  %v14053_v37 = vand.u32 4294901760, %v14043_v12 }
 0x359   : > { %10418 = vmatprep.subr.mxu1 %v5769_v43  ;;  %10370 = vmatprep.subr.mxu0 %v13979_v59 }
 0x35a   : > { %10419 = vmatpush3.msra.mxu1 %v5769_v43  ;;  %10371 = vmatpush3.msra.mxu0 %v13979_v59  ;;  %16439 = vst [vmem:[#allocation21_spill] sm:$0xff] %v14049_v47  ;;  %16440 = vst [vmem:[#allocation66_spill] sm:$0xff] %v14053_v37  ;;  %v14057_v43 = vand.u32 4294901760, %v14049_v47  ;;  %v5817_v48 = vsub.f32 %v14043_v12, %v14053_v37 }
 0x35b   : > { %10420 = vmatprep.subr.mxu1 %v5776_v4  ;;  %10372 = vmatprep.subr.mxu0 %v13995_v52 }
 0x35c   : > { %10421 = vmatpush3.msra.mxu1 %v5776_v4  ;;  %10373 = vmatpush3.msra.mxu0 %v13995_v52  ;;  %16441 = vst [vmem:[#allocation12_spill] sm:$0xff] %v14057_v43  ;;  %v5824_v7 = vsub.f32 %v14049_v47, %v14057_v43  ;;  %v5818_v4 = vand.u32 4294901760, %v5817_v48 }
 0x35d   : > { %10422 = vmatprep.subr.mxu1 %v5783_v2  ;;  %10374 = vmatprep.subr.mxu0 %v14012_v14 }
 0x35e   : > { %10423 = vmatpush3.msra.mxu1 %v5783_v2  ;;  %10375 = vmatpush3.msra.mxu0 %v14012_v14  ;;  %v5825_v17 = vand.u32 4294901760, %v5824_v7 }
 0x35f   : > { %10424 = vmatprep.subr.mxu1 %v5790_v62  ;;  %10376 = vmatprep.subr.mxu0 %v14028_v40 }
 0x360   : > { %10425 = vmatpush3.msra.mxu1 %v5790_v62  ;;  %10377 = vmatpush3.msra.mxu0 %v14028_v40 }
 0x361   : > { %10426 = vmatprep.subr.mxu1 %v5797_v30  ;;  %10378 = vmatprep.subr.mxu0 %v14039_v58 }
 0x362   : > { %10427 = vmatpush3.msra.mxu1 %v5797_v30  ;;  %10379 = vmatpush3.msra.mxu0 %v14039_v58 }
 0x363   : > { %10428 = vmatprep.subr.mxu1 %v5804_v60  ;;  %10460 = vmatprep.subr.mxu0 %v13833_v63 }
 0x364   : > { %10429 = vmatpush3.msra.mxu1 %v5804_v60 }
 0x365   : > { %10430 = vmatprep.subr.mxu1 %v5811_v50 }
 0x366   : > { %10431 = vmatpush3.msra.mxu1 %v5811_v50 }
 0x367   : > { %10432 = vmatprep.subr.mxu1 %v5818_v4 }
 0x368   : > { %10433 = vmatpush3.msra.mxu1 %v5818_v4 }
 0x369   : > { %10434 = vmatprep.subr.mxu1 %v5825_v17 }
 0x36a   : > { %10435 = vmatpush3.msra.mxu1 %v5825_v17 }
 0x36b   : > { %10516 = vmatprep.subr.mxu1 %v13827_v18 }
 0x38a   : > { %v14066_v57 = vpop.f32.mrf.mxu1 }
 0x38c   : > { %v14068_v25 = vpop.f32.mrf.mxu1 }
 0x38e   : > { %v14070_v2 = vpop.f32.mrf.mxu1 }
 0x390   : > { %v14072_v28 = vpop.f32.mrf.mxu1 }
 0x393   : > { %v14074_v62 = vpop.f32.mrf.mxu0  ;;  %v14076_v46 = vpop.f32.mrf.mxu1 }
 0x394   : > { %v4248_v55 = vadd.f32 %v14074_v62, %v14105_v26 }
 0x395   : > { %v14078_v19 = vpop.f32.mrf.mxu0  ;;  %v14080_v30 = vpop.f32.mrf.mxu1 }
 0x396   : > { %v4238_v36 = vadd.f32 %v14105_v26, %v14078_v19 }
 0x398   : > { %v4539_v62 = vadd.f32 %v14068_v25, %v4238_v36 }
 0x399   : > { %v14082_v0 = vpop.f32.mrf.mxu0  ;;  %v14084_v60 = vpop.f32.mrf.mxu1 }
 0x39b   : > { %v14086_v8 = vpop.f32.mrf.mxu0  ;;  %v14088_v50 = vpop.f32.mrf.mxu1 }
 0x39f   : > { %v14090_v48 = vpop.f32.mrf.mxu0  ;;  %v10114_v7 = vpop.f32.mrf.mxu1 }
 0x3a0   : > { %v4288_v19 = vadd.f32 %v14090_v48, %v14105_v26 }
 0x3a1   : > { %v14092_v4 = vpop.f32.mrf.mxu0  ;;  %v14094_v17 = vpop.f32.mrf.mxu1 }
 0x3a5   : > { %v14096_v43 = vpop.f32.mrf.mxu0  ;;  %v10117_v37 = vpop.f32.mrf.mxu1 }
 0x3a7   : > { %v14098_v44 = vpop.f32.mrf.mxu0  ;;  %v14100_v54 = vpop.f32.mrf.mxu1 }
 0x3ab   : > { %v10058_v38 = vpop.f32.mrf.mxu0  ;;  %v10120_v6 = vpop.f32.mrf.mxu1 }
 0x3ac   : > { %v4328_v9 = vadd.f32 %v10058_v38, %v14105_v26 }
 0x3ad   : > { %v14108_v45 = vpop.f32.mrf.mxu0  ;;  %v14110_v23 = vpop.f32.mrf.mxu1 }
 0x3ae   : > { %v14112_v20 = vadd.f32 %v10114_v7, %v4328_v9  ;;  %v4318_v36 = vadd.f32 %v14105_v26, %v14108_v45 }
 0x3b1   : > { %v10061_v24 = vpop.f32.mrf.mxu0  ;;  %v10123_v29 = vpop.f32.mrf.mxu1 }
 0x3b2   : > { %v4348_v22 = vadd.f32 %v10061_v24, %v14105_v26 }
 0x3b3   : > { %v14115_v3 = vpop.f32.mrf.mxu0  ;;  %v14117_v11 = vpop.f32.mrf.mxu1 }
 0x3b4   : > { %v14119_v47 = vadd.f32 %v10117_v37, %v4348_v22 }
 0x3b7   : > { %v10064_v12 = vpop.f32.mrf.mxu0  ;;  %v10214_v51 = vpop.f32.mrf.mxu1 }
 0x3b8   : > { %v4368_v38 = vadd.f32 %v10064_v12, %v14105_v26 }
 0x3b9   : > { %v4357_v21 = vpop.f32.mrf.mxu0  ;;  %v14122_v58 = vpop.f32.mrf.mxu1 }
 0x3ba   : > { %v14124_v27 = vadd.f32 %v10120_v6, %v4368_v38 }
 0x3bc   : > { %16442 = vst [vmem:[#allocation57_spill] sm:$0xff] %v14124_v27 }
 0x3bd   : > { %v10067_v9 = vpop.f32.mrf.mxu0  ;;  %v14126_v7 = vpop.f32.mrf.mxu1 }
 0x3be   : > { %v4388_v24 = vadd.f32 %v10067_v9, %v14105_v26 }
 0x3bf   : > { %v4377_v40 = vpop.f32.mrf.mxu0  ;;  %v14129_v31 = vpop.f32.mrf.mxu1 }
 0x3c0   : > { %v14131_v14 = vadd.f32 %v10123_v29, %v4388_v24 }
 0x3c2   : > { %16443 = vst [vmem:[#allocation53_spill] sm:$0xff] %v14131_v14 }
 0x3c3   : > { %v10158_v22 = vpop.f32.mrf.mxu0  ;;  %v14133_v37 = vpop.f32.mrf.mxu1 }
 0x3c5   : > { %v4732_v5 = vpop.f32.mrf.mxu0  ;;  %v14135_v12 = vpop.f32.mrf.mxu1 }
 0x3c9   : > { %v10161_v52 = vpop.f32.mrf.mxu0  ;;  %v14137_v56 = vpop.f32.mrf.mxu1 }
 0x3cb   : > { %v4746_v6 = vpop.f32.mrf.mxu0  ;;  %v14139_v38 = vpop.f32.mrf.mxu1 }
 0x3cf   : > { %v10164_v59 = vpop.f32.mrf.mxu0  ;;  %v14141_v35 = vpop.f32.mrf.mxu1 }
 0x3d1   : > { %v4760_v9 = vpop.f32.mrf.mxu0  ;;  %v14143_v42 = vpop.f32.mrf.mxu1 }
 0x3d5   : > { %v10167_v29 = vpop.f32.mrf.mxu0  ;;  %v14145_v24 = vpop.f32.mrf.mxu1 }
 0x3d7   : > { %v14147_v33 = vpop.f32.mrf.mxu0  ;;  %v14149_v61 = vpop.f32.mrf.mxu1 }
 0x3db   : > { %v14151_v39 = vpop.f32.mrf.mxu0  ;;  %v14153_v16 = vpop.f32.mrf.mxu1 }
 0x3dc   : > { %16444 = vst [vmem:[#allocation16_spill] sm:$0xff] %v14153_v16  ;;  %v4545_v16 = vadd.f32 %v14066_v57, %v4248_v55 }
 0x3dd   : > { %v14155_v49 = vpop.f32.mrf.mxu0  ;;  %v14157_v13 = vpop.f32.mrf.mxu1 }
 0x3de   : > { %16445 = vst [vmem:[#allocation63_spill] sm:$0xff] %v14157_v13  ;;  %v4268_v13 = vadd.f32 %v14082_v0, %v14105_v26  ;;  %v4740_v53 = vadd.f32 %v10158_v22, %v4545_v16  ;;  %v4733_v0 = vadd.f32 %v4732_v5, %v4539_v62  ;;  %v4298_v16 = vadd.f32 %v14105_v26, %v14098_v44 }
 0x3df   : > { %v4358_v5 = vadd.f32 %v14105_v26, %v4357_v21  ;;  %v4587_v21 = vadd.f32 %v14094_v17, %v4318_v36  ;;  %v4796_v17 = vadd.f32 %v14151_v39, %v14112_v20 }
 0x3e0   : > { %v4557_v55 = vadd.f32 %v14070_v2, %v4268_v13  ;;  %v4338_v13 = vadd.f32 %v14105_v26, %v14115_v3  ;;  %v4927_v45 = vadd.f32 %v14122_v58, %v4733_v0 }
 0x3e1   : > { %v14159_v10 = vpop.f32.mrf.mxu0  ;;  %v14161_v41 = vpop.f32.mrf.mxu1  ;;  %v14210_v58 = vadd.f32 %v14110_v23, %v4358_v5 }
 0x3e2   : > { %16446 = vst [vmem:[#allocation22_spill] sm:$0xff] %v14161_v41  ;;  %v4754_v25 = vadd.f32 %v10161_v52, %v4557_v55  ;;  %v4378_v52 = vadd.f32 %v14105_v26, %v4377_v40  ;;  %v4599_v55 = vadd.f32 %v14100_v54, %v4338_v13 }
 0x3e3   : > { %v14163_v34 = vpop.f32.mrf.mxu0  ;;  %v14165_v14 = vpop.f32.mrf.mxu1 }
 0x3e4   : > { %16447 = vst [vmem:[#allocation72_spill] sm:$0xff] %v14165_v14  ;;  %v4258_v14 = vadd.f32 %v14105_v26, %v14086_v8 }
 0x3e6   : > { %v4551_v48 = vadd.f32 %v14072_v28, %v4258_v14 }
 0x3e7   : > { %v14171_v32 = vpop.f32.mrf.mxu0  ;;  %v10326_v63 = vpop.f32.mrf.mxu1 }
 0x3e8   : > { %16448 = vst [vmem:[#allocation65_spill] sm:$0xff] %v14171_v32  ;;  %v4278_v32 = vadd.f32 %v14105_v26, %v14092_v4  ;;  %v4935_v4 = vadd.f32 %v10214_v51, %v4740_v53  ;;  %v4747_v62 = vadd.f32 %v4746_v6, %v4551_v48  ;;  %v4575_v51 = vadd.f32 %v14088_v50, %v4298_v16 }
 0x3e9   : > { %v14176_v15 = vpop.f32.mrf.mxu0  ;;  %v5342_v41 = vpop.f32.mrf.mxu1  ;;  %v4951_v6 = vadd.f32 %v14126_v7, %v4754_v25  ;;  %v14217_v7 = vadd.f32 %v14117_v11, %v4378_v52  ;;  %v4803_v48 = vadd.f32 %v14163_v34, %v4599_v55 }
 0x3ea   : > { %16449 = vst [vmem:[#allocation56_spill] sm:$0xff] %v14176_v15  ;;  %v4308_v15 = vadd.f32 %v14096_v43, %v14105_v26  ;;  %v4569_v43 = vadd.f32 %v14076_v46, %v4288_v19  ;;  %v4563_v44 = vadd.f32 %v14080_v30, %v4278_v32  ;;  %v4943_v50 = vadd.f32 %v14129_v31, %v4747_v62 }
 0x3eb   : > { %v14183_v27 = vpop.f32.mrf.mxu0 }
 0x3ec   : > { %16450 = vst [vmem:[#allocation71_spill] sm:$0xff] %v14183_v27  ;;  %v10329_v57 = vpop.f32.mrf.mxu1  ;;  %v4768_v14 = vadd.f32 %v10164_v59, %v4569_v43  ;;  %v4581_v53 = vadd.f32 %v14084_v60, %v4308_v15  ;;  %v4761_v32 = vadd.f32 %v4760_v9, %v4563_v44 }
 0x3ed   : > { %v14192_v8 = vpop.f32.mrf.mxu0 }
 0x3ee   : > { %16451 = vst [vmem:[#allocation73_spill] sm:$0xff] %v14192_v8  ;;  %v5354_v22 = vpop.f32.mrf.mxu1  ;;  %v4782_v30 = vadd.f32 %v10167_v29, %v4581_v53  ;;  %v4967_v54 = vadd.f32 %v14133_v37, %v4768_v14  ;;  %v4959_v39 = vadd.f32 %v14135_v12, %v4761_v32 }
 0x3ef   : > { %v10270_v2 = vpop.f32.mrf.mxu0 }
 0x3f0   : > { %v5172_v8 = vadd.f32 %v10270_v2, %v4935_v4  ;;  %v10332_v27 = vpop.f32.mrf.mxu1  ;;  %v4983_v11 = vadd.f32 %v14137_v56, %v4782_v30 }
 0x3f1   : > { %v5165_v3 = vpop.f32.mrf.mxu0 }
 0x3f2   : > { %v5349_v28 = vadd.f32 %v10326_v63, %v5172_v8  ;;  %v5166_v46 = vadd.f32 %v5165_v3, %v4927_v45  ;;  %v5366_v19 = vpop.f32.mrf.mxu1  ;;  %v4775_v63 = vadd.f32 %v14147_v33, %v4575_v51  ;;  %v4789_v8 = vadd.f32 %v14155_v49, %v4587_v21  ;;  %v16452_v3 = vld [vmem:[#allocation57_spill] sm:$0xff] }
 0x3f3   : > { %v10273_v59 = vpop.f32.mrf.mxu0  ;;  %v4810_v33 = vadd.f32 %v14159_v10, %v14119_v47  ;;  %v4999_v10 = vadd.f32 %v14141_v35, %v4796_v17  ;;  %v16453_v21 = vld [vmem:[#allocation65_spill] sm:$0xff] }
 0x3f4   : > { %v5437_v26 = vmax.f32 %v5349_v28, 0.0  ;;  %v5343_v15 = vadd.f32 %v5342_v41, %v5166_v46  ;;  %v5184_v40 = vadd.f32 %v10273_v59, %v4951_v6  ;;  %v10335_v60 = vpop.f32.mrf.mxu1  ;;  %v4975_v13 = vadd.f32 %v14139_v38, %v4775_v63 }
 0x3f5   : > { %v5177_v9 = vpop.f32.mrf.mxu0  ;;  %v4991_v38 = vadd.f32 %v14143_v42, %v4789_v8  ;;  %v5015_v35 = vadd.f32 %v14145_v24, %v4810_v33  ;;  %v5007_v24 = vadd.f32 %v14149_v61, %v4803_v48  ;;  %v4824_v28 = vadd.f32 %v16453_v21, %v16452_v3  ;;  %v16454_v61 = vld [vmem:[#allocation27_spill] sm:$0xff] }
 0x3f6   : > { %v14220_v23 = vand.u32 4294901760, %v5437_v26  ;;  %v5436_v29 = vmax.f32 %v5343_v15, 0.0  ;;  %v5361_v0 = vadd.f32 %v10329_v57, %v5184_v40  ;;  %v5178_v41 = vadd.f32 %v5177_v9, %v4943_v50  ;;  %v5378_v16 = vpop.f32.mrf.mxu1 }
 0x3f7   : > { %v10276_v31 = vpop.f32.mrf.mxu0 }
 0x3f8   : > { %v14228_v20 = vsub.f32 %v5437_v26, %v14220_v23  ;;  %v14230_v37 = vand.u32 4294901760, %v5436_v29  ;;  %v5439_v36 = vmax.f32 %v5361_v0, 0.0  ;;  %v5355_v25 = vadd.f32 %v5354_v22, %v5178_v41  ;;  %v10338_v57 = vpop.f32.mrf.mxu1  ;;  %v16455_v0 = vld [vmem:[#allocation40_spill] sm:$0xff] }
 0x3f9   : > { %v5196_v4 = vadd.f32 %v10276_v31, %v4967_v54  ;;  %v5189_v49 = vpop.f32.mrf.mxu0 }
 0x3fa   : > { %v5567_v47 = vand.u32 4294901760, %v14228_v20  ;;  %v14237_v56 = vsub.f32 %v5436_v29, %v14230_v37  ;;  %v14239_v12 = vand.u32 4294901760, %v5439_v36  ;;  %v5438_v5 = vmax.f32 %v5355_v25, 0.0  ;;  %v5390_v43 = vpop.f32.mrf.mxu1  ;;  %10436 = vmatprep.mubr.f32.mxu1 %v14230_v37 }
 0x3fb   : > { %v5373_v22 = vadd.f32 %v10332_v27, %v5196_v4  ;;  %v5190_v2 = vadd.f32 %v5189_v49, %v4959_v39  ;;  %v10279_v34 = vpop.f32.mrf.mxu0  ;;  %10437 = vmatmul.mubr.f32.vlgmr.msra.gmra.mxu1 %v14220_v23  ;;  %v16457_v4 = vld [vmem:[#allocation16_spill] sm:$0xff] }
 0x3fc   : > { %v5568_v62 = vsub.f32 %v14228_v20, %v5567_v47  ;;  %v14249_v44 = vsub.f32 %v5439_v36, %v14239_v12  ;;  %v14251_v45 = vand.u32 4294901760, %v5438_v5  ;;  %v5208_v52 = vadd.f32 %v10279_v34, %v4983_v11  ;;  %v10341_v14 = vpop.f32.mrf.mxu1  ;;  %10517 = vmatpush3.msra.mxu1 %v13827_v18  ;;  %v16456_v11 = vld [vmem:[#allocation56_spill] sm:$0xff] }
 0x3fd   : > { %v5441_v27 = vmax.f32 %v5373_v22, 0.0  ;;  %v5367_v53 = vadd.f32 %v5366_v19, %v5190_v2  ;;  %v5201_v51 = vpop.f32.mrf.mxu0  ;;  %10518 = vmatprep.subr.mxu1 %v13835_v1  ;;  %v5557_v42 = vand.u32 4294901760, %v14237_v56  ;;  %v4817_v36 = vadd.f32 %v16456_v11, %v14210_v58  ;;  %v16458_v2 = vld [vmem:[#allocation30_spill] sm:$0xff]  ;;  %v16459_v34 = vld [vmem:[#allocation36_spill] sm:$0xff] }
 0x3fe   : > { %v5569_v46 = vand.u32 4294901760, %v5568_v62  ;;  %v14260_v6 = vsub.f32 %v5438_v5, %v14251_v45  ;;  %v5385_v32 = vadd.f32 %v10335_v60, %v5208_v52  ;;  %10439 = vmatprep.mubr.f32.mxu1 %v14251_v45  ;;  %10519 = vmatpush3.msra.mxu1 %v13835_v1  ;;  %v5202_v55 = vadd.f32 %v5201_v51, %v4975_v13  ;;  %v5402_v59 = vpop.f32.mrf.mxu1  ;;  %v16460_v51 = vld [vmem:[#allocation33_spill] sm:$0xff] }
 0x3ff   : > { %v14264_v19 = vand.u32 4294901760, %v5441_v27  ;;  %v5440_v30 = vmax.f32 %v5367_v53, 0.0  ;;  %v10282_v26 = vpop.f32.mrf.mxu0  ;;  %10440 = vmatmul.mubr.f32.gmra.mxu1 %v14239_v12  ;;  %10520 = vmatprep.subr.mxu1 %v16454_v61  ;;  %v5558_v15 = vsub.f32 %v14237_v56, %v5557_v42  ;;  %v5587_v40 = vand.u32 4294901760, %v14249_v44 }
 0x400   : > { %v5443_v60 = vmax.f32 %v5385_v32, 0.0  ;;  %v5220_v50 = vadd.f32 %v10282_v26, %v4999_v10  ;;  %10521 = vmatpush3.msra.mxu1 %v16454_v61  ;;  %v5577_v63 = vand.u32 4294901760, %v14260_v6  ;;  %v5379_v54 = vadd.f32 %v5378_v16, %v5202_v55  ;;  %v14293_v48 = vpop.f32.mrf.mxu1  ;;  %v16463_v55 = vld [vmem:[#allocation71_spill] sm:$0xff] }
 0x401   : > { %v14275_v17 = vsub.f32 %v5441_v27, %v14264_v19  ;;  %v14277_v9 = vand.u32 4294901760, %v5440_v30  ;;  %v5213_v29 = vpop.f32.mrf.mxu0  ;;  %10522 = vmatprep.subr.mxu1 %v16455_v0  ;;  %v5559_v41 = vand.u32 4294901760, %v5558_v15  ;;  %v5031_v49 = vadd.f32 %v16457_v4, %v4824_v28  ;;  %v16464_v15 = vld [vmem:[#allocation73_spill] sm:$0xff] }
 0x402   : > { %v14280_v8 = vand.u32 4294901760, %v5443_v60  ;;  %v14282_v33 = vadd.f32 %v10338_v57, %v5220_v50  ;;  %v5214_v31 = vadd.f32 %v5213_v29, %v4991_v38  ;;  %10523 = vmatpush3.msra.mxu1 %v16455_v0  ;;  %v5578_v39 = vsub.f32 %v14260_v6, %v5577_v63  ;;  %v5414_v21 = vpop.f32.mrf.mxu1  ;;  %v16465_v29 = vld [vmem:[#allocation31_spill] sm:$0xff] }
 0x403   : > { %v14291_v16 = vsub.f32 %v5440_v30, %v14277_v9  ;;  %v5442_v25 = vmax.f32 %v5379_v54, 0.0  ;;  %10380 = vmatprep.mubr.f32.mxu0 %v5559_v41  ;;  %10442 = vmatprep.mubr.f32.mxu1 %v14277_v9  ;;  %v10285_v57 = vpop.f32.mrf.mxu0  ;;  %v5588_v58 = vsub.f32 %v14249_v44, %v5587_v40  ;;  %v5607_v5 = vand.u32 4294901760, %v14275_v17  ;;  %v16466_v41 = vld [vmem:[#allocation63_spill] sm:$0xff] }
 0x404   : > { %v5391_v13 = vadd.f32 %v5390_v43, %v5214_v31  ;;  %v5232_v10 = vadd.f32 %v10285_v57, %v5015_v35  ;;  %10381 = vmatmul.mubr.f32.vlgmr.msra.gmra.mxu0 %v5569_v46  ;;  %10443 = vmatmul.mubr.f32.gmra.mxu1 %v14264_v19  ;;  %v5579_v62 = vand.u32 4294901760, %v5578_v39  ;;  %v14308_v35 = vsub.f32 %v5443_v60, %v14280_v8  ;;  %v16461_v46 = vld [vmem:[#allocation39_spill] sm:$0xff] }
 0x405   : > { %v14302_v22 = vand.u32 4294901760, %v5442_v25  ;;  %10461 = vmatpush3.msra.mxu0 %v16458_v2  ;;  %10524 = vmatprep.subr.mxu1 %v16459_v34  ;;  %v5225_v38 = vpop.f32.mrf.mxu0  ;;  %v5597_v43 = vand.u32 4294901760, %v14291_v16  ;;  %v5445_v52 = vmax.f32 %v14282_v33, 0.0  ;;  %v4831_v60 = vadd.f32 %v16464_v15, %v14217_v7 }
 0x406   : > { %v5444_v27 = vmax.f32 %v5391_v13, 0.0  ;;  %v14311_v53 = vadd.f32 %v10341_v14, %v5232_v10  ;;  %10462 = vmatprep.subr.mxu0 %v16460_v51  ;;  %10525 = vmatpush3.msra.mxu1 %v16459_v34  ;;  %v5226_v28 = vadd.f32 %v5225_v38, %v5007_v24  ;;  %v16462_v14 = vld [vmem:[#allocation53_spill] sm:$0xff]  ;;  %v5589_v24 = vand.u32 4294901760, %v5588_v58  ;;  %v10347_v13 = vpop.f32.mrf.mxu1  ;;  %v16467_v58 = vld [vmem:[#allocation48_spill] sm:$0xff] }
 0x407   : > { %v14316_v3 = vsub.f32 %v5442_v25, %v14302_v22  ;;  %10463 = vmatpush3.msra.mxu0 %v16460_v51  ;;  %10526 = vmatprep.subr.mxu1 %v16461_v46  ;;  %v10288_v32 = vpop.f32.mrf.mxu0  ;;  %v5598_v30 = vsub.f32 %v14291_v16, %v5597_v43  ;;  %v4838_v26 = vadd.f32 %v16463_v55, %v16462_v14  ;;  %v14337_v11 = vand.u32 4294901760, %v5445_v52 }
 0x408   : > { %v14327_v50 = vand.u32 4294901760, %v5444_v27  ;;  %10383 = vmatprep.mubr.f32.mxu0 %v5579_v62  ;;  %10445 = vmatprep.mubr.f32.mxu1 %v14302_v22  ;;  %v5403_v54 = vadd.f32 %v5402_v59, %v5226_v28  ;;  %v5023_v33 = vadd.f32 %v16466_v41, %v4817_v36  ;;  %v5608_v39 = vsub.f32 %v14275_v17, %v5607_v5  ;;  %v16468_v62 = vld [vmem:[#allocation43_spill] sm:$0xff]  ;;  %v5426_v41 = vpop.f32.mrf.mxu1 }
 0x409   : > { %10464 = vmatprep.subr.mxu0 %v16465_v29  ;;  %10527 = vmatpush3.msra.mxu1 %v16461_v46  ;;  %v5237_v31 = vpop.f32.mrf.mxu0  ;;  %v5617_v7 = vand.u32 4294901760, %v14316_v3  ;;  %v5244_v57 = vadd.f32 %v10288_v32, %v5031_v49  ;;  %v5599_v59 = vand.u32 4294901760, %v5598_v30  ;;  %v15959_v4 = vand.u32 4294901760, %v14308_v35  ;;  %v16469_v49 = vld [vmem:[#allocation72_spill] sm:$0xff]  ;;  %v16470_v32 = vld [vmem:[#allocation15_spill] sm:$0xff]  ;;  %v16471_v30 = vld [vmem:[#allocation22_spill] sm:$0xff] }
 0x40a   : > { %v14340_v25 = vsub.f32 %v5444_v27, %v14327_v50  ;;  %10384 = vmatmul.mubr.f32.gmra.mxu0 %v5589_v24  ;;  %10446 = vmatmul.mubr.f32.gmra.mxu1 %v14280_v8  ;;  %v5447_v36 = vmax.f32 %v14311_v53, 0.0  ;;  %v5446_v10 = vmax.f32 %v5403_v54, 0.0  ;;  %v5238_v2 = vadd.f32 %v5237_v31, %v5023_v33  ;;  %v16472_v31 = vld [vmem:[#allocation42_spill] sm:$0xff] }
 0x40b   : > { %10465 = vmatpush3.msra.mxu0 %v16465_v29  ;;  %10528 = vmatprep.subr.mxu1 %v16467_v58  ;;  %v10291_v38 = vpop.f32.mrf.mxu0  ;;  %v5039_v27 = vadd.f32 %v16469_v49, %v4831_v60  ;;  %v5618_v51 = vsub.f32 %v14316_v3, %v5617_v7  ;;  %v5047_v14 = vadd.f32 %v16471_v30, %v4838_v26  ;;  %v5609_v55 = vand.u32 4294901760, %v5608_v39 }
 0x40c   : > { %10466 = vmatprep.subr.mxu0 %v16468_v62  ;;  %10529 = vmatpush3.msra.mxu1 %v16467_v58  ;;  %v14353_v28 = vand.u32 4294901760, %v5446_v10  ;;  %v5415_v53 = vadd.f32 %v5414_v21, %v5238_v2  ;;  %v14359_v24 = vsub.f32 %v5445_v52, %v14337_v11  ;;  %v5421_v60 = vadd.f32 %v14293_v48, %v5244_v57 }
 0x40d   : > { %10467 = vmatpush3.msra.mxu0 %v16468_v62  ;;  %10530 = vmatprep.subr.mxu1 %v16470_v32  ;;  %v5249_v15 = vpop.f32.mrf.mxu0  ;;  %v15956_v29 = vand.u32 4294901760, %v14340_v25  ;;  %v14364_v21 = vand.u32 4294901760, %v5447_v36  ;;  %v5628_v52 = vsub.f32 %v14308_v35, %v15959_v4  ;;  %v5256_v26 = vadd.f32 %v10291_v38, %v5047_v14  ;;  %v16475_v38 = vld [vmem:[#allocation34_spill] sm:$0xff] }
 0x40e   : > { %10386 = vmatprep.mubr.f32.mxu0 %v5599_v59  ;;  %10448 = vmatprep.mubr.f32.mxu1 %v14327_v50  ;;  %v5250_v54 = vadd.f32 %v5249_v15, %v5039_v27  ;;  %v5448_v33 = vmax.f32 %v5415_v53, 0.0  ;;  %v14372_v48 = vsub.f32 %v5446_v10, %v14353_v28  ;;  %v5619_v57 = vand.u32 4294901760, %v5618_v51  ;;  %v16473_v59 = vld [vmem:[#allocation23_spill] sm:$0xff]  ;;  %v16474_v27 = vld [vmem:[#allocation45_spill] sm:$0xff] }
 0x40f   : > { %10468 = vmatprep.subr.mxu0 %v16472_v31  ;;  %10531 = vmatpush3.msra.mxu1 %v16470_v32  ;;  %v15954_v2 = vand.u32 4294901760, %v14359_v24  ;;  %v5449_v62 = vmax.f32 %v5421_v60, 0.0  ;;  %v5638_v10 = vsub.f32 %v14340_v25, %v15956_v29  ;;  %v5629_v51 = vand.u32 4294901760, %v5628_v52  ;;  %v16476_v15 = vld [vmem:[#allocation11_spill] sm:$0xff]  ;;  %v16484_v29 = vld [vmem:[#allocation44_spill] sm:$0xff] }
 0x410   : > { %10387 = vmatmul.mubr.f32.gmra.mxu0 %v5609_v55  ;;  %10449 = vmatmul.mubr.f32.gmra.mxu1 %v14337_v11  ;;  %v5427_v39 = vadd.f32 %v5426_v41, %v5250_v54  ;;  %v14378_v49 = vand.u32 4294901760, %v5448_v33  ;;  %v14388_v53 = vsub.f32 %v5447_v36, %v14364_v21  ;;  %v5433_v30 = vadd.f32 %v10347_v13, %v5256_v26  ;;  %v16477_v41 = vld [vmem:[#allocation38_spill] sm:$0xff] }
 0x411   : > { %10469 = vmatpush3.msra.mxu0 %v16472_v31  ;;  %10532 = vmatprep.subr.mxu1 %v16473_v59  ;;  %v15953_v55 = vand.u32 4294901760, %v14372_v48  ;;  %v14394_v60 = vand.u32 4294901760, %v5449_v62  ;;  %v5639_v36 = vand.u32 4294901760, %v5638_v10  ;;  %v5648_v13 = vsub.f32 %v14359_v24, %v15954_v2  ;;  %v16482_v2 = vld [vmem:[#allocation41_spill] sm:$0xff] }
 0x412   : > { %10470 = vmatprep.subr.mxu0 %v16474_v27  ;;  %10533 = vmatpush3.msra.mxu1 %v16473_v59  ;;  %v5450_v14 = vmax.f32 %v5427_v39, 0.0  ;;  %v14397_v54 = vsub.f32 %v5448_v33, %v14378_v49  ;;  %v15955_v31 = vand.u32 4294901760, %v14388_v53  ;;  %v5451_v52 = vmax.f32 %v5433_v30, 0.0  ;;  %v16478_v39 = vld [vmem:[#allocation20_spill] sm:$0xff]  ;;  %v16480_v30 = vld [vmem:[#allocation29_spill] sm:$0xff] }
 0x413   : > { %10471 = vmatpush3.msra.mxu0 %v16474_v27  ;;  %10534 = vmatprep.subr.mxu1 %v16475_v38  ;;  %v5658_v33 = vsub.f32 %v14372_v48, %v15953_v55  ;;  %v14416_v27 = vsub.f32 %v5449_v62, %v14394_v60  ;;  %v5649_v10 = vand.u32 4294901760, %v5648_v13  ;;  %v16481_v13 = vld [vmem:[#allocation60_spill] sm:$0xff] }
 0x414   : > { %10389 = vmatprep.mubr.f32.mxu0 %v5619_v57  ;;  %10451 = vmatprep.mubr.f32.mxu1 %v14353_v28  ;;  %v14406_v26 = vand.u32 4294901760, %v5450_v14  ;;  %v16479_v57 = vld [vmem:[#allocation47_spill] sm:$0xff] }
 0x415   : > { %10472 = vmatprep.subr.mxu0 %v16476_v15  ;;  %10535 = vmatpush3.msra.mxu1 %v16475_v38  ;;  %v5659_v62 = vand.u32 4294901760, %v5658_v33  ;;  %v16483_v33 = vld [vmem:[#allocation18_spill] sm:$0xff] }
 0x416   : > { %10390 = vmatmul.mubr.f32.gmra.mxu0 %v5629_v51  ;;  %10452 = vmatmul.mubr.f32.gmra.mxu1 %v14364_v21  ;;  %v15957_v51 = vand.u32 4294901760, %v14397_v54  ;;  %v14425_v55 = vsub.f32 %v5450_v14, %v14406_v26 }
 0x417   : > { %10473 = vmatpush3.msra.mxu0 %v16476_v15  ;;  %10536 = vmatprep.subr.mxu1 %v16477_v41  ;;  %v14422_v15 = vand.u32 4294901760, %v5451_v52 }
 0x418   : > { %10474 = vmatprep.subr.mxu0 %v16478_v39  ;;  %10537 = vmatpush3.msra.mxu1 %v16477_v41  ;;  %v5678_v14 = vsub.f32 %v14397_v54, %v15957_v51 }
 0x419   : > { %10475 = vmatpush3.msra.mxu0 %v16478_v39  ;;  %10538 = vmatprep.subr.mxu1 %v16479_v57  ;;  %v15958_v39 = vand.u32 4294901760, %v14416_v27 }
 0x41a   : > { %10392 = vmatprep.mubr.f32.mxu0 %v5639_v36  ;;  %10454 = vmatprep.mubr.f32.mxu1 %v14378_v49  ;;  %v5668_v36 = vsub.f32 %v14388_v53, %v15955_v31  ;;  %v15960_v31 = vand.u32 4294901760, %v14425_v55  ;;  %v5679_v51 = vand.u32 4294901760, %v5678_v14  ;;  %v16487_v14 = vld [vmem:[#allocation9_spill] sm:$0xff] }
 0x41b   : > { %10476 = vmatprep.subr.mxu0 %v16480_v30  ;;  %10539 = vmatpush3.msra.mxu1 %v16479_v57 }
 0x41c   : > { %10393 = vmatmul.mubr.f32.gmra.mxu0 %v5649_v10  ;;  %10455 = vmatmul.mubr.f32.gmra.mxu1 %v14394_v60  ;;  %v14442_v10 = vsub.f32 %v5451_v52, %v14422_v15  ;;  %v16485_v52 = vld [vmem:[#allocation50_spill] sm:$0xff] }
 0x41d   : > { %10477 = vmatpush3.msra.mxu0 %v16480_v30  ;;  %10540 = vmatprep.subr.mxu1 %v16481_v13  ;;  %v5669_v30 = vand.u32 4294901760, %v5668_v36  ;;  %v16486_v36 = vld [vmem:[#allocation25_spill] sm:$0xff] }
 0x41e   : > { %10478 = vmatprep.subr.mxu0 %v16482_v2  ;;  %10541 = vmatpush3.msra.mxu1 %v16481_v13 }
 0x41f   : > { %10479 = vmatpush3.msra.mxu0 %v16482_v2  ;;  %10542 = vmatprep.subr.mxu1 %v16483_v33  ;;  %v5688_v2 = vsub.f32 %v14416_v27, %v15958_v39  ;;  %v16488_v39 = vld [vmem:[#allocation17_spill] sm:$0xff] }
 0x420   : > { %10395 = vmatprep.mubr.f32.mxu0 %v5659_v62  ;;  %10457 = vmatprep.mubr.f32.mxu1 %v14406_v26  ;;  %v5707_v62 = vand.u32 4294901760, %v14442_v10 }
 0x421   : > { %10480 = vmatprep.subr.mxu0 %v16484_v29  ;;  %10543 = vmatpush3.msra.mxu1 %v16483_v33 }
 0x422   : > { %10396 = vmatmul.mubr.f32.gmra.mxu0 %v5669_v30  ;;  %10458 = vmatmul.mubr.f32.gmra.mxu1 %v14422_v15  ;;  %v5698_v30 = vsub.f32 %v14425_v55, %v15960_v31  ;;  %v5708_v31 = vsub.f32 %v14442_v10, %v5707_v62 }
 0x423   : > { %10481 = vmatpush3.msra.mxu0 %v16484_v29  ;;  %10544 = vmatprep.subr.mxu1 %v16485_v52  ;;  %v5689_v29 = vand.u32 4294901760, %v5688_v2 }
 0x424   : > { %10482 = vmatprep.subr.mxu0 %v16486_v36  ;;  %10545 = vmatpush3.msra.mxu1 %v16485_v52  ;;  %v5699_v4 = vand.u32 4294901760, %v5698_v30 }
 0x425   : > { %10548 = vmatprep.mubr.f32.mxu1 %v5557_v42  ;;  %10483 = vmatpush3.msra.mxu0 %v16486_v36  ;;  %v16489_v42 = vld [vmem:[#allocation70_spill] sm:$0xff] }
 0x426   : > { %10546 = vmatprep.subr.mxu1 %v16487_v14  ;;  %10398 = vmatprep.mubr.f32.mxu0 %v5679_v51  ;;  %v16490_v51 = vld [vmem:[#allocation28_spill] sm:$0xff]  ;;  %v6784_v36 = vld [vmem:[%s15623_s4 + $0x40] sm:$0xff] }
 0x427   : > { %10484 = vmatprep.subr.mxu0 %v16488_v39  ;;  %10547 = vmatpush3.msra.mxu1 %v16487_v14 }
 0x428   : > { %10399 = vmatmul.mubr.f32.gmra.mxu0 %v5689_v29  ;;  %10549 = vmatmul.mubr.f32.vlgmr.msra.gmra.mxu1 %v5567_v47  ;;  %v5709_v47 = vand.u32 4294901760, %v5708_v31  ;;  %v6786_v31 = vld [vmem:[%s15623_s4 + $0x50] sm:$0xff] }
 0x429   : > { %10485 = vmatpush3.msra.mxu0 %v16488_v39  ;;  %10628 = vmatprep.subr.mxu1 %v13827_v18  ;;  %v6785_v39 = vld [vmem:[%s15623_s4 + $0x48] sm:$0xff] }
 0x42a   : > { %10486 = vmatprep.subr.mxu0 %v16489_v42  ;;  %10551 = vmatprep.mubr.f32.mxu1 %v5577_v63  ;;  %v16491_v63 = vld [vmem:[#allocation21_spill] sm:$0xff] }
 0x42b   : > { %10629 = vmatpush3.msra.mxu1 %v13827_v18  ;;  %10487 = vmatpush3.msra.mxu0 %v16489_v42  ;;  %v16492_v18 = vld [vmem:[#allocation24_spill] sm:$0xff]  ;;  %v14714_v42 = vand.u32 4294901760, %v6784_v36 }
 0x42c   : > { %10630 = vmatprep.subr.mxu1 %v13835_v1  ;;  %10401 = vmatprep.mubr.f32.mxu0 %v5699_v4  ;;  %v16511_v4 = vld [vmem:[#allocation68_spill] sm:$0xff] }
 0x42d   : > { %10488 = vmatprep.subr.mxu0 %v16490_v51  ;;  %10631 = vmatpush3.msra.mxu1 %v13835_v1  ;;  %v16493_v1 = vld [vmem:[#allocation37_spill] sm:$0xff]  ;;  %16533 = vst [vmem:[#allocation52_spill] sm:$0xff] %v14714_v42 }
 0x42e   : > { %10402 = vmatmul.mubr.f32.gmra.mxu0 %v5709_v47  ;;  %10552 = vmatmul.mubr.f32.gmra.mxu1 %v5587_v40  ;;  %v16499_v40 = vand.u32 4294901760, %v14359_v24 }
 0x42f   : > { %10489 = vmatpush3.msra.mxu0 %v16490_v51  ;;  %10632 = vmatprep.subr.mxu1 %v16454_v61  ;;  %v6783_v51 = vld [vmem:[%s15623_s4 + $0x38] sm:$0xff] }
 0x430   : > { %10490 = vmatprep.subr.mxu0 %v16491_v63  ;;  %10492 = vmatprep.mubr.f32.mxu0 %v14237_v56  ;;  %v16495_v56 = vand.u32 4294901760, %v14308_v35 }
 0x431   : > { %10554 = vmatprep.mubr.f32.mxu1 %v5597_v43  ;;  %10633 = vmatpush3.msra.mxu1 %v16454_v61  ;;  %v16497_v61 = vld [vmem:[#allocation46_spill] sm:$0xff] }
 0x432   : > { %10491 = vmatpush3.msra.mxu0 %v16491_v63  ;;  %10634 = vmatprep.subr.mxu1 %v16455_v0  ;;  %v16505_v43 = vld [vmem:[#allocation26_spill] sm:$0xff] }
 0x433   : > { %10572 = vmatprep.subr.mxu0 %v16492_v18  ;;  %10635 = vmatpush3.msra.mxu1 %v16455_v0  ;;  %v16500_v0 = vand.u32 4294901760, %v14372_v48 }
 0x434   : > { %10493 = vmatmul.mubr.f32.vlgmr.msra.gmra.mxu0 %v14228_v20  ;;  %10555 = vmatmul.mubr.f32.gmra.mxu1 %v5607_v5  ;;  %v16494_v20 = vld [vmem:[#allocation32_spill] sm:$0xff]  ;;  %v16503_v5 = vand.u32 4294901760, %v14388_v53 }
 0x435   : > { %10573 = vmatpush3.msra.mxu0 %v16492_v18  ;;  %10636 = vmatprep.subr.mxu1 %v16459_v34 }
 0x436   : > { %10495 = vmatprep.mubr.f32.mxu0 %v14260_v6  ;;  %10557 = vmatprep.mubr.f32.mxu1 %v5617_v7  ;;  %v16496_v6 = vand.u32 4294901760, %v14340_v25  ;;  %v16509_v7 = vld [vmem:[#allocation49_spill] sm:$0xff] }
 0x437   : > { %10574 = vmatprep.subr.mxu0 %v16493_v1  ;;  %10637 = vmatpush3.msra.mxu1 %v16459_v34  ;;  %v16504_v34 = vand.u32 4294901760, %v14397_v54 }
 0x438   : > { %10575 = vmatpush3.msra.mxu0 %v16493_v1  ;;  %10638 = vmatprep.subr.mxu1 %v16461_v46  ;;  %v14729_v1 = vsub.f32 %v6784_v36, %v14714_v42 }
 0x439   : > { %10576 = vmatprep.subr.mxu0 %v16494_v20  ;;  %10639 = vmatpush3.msra.mxu1 %v16461_v46  ;;  %v16508_v46 = vand.u32 4294901760, %v14425_v55 }
 0x43a   : > { %10496 = vmatmul.mubr.f32.gmra.mxu0 %v14249_v44  ;;  %10558 = vmatmul.mubr.f32.gmra.mxu1 %v16495_v56  ;;  %v16498_v44 = vld [vmem:[#allocation5_spill] sm:$0xff]  ;;  %16535 = vst [vmem:[#allocation58_spill] sm:$0xff] %v14729_v1 }
 0x43b   : > { %10577 = vmatpush3.msra.mxu0 %v16494_v20  ;;  %10640 = vmatprep.subr.mxu1 %v16467_v58  ;;  %v14731_v20 = vand.u32 4294901760, %v6783_v51 }
 0x43c   : > { %10498 = vmatprep.mubr.f32.mxu0 %v14291_v16  ;;  %10560 = vmatprep.mubr.f32.mxu1 %v16496_v6  ;;  %v16501_v16 = vld [vmem:[#allocation8_spill] sm:$0xff] }
 0x43d   : > { %10578 = vmatprep.subr.mxu0 %v16497_v61  ;;  %10641 = vmatpush3.msra.mxu1 %v16467_v58  ;;  %v16512_v58 = vld [vmem:[#allocation59_spill] sm:$0xff]  ;;  %16536 = vst [vmem:[#allocation55_spill] sm:$0xff] %v14731_v20  ;;  %v6782_v6 = vld [vmem:[%s15623_s4 + $0x30] sm:$0xff] }
 0x43e   : > { %10579 = vmatpush3.msra.mxu0 %v16497_v61  ;;  %10642 = vmatprep.subr.mxu1 %v16470_v32 }
 0x43f   : > { %10580 = vmatprep.subr.mxu0 %v16498_v44  ;;  %10643 = vmatpush3.msra.mxu1 %v16470_v32  ;;  %v16513_v32 = vld [vmem:[#allocation61_spill] sm:$0xff] }
 0x440   : > { %10499 = vmatmul.mubr.f32.gmra.mxu0 %v14275_v17  ;;  %10561 = vmatmul.mubr.f32.gmra.mxu1 %v16499_v40  ;;  %v16502_v17 = vld [vmem:[#allocation19_spill] sm:$0xff]  ;;  %v14741_v40 = vand.u32 4294901760, %v14729_v1 }
 0x441   : > { %10581 = vmatpush3.msra.mxu0 %v16498_v44  ;;  %10644 = vmatprep.subr.mxu1 %v16473_v59 }
 0x442   : > { %10501 = vmatprep.mubr.f32.mxu0 %v14316_v3  ;;  %10563 = vmatprep.mubr.f32.mxu1 %v16500_v0  ;;  %v16507_v3 = vand.u32 4294901760, %v14416_v27  ;;  %16537 = vst [vmem:[#allocation64_spill] sm:$0xff] %v14741_v40  ;;  %v14744_v0 = vsub.f32 %v6783_v51, %v14731_v20 }
 0x443   : > { %10582 = vmatprep.subr.mxu0 %v16501_v16  ;;  %10645 = vmatpush3.msra.mxu1 %v16473_v59 }
 0x444   : > { %10583 = vmatpush3.msra.mxu0 %v16501_v16  ;;  %10646 = vmatprep.subr.mxu1 %v16475_v38  ;;  %16538 = vst [vmem:[#allocation67_spill] sm:$0xff] %v14744_v0  ;;  %v14747_v16 = vand.u32 4294901760, %v6782_v6 }
 0x445   : > { %10584 = vmatprep.subr.mxu0 %v16502_v17  ;;  %10647 = vmatpush3.msra.mxu1 %v16475_v38  ;;  %v6787_v38 = vld [vmem:[%s15623_s4 + $0x58] sm:$0xff] }
 0x446   : > { %10502 = vmatmul.mubr.f32.gmra.mxu0 %v14308_v35  ;;  %10564 = vmatmul.mubr.f32.gmra.mxu1 %v16503_v5  ;;  %v16506_v35 = vld [vmem:[#allocation35_spill] sm:$0xff]  ;;  %16539 = vst [vmem:[#allocation74_spill] sm:$0xff] %v14747_v16 }
 0x447   : > { %10585 = vmatpush3.msra.mxu0 %v16502_v17  ;;  %10648 = vmatprep.subr.mxu1 %v16477_v41  ;;  %v6781_v17 = vld [vmem:[%s15623_s4 + $0x28] sm:$0xff] }
 0x448   : > { %10504 = vmatprep.mubr.f32.mxu0 %v14340_v25  ;;  %10566 = vmatprep.mubr.f32.mxu1 %v16504_v34  ;;  %v16510_v25 = vld [vmem:[#allocation14_spill] sm:$0xff]  ;;  %v7093_v34 = vsub.f32 %v14729_v1, %v14741_v40 }
 0x449   : > { %10586 = vmatprep.subr.mxu0 %v16505_v43  ;;  %10649 = vmatpush3.msra.mxu1 %v16477_v41  ;;  %v14673_v41 = vand.u32 4294901760, %v6787_v38 }
 0x44a   : > { %10587 = vmatpush3.msra.mxu0 %v16505_v43  ;;  %10650 = vmatprep.subr.mxu1 %v16479_v57  ;;  %v14756_v43 = vand.u32 4294901760, %v14744_v0 }
 0x44b   : > { %10588 = vmatprep.subr.mxu0 %v16506_v35  ;;  %10651 = vmatpush3.msra.mxu1 %v16479_v57  ;;  %16524 = vst [vmem:[#allocation2_spill] sm:$0xff] %v14673_v41 }
 0x44c   : > { %10505 = vmatmul.mubr.f32.gmra.mxu0 %v14359_v24  ;;  %10567 = vmatmul.mubr.f32.gmra.mxu1 %v16507_v3  ;;  %v16514_v24 = vld [vmem:[#allocation66_spill] sm:$0xff]  ;;  %16540 = vst [vmem:[#allocation84_spill] sm:$0xff] %v14756_v43  ;;  %v14762_v3 = vsub.f32 %v6782_v6, %v14747_v16 }
 0x44d   : > { %10589 = vmatpush3.msra.mxu0 %v16506_v35  ;;  %10652 = vmatprep.subr.mxu1 %v16481_v13  ;;  %v14758_v35 = vand.u32 4294901760, %v6781_v17 }
 0x44e   : > { %10507 = vmatprep.mubr.f32.mxu0 %v14372_v48  ;;  %10569 = vmatprep.mubr.f32.mxu1 %v16508_v46  ;;  %v16515_v48 = vld [vmem:[#allocation12_spill] sm:$0xff]  ;;  %16542 = vst [vmem:[#allocation78_spill] sm:$0xff] %v14762_v3  ;;  %v6780_v46 = vld [vmem:[%s15623_s4 + $0x20] sm:$0xff] }
 0x44f   : > { %10590 = vmatprep.subr.mxu0 %v16509_v7  ;;  %10653 = vmatpush3.msra.mxu1 %v16481_v13  ;;  %v14687_v13 = vsub.f32 %v6787_v38, %v14673_v41  ;;  %16541 = vst [vmem:[#allocation77_spill] sm:$0xff] %v14758_v35 }
 0x450   : > { %10591 = vmatpush3.msra.mxu0 %v16509_v7  ;;  %10654 = vmatprep.subr.mxu1 %v16483_v33  ;;  %v7094_v7 = vand.u32 4294901760, %v7093_v34 }
 0x451   : > { %10592 = vmatprep.subr.mxu0 %v16510_v25  ;;  %10655 = vmatpush3.msra.mxu1 %v16483_v33  ;;  %16527 = vst [vmem:[#allocation87_spill] sm:$0xff] %v14687_v13 }
 0x452   : > { %10508 = vmatmul.mubr.f32.gmra.mxu0 %v14388_v53  ;;  %10570 = vmatmul.mubr.f32.gmra.mxu1 %v5707_v62  ;;  %v14702_v62 = vand.u32 4294901760, %v14687_v13 }
 0x453   : > { %10593 = vmatpush3.msra.mxu0 %v16510_v25  ;;  %10656 = vmatprep.subr.mxu1 %v16485_v52  ;;  %v7100_v25 = vsub.f32 %v14744_v0, %v14756_v43 }
 0x454   : > { %10510 = vmatprep.mubr.f32.mxu0 %v14397_v54  ;;  %10594 = vmatprep.subr.mxu0 %v16511_v4  ;;  %16530 = vst [vmem:[#allocation3_spill] sm:$0xff] %v14702_v62  ;;  %v7072_v47 = vsub.f32 %v14687_v13, %v14702_v62 }
 0x455   : > { %10657 = vmatpush3.msra.mxu1 %v16485_v52  ;;  %10660 = vmatprep.mubr.f32.mxu1 %v14230_v37  ;;  %v14698_v52 = vand.u32 4294901760, %v6785_v39 }
 0x456   : > { %10595 = vmatpush3.msra.mxu0 %v16511_v4  ;;  %10658 = vmatprep.subr.mxu1 %v16487_v14  ;;  %v7073_v56 = vand.u32 4294901760, %v7072_v47  ;;  %v14771_v4 = vsub.f32 %v6781_v17, %v14758_v35  ;;  %v6776_v47 = vld [vmem:[%s15623_s4] sm:$0xff] }
 0x457   : > { %10596 = vmatprep.subr.mxu0 %v16512_v58  ;;  %10659 = vmatpush3.msra.mxu1 %v16487_v14  ;;  %16529 = vst [vmem:[#allocation10_spill] sm:$0xff] %v14698_v52  ;;  %v14712_v29 = vsub.f32 %v6785_v39, %v14698_v52  ;;  %v14833_v6 = vand.u32 4294901760, %v6776_v47 }
 0x458   : > { %10511 = vmatmul.mubr.f32.gmra.mxu0 %v14416_v27  ;;  %10661 = vmatmul.mubr.f32.vlgmr.msra.gmra.mxu1 %v14220_v23  ;;  %16543 = vst [vmem:[#allocation80_spill] sm:$0xff] %v14771_v4 }
 0x459   : > { %10597 = vmatpush3.msra.mxu0 %v16512_v58  ;;  %10513 = vmatprep.mubr.f32.mxu0 %v14425_v55  ;;  %16532 = vst [vmem:[#allocation51_spill] sm:$0xff] %v14712_v29  ;;  %v14726_v18 = vand.u32 4294901760, %v14712_v29  ;;  %v14773_v58 = vand.u32 4294901760, %v6780_v46  ;;  %16556 = vst [vmem:[#allocation39_spill] sm:$0xff] %v14833_v6 }
 0x45a   : > { %10598 = vmatprep.subr.mxu0 %v16513_v32  ;;  %10663 = vmatprep.mubr.f32.mxu1 %v14251_v45 }
 0x45b   : > { %10599 = vmatpush3.msra.mxu0 %v16513_v32  ;;  %16534 = vst [vmem:[#allocation54_spill] sm:$0xff] %v14726_v18  ;;  %v7086_v44 = vsub.f32 %v14712_v29, %v14726_v18  ;;  %16544 = vst [vmem:[#allocation4_spill] sm:$0xff] %v14773_v58  ;;  %v14777_v32 = vand.u32 4294901760, %v14762_v3 }
 0x45c   : > { %10600 = vmatprep.subr.mxu0 %v16514_v24  ;;  %10514 = vmatmul.mubr.f32.gmra.mxu0 %v14442_v10 }
 0x45d   : > { %10601 = vmatpush3.msra.mxu0 %v16514_v24  ;;  %10664 = vmatmul.mubr.f32.gmra.mxu1 %v14239_v12  ;;  %v7087_v5 = vand.u32 4294901760, %v7086_v44  ;;  %16545 = vst [vmem:[#allocation13_spill] sm:$0xff] %v14777_v32  ;;  %v6779_v24 = vld [vmem:[%s15623_s4 + $0x18] sm:$0xff] }
 0x45e   : > { %10602 = vmatprep.subr.mxu0 %v16515_v48  ;;  %10604 = vmatprep.mubr.f32.mxu0 %v14230_v37 }
 0x45f   : > { %10666 = vmatprep.mubr.f32.mxu1 %v14277_v9  ;;  %10603 = vmatpush3.msra.mxu0 %v16515_v48  ;;  %v7101_v48 = vand.u32 4294901760, %v7100_v25 }
 0x460   : > { %10605 = vmatmul.mubr.f32.vlgmr.msra.gmra.mxu0 %v14220_v23  ;;  %v6791_v23 = vld [vmem:[%s15623_s4 + $0x78] sm:$0xff] }
 0x461   : > { %10667 = vmatmul.mubr.f32.gmra.mxu1 %v14264_v19  ;;  %10607 = vmatprep.mubr.f32.mxu0 %v14251_v45  ;;  %v14621_v37 = vand.u32 4294901760, %v6791_v23 }
 0x462   : > { %10669 = vmatprep.mubr.f32.mxu1 %v14302_v22 }
 0x463   : > { %v14627_v45 = vsub.f32 %v6791_v23, %v14621_v37  ;;  %10684 = vmatprep.subr.mxu0 %v14621_v37  ;;  %v14784_v23 = vand.u32 4294901760, %v14771_v4 }
 0x464   : > { %10608 = vmatmul.mubr.f32.gmra.mxu0 %v14239_v12  ;;  %v6790_v12 = vld [vmem:[%s15623_s4 + $0x70] sm:$0xff] }
 0x465   : > { %10670 = vmatmul.mubr.f32.gmra.mxu1 %v14280_v8  ;;  %10610 = vmatprep.mubr.f32.mxu0 %v14277_v9  ;;  %16516 = vst [vmem:[#allocation76_spill] sm:$0xff] %v14627_v45  ;;  %v6789_v9 = vld [vmem:[%s15623_s4 + $0x68] sm:$0xff]  ;;  %16546 = vst [vmem:[#allocation6_spill] sm:$0xff] %v14784_v23  ;;  %v7114_v38 = vsub.f32 %v14771_v4, %v14784_v23 }
 0x466   : > { %10672 = vmatprep.mubr.f32.mxu1 %v14327_v50  ;;  %10685 = vmatpush3.msra.mxu0 %v14621_v37 }
 0x467   : > { %v7115_v39 = vand.u32 4294901760, %v7114_v38 }
 0x468   : > { %10611 = vmatmul.mubr.f32.gmra.mxu0 %v14264_v19  ;;  %v14629_v19 = vand.u32 4294901760, %v6790_v12 }
 0x469   : > { %10673 = vmatmul.mubr.f32.gmra.mxu1 %v14337_v11  ;;  %10613 = vmatprep.mubr.f32.mxu0 %v14302_v22 }
 0x46a   : > { %10675 = vmatprep.mubr.f32.mxu1 %v14353_v28  ;;  %v14640_v22 = vsub.f32 %v6790_v12, %v14629_v19  ;;  %10686 = vmatprep.subr.mxu0 %v14629_v19  ;;  %v14787_v12 = vsub.f32 %v6780_v46, %v14773_v58 }
 0x46b   : > { %10687 = vmatpush3.msra.mxu0 %v14629_v19 }
 0x46c   : > { %10614 = vmatmul.mubr.f32.gmra.mxu0 %v14280_v8  ;;  %v14637_v8 = vand.u32 4294901760, %v14627_v45  ;;  %16518 = vst [vmem:[#allocation83_spill] sm:$0xff] %v14640_v22  ;;  %16547 = vst [vmem:[#allocation57_spill] sm:$0xff] %v14787_v12 }
 0x46d   : > { %10676 = vmatmul.mubr.f32.gmra.mxu1 %v14364_v21  ;;  %10616 = vmatprep.mubr.f32.mxu0 %v14327_v50  ;;  %v14642_v50 = vand.u32 4294901760, %v6789_v9 }
 0x46e   : > { %10678 = vmatprep.mubr.f32.mxu1 %v14378_v49  ;;  %16517 = vst [vmem:[#allocation75_spill] sm:$0xff] %v14637_v8 }
 0x46f   : > { %v14655_v59 = vsub.f32 %v6789_v9, %v14642_v50  ;;  %10688 = vmatprep.subr.mxu0 %v14642_v50  ;;  %v14789_v9 = vand.u32 4294901760, %v6779_v24 }
 0x470   : > { %10617 = vmatmul.mubr.f32.gmra.mxu0 %v14337_v11  ;;  %v6788_v11 = vld [vmem:[%s15623_s4 + $0x60] sm:$0xff] }
 0x471   : > { %10679 = vmatmul.mubr.f32.gmra.mxu1 %v14394_v60  ;;  %10619 = vmatprep.mubr.f32.mxu0 %v14353_v28  ;;  %v7044_v28 = vsub.f32 %v14627_v45, %v14637_v8  ;;  %16520 = vst [vmem:[#allocation86_spill] sm:$0xff] %v14655_v59  ;;  %16548 = vst [vmem:[#allocation65_spill] sm:$0xff] %v14789_v9 }
 0x472   : > { %10681 = vmatprep.mubr.f32.mxu1 %v14406_v26  ;;  %10689 = vmatpush3.msra.mxu0 %v14642_v50 }
 0x473   : > { %v7045_v53 = vand.u32 4294901760, %v7044_v28  ;;  %v6778_v28 = vld [vmem:[%s15623_s4 + $0x10] sm:$0xff] }
 0x474   : > { %10620 = vmatmul.mubr.f32.gmra.mxu0 %v14364_v21  ;;  %v14652_v21 = vand.u32 4294901760, %v14640_v22 }
 0x475   : > { %10682 = vmatmul.mubr.f32.gmra.mxu1 %v14422_v15  ;;  %10622 = vmatprep.mubr.f32.mxu0 %v14378_v49  ;;  %v14657_v49 = vand.u32 4294901760, %v6788_v11 }
 0x476   : > { %16519 = vst [vmem:[#allocation69_spill] sm:$0xff] %v14652_v21  ;;  %v7051_v55 = vsub.f32 %v14640_v22, %v14652_v21  ;;  %10740 = vmatprep.subr.mxu1 %v7045_v53 }
 0x477   : > { %16521 = vst [vmem:[#allocation79_spill] sm:$0xff] %v14657_v49  ;;  %v14670_v54 = vsub.f32 %v6788_v11, %v14657_v49  ;;  %10690 = vmatprep.subr.mxu0 %v14657_v49  ;;  %10741 = vmatpush3.msra.mxu1 %v7045_v53  ;;  %v7107_v11 = vsub.f32 %v14762_v3, %v14777_v32  ;;  %v14801_v53 = vand.u32 4294901760, %v14787_v12 }
 0x478   : > { %10623 = vmatmul.mubr.f32.gmra.mxu0 %v14394_v60  ;;  %v14667_v60 = vand.u32 4294901760, %v14655_v59 }
 0x479   : > { %10625 = vmatprep.mubr.f32.mxu0 %v14406_v26  ;;  %16523 = vst [vmem:[#allocation81_spill] sm:$0xff] %v14670_v54  ;;  %10691 = vmatpush3.msra.mxu0 %v14657_v49  ;;  %v7052_v26 = vand.u32 4294901760, %v7051_v55  ;;  %v14682_v27 = vand.u32 4294901760, %v14670_v54  ;;  %16549 = vst [vmem:[#allocation27_spill] sm:$0xff] %v14801_v53  ;;  %v14804_v55 = vsub.f32 %v6779_v24, %v14789_v9 }
 0x47a   : > { %16522 = vst [vmem:[#allocation88_spill] sm:$0xff] %v14667_v60  ;;  %v7058_v57 = vsub.f32 %v14655_v59, %v14667_v60  ;;  %10692 = vmatprep.subr.mxu0 %v14673_v41 }
 0x47b   : > { %16525 = vst [vmem:[#allocation85_spill] sm:$0xff] %v14682_v27  ;;  %10742 = vmatprep.subr.mxu1 %v7052_v26  ;;  %v7065_v10 = vsub.f32 %v14670_v54, %v14682_v27  ;;  %10693 = vmatpush3.msra.mxu0 %v14673_v41  ;;  %16550 = vst [vmem:[#allocation40_spill] sm:$0xff] %v14804_v55 }
 0x47c   : > { %10626 = vmatmul.mubr.f32.gmra.mxu0 %v14422_v15  ;;  %v14684_v15 = vand.u32 4294901760, %v6786_v31  ;;  %v7059_v33 = vand.u32 4294901760, %v7058_v57  ;;  %10743 = vmatpush3.msra.mxu1 %v7052_v26  ;;  %v7108_v26 = vand.u32 4294901760, %v7107_v11  ;;  %v6777_v57 = vld [vmem:[%s15623_s4 + $0x8] sm:$0xff] }
 0x47d   : > { %v7066_v30 = vand.u32 4294901760, %v7065_v10  ;;  %v14816_v10 = vand.u32 4294901760, %v14804_v55 }
 0x47e   : > { %16526 = vst [vmem:[#allocation7_spill] sm:$0xff] %v14684_v15  ;;  %v14696_v2 = vsub.f32 %v6786_v31, %v14684_v15  ;;  %10694 = vmatprep.subr.mxu0 %v14684_v15  ;;  %10744 = vmatprep.subr.mxu1 %v7059_v33  ;;  %v14806_v31 = vand.u32 4294901760, %v6778_v28 }
 0x47f   : > { %10695 = vmatpush3.msra.mxu0 %v14684_v15  ;;  %10745 = vmatpush3.msra.mxu1 %v7059_v33  ;;  %v7121_v33 = vsub.f32 %v14787_v12, %v14801_v53  ;;  %16552 = vst [vmem:[#allocation16_spill] sm:$0xff] %v14816_v10  ;;  %v14899_v53 = vld [vmem:[%s15622_s3 + $0x3] ss:$0 sm:$0xff] }
 0x480   : > { %16528 = vst [vmem:[#allocation82_spill] sm:$0xff] %v14696_v2  ;;  %v14709_v14 = vand.u32 4294901760, %v14696_v2  ;;  %10696 = vmatprep.subr.mxu0 %v14698_v52  ;;  %10746 = vmatprep.subr.mxu1 %v7066_v30  ;;  %16551 = vst [vmem:[#allocation56_spill] sm:$0xff] %v14806_v31  ;;  %v14819_v36 = vsub.f32 %v6778_v28, %v14806_v31 }
 0x481   : > { %10697 = vmatpush3.msra.mxu0 %v14698_v52  ;;  %10747 = vmatpush3.msra.mxu1 %v7066_v30  ;;  %v14822_v30 = vand.u32 4294901760, %v6777_v57  ;;  %v7122_v51 = vand.u32 4294901760, %v7121_v33 }
 0x482   : > { %16531 = vst [vmem:[#allocation62_spill] sm:$0xff] %v14709_v14  ;;  %v7079_v63 = vsub.f32 %v14696_v2, %v14709_v14  ;;  %10698 = vmatprep.subr.mxu0 %v14714_v42  ;;  %10748 = vmatprep.subr.mxu1 %v7073_v56  ;;  %16553 = vst [vmem:[#allocation30_spill] sm:$0xff] %v14819_v36 }
 0x483   : > { %10699 = vmatpush3.msra.mxu0 %v14714_v42  ;;  %10749 = vmatpush3.msra.mxu1 %v7073_v56  ;;  %16554 = vst [vmem:[#allocation36_spill] sm:$0xff] %v14822_v30  ;;  %v14831_v56 = vand.u32 4294901760, %v14819_v36 }
 0x484   : > { %v7080_v61 = vand.u32 4294901760, %v7079_v63  ;;  %10700 = vmatprep.subr.mxu0 %v14731_v20  ;;  %v7128_v63 = vsub.f32 %v14804_v55, %v14816_v10 }
 0x485   : > { %10701 = vmatpush3.msra.mxu0 %v14731_v20  ;;  %16555 = vst [vmem:[#allocation33_spill] sm:$0xff] %v14831_v56  ;;  %v7135_v17 = vsub.f32 %v14819_v36, %v14831_v56 }
 0x486   : > { %10750 = vmatprep.subr.mxu1 %v7080_v61  ;;  %10702 = vmatprep.subr.mxu0 %v14747_v16  ;;  %v7129_v44 = vand.u32 4294901760, %v7128_v63 }
 0x487   : > { %10751 = vmatpush3.msra.mxu1 %v7080_v61  ;;  %10703 = vmatpush3.msra.mxu0 %v14747_v16  ;;  %v14837_v61 = vsub.f32 %v6777_v57, %v14822_v30  ;;  %v7136_v46 = vand.u32 4294901760, %v7135_v17 }
 0x488   : > { %10752 = vmatprep.subr.mxu1 %v7087_v5  ;;  %10704 = vmatprep.subr.mxu0 %v14758_v35 }
 0x489   : > { %10753 = vmatpush3.msra.mxu1 %v7087_v5  ;;  %10705 = vmatpush3.msra.mxu0 %v14758_v35  ;;  %16557 = vst [vmem:[#allocation53_spill] sm:$0xff] %v14837_v61  ;;  %v14843_v5 = vsub.f32 %v6776_v47, %v14833_v6  ;;  %v14847_v34 = vand.u32 4294901760, %v14837_v61 }
 0x48a   : > { %10754 = vmatprep.subr.mxu1 %v7094_v7  ;;  %10706 = vmatprep.subr.mxu0 %v14773_v58 }
 0x48b   : > { %10755 = vmatpush3.msra.mxu1 %v7094_v7  ;;  %10707 = vmatpush3.msra.mxu0 %v14773_v58  ;;  %16558 = vst [vmem:[#allocation71_spill] sm:$0xff] %v14843_v5  ;;  %16559 = vst [vmem:[#allocation73_spill] sm:$0xff] %v14847_v34  ;;  %v14851_v7 = vand.u32 4294901760, %v14843_v5  ;;  %v7142_v25 = vsub.f32 %v14837_v61, %v14847_v34 }
 0x48c   : > { %10756 = vmatprep.subr.mxu1 %v7101_v48  ;;  %10708 = vmatprep.subr.mxu0 %v14789_v9 }
 0x48d   : > { %10757 = vmatpush3.msra.mxu1 %v7101_v48  ;;  %10709 = vmatpush3.msra.mxu0 %v14789_v9  ;;  %16560 = vst [vmem:[#allocation31_spill] sm:$0xff] %v14851_v7  ;;  %v7149_v24 = vsub.f32 %v14843_v5, %v14851_v7  ;;  %v7143_v48 = vand.u32 4294901760, %v7142_v25 }
 0x48e   : > { %10758 = vmatprep.subr.mxu1 %v7108_v26  ;;  %10710 = vmatprep.subr.mxu0 %v14806_v31 }
 0x48f   : > { %10759 = vmatpush3.msra.mxu1 %v7108_v26  ;;  %10711 = vmatpush3.msra.mxu0 %v14806_v31  ;;  %v7150_v11 = vand.u32 4294901760, %v7149_v24 }
 0x490   : > { %10760 = vmatprep.subr.mxu1 %v7115_v39  ;;  %10712 = vmatprep.subr.mxu0 %v14822_v30 }
 0x491   : > { %10761 = vmatpush3.msra.mxu1 %v7115_v39  ;;  %10713 = vmatpush3.msra.mxu0 %v14822_v30 }
 0x492   : > { %10762 = vmatprep.subr.mxu1 %v7122_v51  ;;  %10714 = vmatprep.subr.mxu0 %v14833_v6 }
 0x493   : > { %10763 = vmatpush3.msra.mxu1 %v7122_v51  ;;  %10715 = vmatpush3.msra.mxu0 %v14833_v6 }
 0x494   : > { %10764 = vmatprep.subr.mxu1 %v7129_v44  ;;  %10796 = vmatprep.subr.mxu0 %v14627_v45 }
 0x495   : > { %10765 = vmatpush3.msra.mxu1 %v7129_v44 }
 0x496   : > { %10766 = vmatprep.subr.mxu1 %v7136_v46 }
 0x497   : > { %10767 = vmatpush3.msra.mxu1 %v7136_v46 }
 0x498   : > { %10768 = vmatprep.subr.mxu1 %v7143_v48 }
 0x499   : > { %10769 = vmatpush3.msra.mxu1 %v7143_v48 }
 0x49a   : > { %10770 = vmatprep.subr.mxu1 %v7150_v11 }
 0x49b   : > { %10771 = vmatpush3.msra.mxu1 %v7150_v11 }
 0x49c   : > { %10852 = vmatprep.subr.mxu1 %v14621_v37 }
 0x4bb   : > { %v14860_v28 = vpop.f32.mrf.mxu1 }
 0x4bd   : > { %v14862_v38 = vpop.f32.mrf.mxu1 }
 0x4bf   : > { %v14864_v26 = vpop.f32.mrf.mxu1 }
 0x4c1   : > { %v14866_v57 = vpop.f32.mrf.mxu1 }
 0x4c4   : > { %v14868_v39 = vpop.f32.mrf.mxu0  ;;  %v14870_v33 = vpop.f32.mrf.mxu1 }
 0x4c5   : > { %v5572_v59 = vadd.f32 %v14868_v39, %v14899_v53 }
 0x4c6   : > { %v14872_v47 = vpop.f32.mrf.mxu0  ;;  %v14874_v51 = vpop.f32.mrf.mxu1 }
 0x4c7   : > { %v5869_v22 = vadd.f32 %v14860_v28, %v5572_v59 }
 0x4ca   : > { %v14876_v63 = vpop.f32.mrf.mxu0  ;;  %v14878_v44 = vpop.f32.mrf.mxu1 }
 0x4cc   : > { %v14880_v17 = vpop.f32.mrf.mxu0  ;;  %v14882_v46 = vpop.f32.mrf.mxu1 }
 0x4d0   : > { %v14884_v25 = vpop.f32.mrf.mxu0  ;;  %v10450_v24 = vpop.f32.mrf.mxu1 }
 0x4d2   : > { %v14886_v48 = vpop.f32.mrf.mxu0  ;;  %v14888_v11 = vpop.f32.mrf.mxu1 }
 0x4d3   : > { %v5602_v59 = vadd.f32 %v14899_v53, %v14886_v48 }
 0x4d6   : > { %v14890_v7 = vpop.f32.mrf.mxu0  ;;  %v10453_v34 = vpop.f32.mrf.mxu1 }
 0x4d7   : > { %v5632_v28 = vadd.f32 %v14890_v7, %v14899_v53 }
 0x4d8   : > { %v14892_v56 = vpop.f32.mrf.mxu0  ;;  %v14894_v10 = vpop.f32.mrf.mxu1 }
 0x4dc   : > { %v10394_v23 = vpop.f32.mrf.mxu0  ;;  %v10456_v32 = vpop.f32.mrf.mxu1 }
 0x4dd   : > { %v5652_v43 = vadd.f32 %v10394_v23, %v14899_v53 }
 0x4de   : > { %v14902_v40 = vpop.f32.mrf.mxu0  ;;  %v5934_v18 = vpop.f32.mrf.mxu1 }
 0x4df   : > { %v14904_v14 = vadd.f32 %v10450_v24, %v5652_v43 }
 0x4e2   : > { %v10397_v62 = vpop.f32.mrf.mxu0  ;;  %v10459_v27 = vpop.f32.mrf.mxu1 }
 0x4e3   : > { %v5672_v60 = vadd.f32 %v10397_v62, %v14899_v53 }
 0x4e4   : > { %v14907_v21 = vpop.f32.mrf.mxu0  ;;  %v5946_v8 = vpop.f32.mrf.mxu1 }
 0x4e5   : > { %v14909_v5 = vadd.f32 %v10453_v34, %v5672_v60 }
 0x4e8   : > { %v10400_v61 = vpop.f32.mrf.mxu0  ;;  %v10550_v36 = vpop.f32.mrf.mxu1 }
 0x4e9   : > { %v5692_v55 = vadd.f32 %v10400_v61, %v14899_v53 }
 0x4ea   : > { %v5681_v6 = vpop.f32.mrf.mxu0  ;;  %v14912_v23 = vpop.f32.mrf.mxu1 }
 0x4eb   : > { %v5682_v12 = vadd.f32 %v14899_v53, %v5681_v6  ;;  %v14915_v43 = vadd.f32 %v10456_v32, %v5692_v55 }
 0x4ed   : > { %v14917_v24 = vadd.f32 %v5934_v18, %v5682_v12 }
 0x4ee   : > { %v10403_v30 = vpop.f32.mrf.mxu0  ;;  %v14919_v62 = vpop.f32.mrf.mxu1 }
 0x4ef   : > { %16561 = vst [vmem:[#allocation63_spill] sm:$0xff] %v14917_v24  ;;  %v5712_v4 = vadd.f32 %v10403_v30, %v14899_v53 }
 0x4f0   : > { %v5701_v60 = vpop.f32.mrf.mxu0  ;;  %v14922_v34 = vpop.f32.mrf.mxu1 }
 0x4f1   : > { %v5702_v31 = vadd.f32 %v14899_v53, %v5701_v60  ;;  %v14925_v61 = vadd.f32 %v10459_v27, %v5712_v4 }
 0x4f3   : > { %16562 = vst [vmem:[#allocation48_spill] sm:$0xff] %v14925_v61  ;;  %v14927_v3 = vadd.f32 %v5946_v8, %v5702_v31 }
 0x4f4   : > { %v10494_v9 = vpop.f32.mrf.mxu0  ;;  %v14929_v6 = vpop.f32.mrf.mxu1 }
 0x4f5   : > { %16563 = vst [vmem:[#allocation43_spill] sm:$0xff] %v14927_v3  ;;  %v5562_v3 = vadd.f32 %v14899_v53, %v14872_v47  ;;  %v6064_v45 = vadd.f32 %v10494_v9, %v5869_v22  ;;  %v5612_v47 = vadd.f32 %v14884_v25, %v14899_v53 }
 0x4f6   : > { %v6056_v32 = vpop.f32.mrf.mxu0  ;;  %v14931_v18 = vpop.f32.mrf.mxu1 }
 0x4f7   : > { %v5863_v39 = vadd.f32 %v14862_v38, %v5562_v3  ;;  %v6259_v38 = vadd.f32 %v10550_v36, %v6064_v45  ;;  %v5887_v45 = vadd.f32 %v14874_v51, %v5602_v59  ;;  %v5905_v36 = vadd.f32 %v14878_v44, %v5632_v28 }
 0x4f9   : > { %v6057_v24 = vadd.f32 %v6056_v32, %v5863_v39 }
 0x4fa   : > { %v10497_v12 = vpop.f32.mrf.mxu0  ;;  %v14933_v55 = vpop.f32.mrf.mxu1 }
 0x4fb   : > { %v6251_v7 = vadd.f32 %v14912_v23, %v6057_v24 }
 0x4fc   : > { %v6070_v0 = vpop.f32.mrf.mxu0  ;;  %v14935_v30 = vpop.f32.mrf.mxu1 }
 0x500   : > { %v10500_v58 = vpop.f32.mrf.mxu0  ;;  %v14937_v1 = vpop.f32.mrf.mxu1 }
 0x502   : > { %v6084_v60 = vpop.f32.mrf.mxu0  ;;  %v14939_v27 = vpop.f32.mrf.mxu1 }
 0x506   : > { %v10503_v8 = vpop.f32.mrf.mxu0  ;;  %v14941_v4 = vpop.f32.mrf.mxu1 }
 0x508   : > { %v6098_v31 = vpop.f32.mrf.mxu0  ;;  %v14943_v35 = vpop.f32.mrf.mxu1 }
 0x50c   : > { %v10506_v29 = vpop.f32.mrf.mxu0  ;;  %v14945_v16 = vpop.f32.mrf.mxu1 }
 0x50d   : > { %16564 = vst [vmem:[#allocation72_spill] sm:$0xff] %v14945_v16 }
 0x50e   : > { %v14947_v2 = vpop.f32.mrf.mxu0  ;;  %v14949_v20 = vpop.f32.mrf.mxu1 }
 0x50f   : > { %16565 = vst [vmem:[#allocation15_spill] sm:$0xff] %v14949_v20  ;;  %v5592_v20 = vadd.f32 %v14876_v63, %v14899_v53 }
 0x511   : > { %v5881_v49 = vadd.f32 %v14864_v26, %v5592_v20  ;;  %v5642_v20 = vadd.f32 %v14899_v53, %v14902_v40  ;;  %v5893_v26 = vadd.f32 %v14870_v33, %v5612_v47  ;;  %v6085_v47 = vadd.f32 %v6084_v60, %v5887_v45 }
 0x512   : > { %v14951_v13 = vpop.f32.mrf.mxu0  ;;  %v14953_v42 = vpop.f32.mrf.mxu1 }
 0x513   : > { %16566 = vst [vmem:[#allocation22_spill] sm:$0xff] %v14953_v42  ;;  %v6078_v22 = vadd.f32 %v10497_v12, %v5881_v49  ;;  %v5662_v49 = vadd.f32 %v14899_v53, %v14907_v21  ;;  %v5911_v23 = vadd.f32 %v14888_v11, %v5642_v20 }
 0x514   : > { %v14955_v54 = vpop.f32.mrf.mxu0  ;;  %v14957_v52 = vpop.f32.mrf.mxu1 }
 0x515   : > { %16567 = vst [vmem:[#allocation42_spill] sm:$0xff] %v14957_v52  ;;  %v5582_v52 = vadd.f32 %v14899_v53, %v14880_v17  ;;  %v5622_v17 = vadd.f32 %v14899_v53, %v14892_v56  ;;  %v6275_v33 = vadd.f32 %v14919_v62, %v6078_v22  ;;  %v5923_v59 = vadd.f32 %v14894_v10, %v5662_v49 }
 0x517   : > { %v5875_v3 = vadd.f32 %v14866_v57, %v5582_v52  ;;  %v6092_v52 = vadd.f32 %v10500_v58, %v5893_v26  ;;  %v6127_v26 = vadd.f32 %v14955_v54, %v5923_v59 }
 0x518   : > { %v14963_v61 = vpop.f32.mrf.mxu0  ;;  %v10662_v15 = vpop.f32.mrf.mxu1 }
 0x519   : > { %v6071_v48 = vadd.f32 %v6070_v0, %v5875_v3  ;;  %v6106_v0 = vadd.f32 %v10503_v8, %v5905_v36  ;;  %v5899_v3 = vadd.f32 %v14882_v46, %v5622_v17  ;;  %v6291_v62 = vadd.f32 %v14929_v6, %v6092_v52 }
 0x51a   : > { %v14968_v41 = vpop.f32.mrf.mxu0  ;;  %v6666_v42 = vpop.f32.mrf.mxu1  ;;  %v6134_v17 = vadd.f32 %v14951_v13, %v14909_v5 }
 0x51b   : > { %16568 = vst [vmem:[#allocation23_spill] sm:$0xff] %v14968_v41  ;;  %v6267_v51 = vadd.f32 %v14922_v34, %v6071_v48  ;;  %v6099_v44 = vadd.f32 %v6098_v31, %v5899_v3  ;;  %v6283_v31 = vadd.f32 %v14931_v18, %v6085_v47  ;;  %v6148_v47 = vadd.f32 %v14963_v61, %v14915_v43 }
 0x51c   : > { %v14975_v16 = vpop.f32.mrf.mxu0 }
 0x51d   : > { %v10665_v63 = vpop.f32.mrf.mxu1  ;;  %v6299_v48 = vadd.f32 %v14935_v30, %v6099_v44 }
 0x51e   : > { %v14982_v41 = vpop.f32.mrf.mxu0 }
 0x51f   : > { %v6678_v9 = vpop.f32.mrf.mxu1 }
 0x520   : > { %v10606_v25 = vpop.f32.mrf.mxu0 }
 0x521   : > { %v6496_v32 = vadd.f32 %v10606_v25, %v6259_v38  ;;  %v10668_v39 = vpop.f32.mrf.mxu1 }
 0x522   : > { %v6489_v56 = vpop.f32.mrf.mxu0 }
 0x523   : > { %v6673_v57 = vadd.f32 %v10662_v15, %v6496_v32  ;;  %v6490_v12 = vadd.f32 %v6489_v56, %v6251_v7  ;;  %v6690_v40 = vpop.f32.mrf.mxu1  ;;  %v6120_v15 = vadd.f32 %v10506_v29, %v14904_v14  ;;  %v6307_v14 = vadd.f32 %v14933_v55, %v6106_v0 }
 0x524   : > { %v10609_v24 = vpop.f32.mrf.mxu0 }
 0x525   : > { %v6761_v38 = vmax.f32 %v6673_v57, 0.0  ;;  %v6667_v21 = vadd.f32 %v6666_v42, %v6490_v12  ;;  %v6508_v58 = vadd.f32 %v10609_v24, %v6275_v33  ;;  %v10671_v53 = vpop.f32.mrf.mxu1  ;;  %v6113_v42 = vadd.f32 %v14947_v2, %v5911_v23 }
 0x526   : > { %v6501_v28 = vpop.f32.mrf.mxu0  ;;  %v6323_v13 = vadd.f32 %v14937_v1, %v6120_v15  ;;  %v6339_v1 = vadd.f32 %v14941_v4, %v6134_v17  ;;  %v6331_v4 = vadd.f32 %v14943_v35, %v6127_v26  ;;  %v16572_v26 = vld [vmem:[#allocation72_spill] sm:$0xff] }
 0x527   : > { %v15002_v60 = vand.u32 4294901760, %v6761_v38  ;;  %v6760_v46 = vmax.f32 %v6667_v21, 0.0  ;;  %v6685_v8 = vadd.f32 %v10665_v63, %v6508_v58  ;;  %v6502_v11 = vadd.f32 %v6501_v28, %v6267_v51  ;;  %v6702_v22 = vpop.f32.mrf.mxu1 }
 0x528   : > { %v10612_v34 = vpop.f32.mrf.mxu0  ;;  %v6315_v30 = vadd.f32 %v14939_v27, %v6113_v42 }
 0x529   : > { %v15010_v29 = vsub.f32 %v6761_v38, %v15002_v60  ;;  %v15012_v10 = vand.u32 4294901760, %v6760_v46  ;;  %v6763_v6 = vmax.f32 %v6685_v8, 0.0  ;;  %v6679_v20 = vadd.f32 %v6678_v9, %v6502_v11  ;;  %v10674_v63 = vpop.f32.mrf.mxu1 }
 0x52a   : > { %v6520_v25 = vadd.f32 %v10612_v34, %v6291_v62  ;;  %v6513_v2 = vpop.f32.mrf.mxu0  ;;  %v16569_v62 = vld [vmem:[#allocation79_spill] sm:$0xff] }
 0x52b   : > { %v6892_v5 = vand.u32 4294901760, %v15010_v29  ;;  %v15019_v18 = vsub.f32 %v6760_v46, %v15012_v10  ;;  %v15021_v55 = vand.u32 4294901760, %v6763_v6  ;;  %v6762_v32 = vmax.f32 %v6679_v20, 0.0  ;;  %v6714_v7 = vpop.f32.mrf.mxu1  ;;  %10772 = vmatprep.mubr.f32.mxu1 %v15012_v10  ;;  %v16570_v34 = vld [vmem:[#allocation63_spill] sm:$0xff] }
 0x52c   : > { %v6697_v9 = vadd.f32 %v10668_v39, %v6520_v25  ;;  %v6514_v49 = vadd.f32 %v6513_v2, %v6283_v31  ;;  %v10615_v54 = vpop.f32.mrf.mxu0  ;;  %10773 = vmatmul.mubr.f32.vlgmr.msra.gmra.mxu1 %v15002_v60  ;;  %v16571_v31 = vld [vmem:[#allocation23_spill] sm:$0xff]  ;;  %v6355_v25 = vadd.f32 %v16572_v26, %v6148_v47 }
 0x52d   : > { %v6893_v52 = vsub.f32 %v15010_v29, %v6892_v5  ;;  %v15031_v45 = vsub.f32 %v6763_v6, %v15021_v55  ;;  %v15033_v36 = vand.u32 4294901760, %v6762_v32  ;;  %v6532_v56 = vadd.f32 %v10615_v54, %v6307_v14  ;;  %v10677_v57 = vpop.f32.mrf.mxu1  ;;  %10853 = vmatpush3.msra.mxu1 %v14621_v37  ;;  %v16574_v54 = vld [vmem:[#allocation2_spill] sm:$0xff] }
 0x52e   : > { %v6765_v39 = vmax.f32 %v6697_v9, 0.0  ;;  %v6691_v12 = vadd.f32 %v6690_v40, %v6514_v49  ;;  %v6525_v33 = vpop.f32.mrf.mxu0  ;;  %10854 = vmatprep.subr.mxu1 %v14629_v19  ;;  %v6882_v27 = vand.u32 4294901760, %v15019_v18  ;;  %v6141_v14 = vadd.f32 %v16571_v31, %v16570_v34  ;;  %v16573_v49 = vld [vmem:[#allocation76_spill] sm:$0xff] }
 0x52f   : > { %v6894_v0 = vand.u32 4294901760, %v6893_v52  ;;  %v15042_v3 = vsub.f32 %v6762_v32, %v15033_v36  ;;  %v6709_v23 = vadd.f32 %v10671_v53, %v6532_v56  ;;  %10775 = vmatprep.mubr.f32.mxu1 %v15033_v36  ;;  %10855 = vmatpush3.msra.mxu1 %v14629_v19  ;;  %v6526_v38 = vadd.f32 %v6525_v33, %v6299_v48  ;;  %v6726_v21 = vpop.f32.mrf.mxu1  ;;  %v16575_v33 = vld [vmem:[#allocation83_spill] sm:$0xff] }
 0x530   : > { %v15046_v40 = vand.u32 4294901760, %v6765_v39  ;;  %v6764_v24 = vmax.f32 %v6691_v12, 0.0  ;;  %v10618_v58 = vpop.f32.mrf.mxu0  ;;  %10776 = vmatmul.mubr.f32.gmra.mxu1 %v15021_v55  ;;  %10856 = vmatprep.subr.mxu1 %v14642_v50  ;;  %v6883_v35 = vsub.f32 %v15019_v18, %v6882_v27  ;;  %v6912_v43 = vand.u32 4294901760, %v15031_v45 }
 0x531   : > { %v6767_v61 = vmax.f32 %v6709_v23, 0.0  ;;  %v6544_v53 = vadd.f32 %v10618_v58, %v6323_v13  ;;  %10857 = vmatpush3.msra.mxu1 %v14642_v50  ;;  %v6902_v51 = vand.u32 4294901760, %v15042_v3  ;;  %v6703_v59 = vadd.f32 %v6702_v22, %v6526_v38  ;;  %v15075_v20 = vpop.f32.mrf.mxu1 }
 0x532   : > { %v15057_v44 = vsub.f32 %v6765_v39, %v15046_v40  ;;  %v15059_v15 = vand.u32 4294901760, %v6764_v24  ;;  %v6537_v28 = vpop.f32.mrf.mxu0  ;;  %10858 = vmatprep.subr.mxu1 %v16569_v62  ;;  %v6884_v46 = vand.u32 4294901760, %v6883_v35  ;;  %v6913_v13 = vsub.f32 %v15031_v45, %v6912_v43 }
 0x533   : > { %v15062_v8 = vand.u32 4294901760, %v6767_v61  ;;  %v15064_v11 = vadd.f32 %v10674_v63, %v6544_v53  ;;  %v6538_v42 = vadd.f32 %v6537_v28, %v6315_v30  ;;  %10859 = vmatpush3.msra.mxu1 %v16569_v62  ;;  %v6903_v17 = vsub.f32 %v15042_v3, %v6902_v51 }
 0x534   : > { %v15073_v22 = vsub.f32 %v6764_v24, %v15059_v15  ;;  %v6766_v6 = vmax.f32 %v6703_v59, 0.0  ;;  %10716 = vmatprep.mubr.f32.mxu0 %v6884_v46  ;;  %10778 = vmatprep.mubr.f32.mxu1 %v15059_v15  ;;  %v10621_v63 = vpop.f32.mrf.mxu0  ;;  %v6932_v32 = vand.u32 4294901760, %v15057_v44  ;;  %v16576_v24 = vld [vmem:[#allocation7_spill] sm:$0xff]  ;;  %v16579_v46 = vld [vmem:[#allocation86_spill] sm:$0xff] }
 0x535   : > { %v6715_v2 = vadd.f32 %v6714_v7, %v6538_v42  ;;  %v6556_v48 = vadd.f32 %v10621_v63, %v6339_v1  ;;  %10717 = vmatmul.mubr.f32.vlgmr.msra.gmra.mxu0 %v6894_v0  ;;  %10779 = vmatmul.mubr.f32.gmra.mxu1 %v15046_v40  ;;  %v6904_v52 = vand.u32 4294901760, %v6903_v17  ;;  %v15090_v1 = vsub.f32 %v6767_v61, %v15062_v8  ;;  %v6738_v0 = vpop.f32.mrf.mxu1  ;;  %v16578_v61 = vld [vmem:[#allocation43_spill] sm:$0xff] }
 0x536   : > { %v15084_v9 = vand.u32 4294901760, %v6766_v6  ;;  %10797 = vmatpush3.msra.mxu0 %v16573_v49  ;;  %10860 = vmatprep.subr.mxu1 %v16574_v54  ;;  %v6549_v30 = vpop.f32.mrf.mxu0  ;;  %v6922_v7 = vand.u32 4294901760, %v15073_v22  ;;  %v6769_v56 = vmax.f32 %v15064_v11, 0.0  ;;  %v6155_v53 = vadd.f32 %v14982_v41, %v16578_v61  ;;  %v16580_v11 = vld [vmem:[#allocation15_spill] sm:$0xff] }
 0x537   : > { %v6768_v39 = vmax.f32 %v6715_v2, 0.0  ;;  %v15093_v12 = vadd.f32 %v10677_v57, %v6556_v48  ;;  %10798 = vmatprep.subr.mxu0 %v16575_v33  ;;  %10861 = vmatpush3.msra.mxu1 %v16574_v54  ;;  %v6550_v23 = vadd.f32 %v6549_v30, %v6331_v4  ;;  %v16577_v57 = vld [vmem:[#allocation48_spill] sm:$0xff]  ;;  %v6914_v4 = vand.u32 4294901760, %v6913_v13  ;;  %v10683_v26 = vpop.f32.mrf.mxu1  ;;  %v16581_v48 = vld [vmem:[#allocation10_spill] sm:$0xff]  ;;  %v16582_v30 = vld [vmem:[#allocation81_spill] sm:$0xff] }
 0x538   : > { %v15098_v47 = vsub.f32 %v6766_v6, %v15084_v9  ;;  %10799 = vmatpush3.msra.mxu0 %v16575_v33  ;;  %10862 = vmatprep.subr.mxu1 %v16576_v24  ;;  %v10624_v38 = vpop.f32.mrf.mxu0  ;;  %v6923_v58 = vsub.f32 %v15073_v22, %v6922_v7  ;;  %v6162_v35 = vadd.f32 %v14975_v16, %v16577_v57  ;;  %v15119_v34 = vand.u32 4294901760, %v6769_v56 }
 0x539   : > { %v15109_v59 = vand.u32 4294901760, %v6768_v39  ;;  %10719 = vmatprep.mubr.f32.mxu0 %v6904_v52  ;;  %10781 = vmatprep.mubr.f32.mxu1 %v15084_v9  ;;  %v6727_v28 = vadd.f32 %v6726_v21, %v6550_v23  ;;  %v6347_v42 = vadd.f32 %v16580_v11, %v6141_v14  ;;  %v6933_v16 = vsub.f32 %v15057_v44, %v6932_v32  ;;  %v16584_v23 = vld [vmem:[#allocation52_spill] sm:$0xff]  ;;  %v6750_v11 = vpop.f32.mrf.mxu1 }
 0x53a   : > { %10800 = vmatprep.subr.mxu0 %v16579_v46  ;;  %10863 = vmatpush3.msra.mxu1 %v16576_v24  ;;  %v6561_v17 = vpop.f32.mrf.mxu0  ;;  %v6942_v41 = vand.u32 4294901760, %v15098_v47  ;;  %v6568_v6 = vadd.f32 %v10624_v38, %v6355_v25  ;;  %v6924_v21 = vand.u32 4294901760, %v6923_v58  ;;  %v16056_v63 = vand.u32 4294901760, %v15090_v1  ;;  %v16583_v25 = vld [vmem:[#allocation42_spill] sm:$0xff] }
 0x53b   : > { %v15122_v31 = vsub.f32 %v6768_v39, %v15109_v59  ;;  %10720 = vmatmul.mubr.f32.gmra.mxu0 %v6914_v4  ;;  %10782 = vmatmul.mubr.f32.gmra.mxu1 %v15062_v8  ;;  %v6771_v14 = vmax.f32 %v15093_v12, 0.0  ;;  %v6770_v2 = vmax.f32 %v6727_v28, 0.0  ;;  %v6562_v13 = vadd.f32 %v6561_v17, %v6347_v42  ;;  %v16585_v38 = vld [vmem:[#allocation22_spill] sm:$0xff]  ;;  %v16586_v17 = vld [vmem:[#allocation87_spill] sm:$0xff] }
 0x53c   : > { %10801 = vmatpush3.msra.mxu0 %v16579_v46  ;;  %10864 = vmatprep.subr.mxu1 %v16581_v48  ;;  %v10627_v49 = vpop.f32.mrf.mxu0  ;;  %v6363_v52 = vadd.f32 %v16583_v25, %v6155_v53  ;;  %v6943_v39 = vsub.f32 %v15098_v47, %v6942_v41  ;;  %v6371_v58 = vadd.f32 %v16585_v38, %v6162_v35  ;;  %v6934_v57 = vand.u32 4294901760, %v6933_v16 }
 0x53d   : > { %10802 = vmatprep.subr.mxu0 %v16582_v30  ;;  %10865 = vmatpush3.msra.mxu1 %v16581_v48  ;;  %v15135_v33 = vand.u32 4294901760, %v6770_v2  ;;  %v6739_v12 = vadd.f32 %v6738_v0, %v6562_v13  ;;  %v15141_v4 = vsub.f32 %v6769_v56, %v15119_v34  ;;  %v6745_v53 = vadd.f32 %v15075_v20, %v6568_v6 }
 0x53e   : > { %10803 = vmatpush3.msra.mxu0 %v16582_v30  ;;  %10866 = vmatprep.subr.mxu1 %v16584_v23  ;;  %v6573_v61 = vpop.f32.mrf.mxu0  ;;  %v16053_v46 = vand.u32 4294901760, %v15122_v31  ;;  %v15146_v0 = vand.u32 4294901760, %v6771_v14  ;;  %v6953_v56 = vsub.f32 %v15090_v1, %v16056_v63  ;;  %v6580_v35 = vadd.f32 %v10627_v49, %v6371_v58  ;;  %v16589_v49 = vld [vmem:[#allocation74_spill] sm:$0xff] }
 0x53f   : > { %10722 = vmatprep.mubr.f32.mxu0 %v6924_v21  ;;  %10784 = vmatprep.mubr.f32.mxu1 %v15109_v59  ;;  %v6574_v28 = vadd.f32 %v6573_v61, %v6363_v52  ;;  %v6772_v42 = vmax.f32 %v6739_v12, 0.0  ;;  %v15154_v20 = vsub.f32 %v6770_v2, %v15135_v33  ;;  %v6944_v6 = vand.u32 4294901760, %v6943_v39  ;;  %v16587_v21 = vld [vmem:[#allocation55_spill] sm:$0xff]  ;;  %v16588_v52 = vld [vmem:[#allocation82_spill] sm:$0xff] }
 0x540   : > { %10804 = vmatprep.subr.mxu0 %v16586_v17  ;;  %10867 = vmatpush3.msra.mxu1 %v16584_v23  ;;  %v16051_v13 = vand.u32 4294901760, %v15141_v4  ;;  %v6773_v30 = vmax.f32 %v6745_v53, 0.0  ;;  %v6963_v2 = vsub.f32 %v15122_v31, %v16053_v46  ;;  %v6954_v39 = vand.u32 4294901760, %v6953_v56  ;;  %v16590_v61 = vld [vmem:[#allocation51_spill] sm:$0xff]  ;;  %v16598_v46 = vld [vmem:[#allocation80_spill] sm:$0xff] }
 0x541   : > { %10723 = vmatmul.mubr.f32.gmra.mxu0 %v6934_v57  ;;  %10785 = vmatmul.mubr.f32.gmra.mxu1 %v15119_v34  ;;  %v6751_v16 = vadd.f32 %v6750_v11, %v6574_v28  ;;  %v15160_v25 = vand.u32 4294901760, %v6772_v42  ;;  %v15170_v12 = vsub.f32 %v6771_v14, %v15146_v0  ;;  %v6757_v38 = vadd.f32 %v10683_v26, %v6580_v35  ;;  %v16591_v11 = vld [vmem:[#allocation77_spill] sm:$0xff] }
 0x542   : > { %10805 = vmatpush3.msra.mxu0 %v16586_v17  ;;  %10868 = vmatprep.subr.mxu1 %v16587_v21  ;;  %v16050_v57 = vand.u32 4294901760, %v15154_v20  ;;  %v15176_v53 = vand.u32 4294901760, %v6773_v30  ;;  %v6964_v14 = vand.u32 4294901760, %v6963_v2  ;;  %v6973_v26 = vsub.f32 %v15141_v4, %v16051_v13  ;;  %v16596_v13 = vld [vmem:[#allocation78_spill] sm:$0xff] }
 0x543   : > { %10806 = vmatprep.subr.mxu0 %v16588_v52  ;;  %10869 = vmatpush3.msra.mxu1 %v16587_v21  ;;  %v6774_v58 = vmax.f32 %v6751_v16, 0.0  ;;  %v15179_v28 = vsub.f32 %v6772_v42, %v15160_v25  ;;  %v16052_v17 = vand.u32 4294901760, %v15170_v12  ;;  %v6775_v56 = vmax.f32 %v6757_v38, 0.0  ;;  %v16592_v16 = vld [vmem:[#allocation58_spill] sm:$0xff]  ;;  %v16594_v38 = vld [vmem:[#allocation67_spill] sm:$0xff] }
 0x544   : > { %10807 = vmatpush3.msra.mxu0 %v16588_v52  ;;  %10870 = vmatprep.subr.mxu1 %v16589_v49  ;;  %v6983_v42 = vsub.f32 %v15154_v20, %v16050_v57  ;;  %v15198_v52 = vsub.f32 %v6773_v30, %v15176_v53  ;;  %v6974_v2 = vand.u32 4294901760, %v6973_v26  ;;  %v16595_v26 = vld [vmem:[#allocation65_spill] sm:$0xff] }
 0x545   : > { %10725 = vmatprep.mubr.f32.mxu0 %v6944_v6  ;;  %10787 = vmatprep.mubr.f32.mxu1 %v15135_v33  ;;  %v15188_v35 = vand.u32 4294901760, %v6774_v58  ;;  %v16593_v6 = vld [vmem:[#allocation4_spill] sm:$0xff] }
 0x546   : > { %10808 = vmatprep.subr.mxu0 %v16590_v61  ;;  %10871 = vmatpush3.msra.mxu1 %v16589_v49  ;;  %v6984_v30 = vand.u32 4294901760, %v6983_v42  ;;  %v16597_v42 = vld [vmem:[#allocation56_spill] sm:$0xff] }
 0x547   : > { %10726 = vmatmul.mubr.f32.gmra.mxu0 %v6954_v39  ;;  %10788 = vmatmul.mubr.f32.gmra.mxu1 %v15146_v0  ;;  %v16054_v39 = vand.u32 4294901760, %v15179_v28  ;;  %v15207_v57 = vsub.f32 %v6774_v58, %v15188_v35 }
 0x548   : > { %10809 = vmatpush3.msra.mxu0 %v16590_v61  ;;  %10872 = vmatprep.subr.mxu1 %v16591_v11  ;;  %v15204_v61 = vand.u32 4294901760, %v6775_v56 }
 0x549   : > { %10810 = vmatprep.subr.mxu0 %v16592_v16  ;;  %10873 = vmatpush3.msra.mxu1 %v16591_v11  ;;  %v7003_v58 = vsub.f32 %v15179_v28, %v16054_v39 }
 0x54a   : > { %10811 = vmatpush3.msra.mxu0 %v16592_v16  ;;  %10874 = vmatprep.subr.mxu1 %v16593_v6  ;;  %v16055_v16 = vand.u32 4294901760, %v15198_v52 }
 0x54b   : > { %10728 = vmatprep.mubr.f32.mxu0 %v6964_v14  ;;  %10790 = vmatprep.mubr.f32.mxu1 %v15160_v25  ;;  %v6993_v14 = vsub.f32 %v15170_v12, %v16052_v17  ;;  %v16057_v17 = vand.u32 4294901760, %v15207_v57  ;;  %v7004_v39 = vand.u32 4294901760, %v7003_v58  ;;  %v16601_v58 = vld [vmem:[#allocation39_spill] sm:$0xff] }
 0x54c   : > { %10812 = vmatprep.subr.mxu0 %v16594_v38  ;;  %10875 = vmatpush3.msra.mxu1 %v16593_v6 }
 0x54d   : > { %10729 = vmatmul.mubr.f32.gmra.mxu0 %v6974_v2  ;;  %10791 = vmatmul.mubr.f32.gmra.mxu1 %v15176_v53  ;;  %v15224_v2 = vsub.f32 %v6775_v56, %v15204_v61  ;;  %v16599_v56 = vld [vmem:[#allocation36_spill] sm:$0xff] }
 0x54e   : > { %10813 = vmatpush3.msra.mxu0 %v16594_v38  ;;  %10876 = vmatprep.subr.mxu1 %v16595_v26  ;;  %v6994_v38 = vand.u32 4294901760, %v6993_v14  ;;  %v16600_v14 = vld [vmem:[#allocation57_spill] sm:$0xff] }
 0x54f   : > { %10814 = vmatprep.subr.mxu0 %v16596_v13  ;;  %10877 = vmatpush3.msra.mxu1 %v16595_v26 }
 0x550   : > { %10815 = vmatpush3.msra.mxu0 %v16596_v13  ;;  %10878 = vmatprep.subr.mxu1 %v16597_v42  ;;  %v7013_v13 = vsub.f32 %v15198_v52, %v16055_v16  ;;  %v16602_v16 = vld [vmem:[#allocation40_spill] sm:$0xff] }
 0x551   : > { %10731 = vmatprep.mubr.f32.mxu0 %v6984_v30  ;;  %10793 = vmatprep.mubr.f32.mxu1 %v15188_v35  ;;  %v7032_v30 = vand.u32 4294901760, %v15224_v2 }
 0x552   : > { %10816 = vmatprep.subr.mxu0 %v16598_v46  ;;  %10879 = vmatpush3.msra.mxu1 %v16597_v42 }
 0x553   : > { %10732 = vmatmul.mubr.f32.gmra.mxu0 %v6994_v38  ;;  %10794 = vmatmul.mubr.f32.gmra.mxu1 %v15204_v61  ;;  %v7023_v38 = vsub.f32 %v15207_v57, %v16057_v17  ;;  %v7033_v17 = vsub.f32 %v15224_v2, %v7032_v30 }
 0x554   : > { %10817 = vmatpush3.msra.mxu0 %v16598_v46  ;;  %10880 = vmatprep.subr.mxu1 %v16599_v56  ;;  %v7014_v46 = vand.u32 4294901760, %v7013_v13 }
 0x555   : > { %10818 = vmatprep.subr.mxu0 %v16600_v14  ;;  %10881 = vmatpush3.msra.mxu1 %v16599_v56  ;;  %v7024_v63 = vand.u32 4294901760, %v7023_v38 }
 0x556   : > { %10884 = vmatprep.mubr.f32.mxu1 %v6882_v27  ;;  %10819 = vmatpush3.msra.mxu0 %v16600_v14  ;;  %v16603_v27 = vld [vmem:[#allocation30_spill] sm:$0xff] }
 0x557   : > { %10882 = vmatprep.subr.mxu1 %v16601_v58  ;;  %10734 = vmatprep.mubr.f32.mxu0 %v7004_v39  ;;  %v16604_v39 = vld [vmem:[#allocation53_spill] sm:$0xff] }
 0x558   : > { %10820 = vmatprep.subr.mxu0 %v16602_v16  ;;  %10883 = vmatpush3.msra.mxu1 %v16601_v58 }
 0x559   : > { %10735 = vmatmul.mubr.f32.gmra.mxu0 %v7014_v46  ;;  %10885 = vmatmul.mubr.f32.vlgmr.msra.gmra.mxu1 %v6892_v5  ;;  %v7034_v5 = vand.u32 4294901760, %v7033_v17 }
 0x55a   : > { %10821 = vmatpush3.msra.mxu0 %v16602_v16  ;;  %10964 = vmatprep.subr.mxu1 %v14621_v37 }
 0x55b   : > { %10822 = vmatprep.subr.mxu0 %v16603_v27  ;;  %10887 = vmatprep.mubr.f32.mxu1 %v6902_v51  ;;  %v16605_v51 = vld [vmem:[#allocation71_spill] sm:$0xff] }
 0x55c   : > { %10965 = vmatpush3.msra.mxu1 %v14621_v37  ;;  %10823 = vmatpush3.msra.mxu0 %v16603_v27  ;;  %v16606_v37 = vld [vmem:[#allocation75_spill] sm:$0xff] }
 0x55d   : > { %10966 = vmatprep.subr.mxu1 %v14629_v19  ;;  %10737 = vmatprep.mubr.f32.mxu0 %v7024_v63  ;;  %v16625_v63 = vld [vmem:[#allocation27_spill] sm:$0xff] }
 0x55e   : > { %10824 = vmatprep.subr.mxu0 %v16604_v39  ;;  %10967 = vmatpush3.msra.mxu1 %v14629_v19  ;;  %v16607_v19 = vld [vmem:[#allocation69_spill] sm:$0xff] }
 0x55f   : > { %10738 = vmatmul.mubr.f32.gmra.mxu0 %v7034_v5  ;;  %10888 = vmatmul.mubr.f32.gmra.mxu1 %v6912_v43  ;;  %v16613_v43 = vand.u32 4294901760, %v15141_v4 }
 0x560   : > { %10825 = vmatpush3.msra.mxu0 %v16604_v39  ;;  %10968 = vmatprep.subr.mxu1 %v14642_v50 }
 0x561   : > { %10826 = vmatprep.subr.mxu0 %v16605_v51  ;;  %10828 = vmatprep.mubr.f32.mxu0 %v15019_v18  ;;  %v16610_v18 = vand.u32 4294901760, %v15122_v31 }
 0x562   : > { %10890 = vmatprep.mubr.f32.mxu1 %v6922_v7  ;;  %10969 = vmatpush3.msra.mxu1 %v14642_v50  ;;  %v16608_v50 = vld [vmem:[#allocation88_spill] sm:$0xff] }
 0x563   : > { %10827 = vmatpush3.msra.mxu0 %v16605_v51  ;;  %10970 = vmatprep.subr.mxu1 %v16569_v62  ;;  %v16619_v7 = vld [vmem:[#allocation64_spill] sm:$0xff] }
 0x564   : > { %10908 = vmatprep.subr.mxu0 %v16606_v37  ;;  %10971 = vmatpush3.msra.mxu1 %v16569_v62  ;;  %v16614_v62 = vand.u32 4294901760, %v15154_v20 }
 0x565   : > { %10829 = vmatmul.mubr.f32.vlgmr.msra.gmra.mxu0 %v15010_v29  ;;  %10891 = vmatmul.mubr.f32.gmra.mxu1 %v6932_v32  ;;  %v16609_v29 = vand.u32 4294901760, %v15090_v1  ;;  %v16617_v32 = vand.u32 4294901760, %v15170_v12 }
 0x566   : > { %10909 = vmatpush3.msra.mxu0 %v16606_v37  ;;  %10972 = vmatprep.subr.mxu1 %v16574_v54 }
 0x567   : > { %10831 = vmatprep.mubr.f32.mxu0 %v15042_v3  ;;  %10893 = vmatprep.mubr.f32.mxu1 %v6942_v41  ;;  %v16611_v3 = vld [vmem:[#allocation85_spill] sm:$0xff] }
 0x568   : > { %10910 = vmatprep.subr.mxu0 %v16607_v19  ;;  %10973 = vmatpush3.msra.mxu1 %v16574_v54  ;;  %v16618_v54 = vand.u32 4294901760, %v15179_v28  ;;  %v16623_v41 = vld [vmem:[#allocation13_spill] sm:$0xff] }
 0x569   : > { %10911 = vmatpush3.msra.mxu0 %v16607_v19  ;;  %10974 = vmatprep.subr.mxu1 %v16576_v24 }
 0x56a   : > { %10912 = vmatprep.subr.mxu0 %v16608_v50  ;;  %10975 = vmatpush3.msra.mxu1 %v16576_v24  ;;  %v16622_v24 = vand.u32 4294901760, %v15207_v57 }
 0x56b   : > { %10832 = vmatmul.mubr.f32.gmra.mxu0 %v15031_v45  ;;  %10894 = vmatmul.mubr.f32.gmra.mxu1 %v16609_v29  ;;  %v16612_v45 = vld [vmem:[#allocation3_spill] sm:$0xff] }
 0x56c   : > { %10913 = vmatpush3.msra.mxu0 %v16608_v50  ;;  %10976 = vmatprep.subr.mxu1 %v16581_v48 }
 0x56d   : > { %10834 = vmatprep.mubr.f32.mxu0 %v15073_v22  ;;  %10896 = vmatprep.mubr.f32.mxu1 %v16610_v18  ;;  %v16615_v22 = vld [vmem:[#allocation62_spill] sm:$0xff] }
 0x56e   : > { %10914 = vmatprep.subr.mxu0 %v16611_v3  ;;  %10977 = vmatpush3.msra.mxu1 %v16581_v48  ;;  %v16626_v48 = vld [vmem:[#allocation16_spill] sm:$0xff] }
 0x56f   : > { %10915 = vmatpush3.msra.mxu0 %v16611_v3  ;;  %10978 = vmatprep.subr.mxu1 %v16584_v23 }
 0x570   : > { %10916 = vmatprep.subr.mxu0 %v16612_v45  ;;  %10979 = vmatpush3.msra.mxu1 %v16584_v23  ;;  %v16627_v23 = vld [vmem:[#allocation33_spill] sm:$0xff] }
 0x571   : > { %10835 = vmatmul.mubr.f32.gmra.mxu0 %v15057_v44  ;;  %10897 = vmatmul.mubr.f32.gmra.mxu1 %v16613_v43  ;;  %v16616_v44 = vld [vmem:[#allocation54_spill] sm:$0xff] }
 0x572   : > { %10917 = vmatpush3.msra.mxu0 %v16612_v45  ;;  %10980 = vmatprep.subr.mxu1 %v16587_v21 }
 0x573   : > { %10837 = vmatprep.mubr.f32.mxu0 %v15098_v47  ;;  %10899 = vmatprep.mubr.f32.mxu1 %v16614_v62  ;;  %v16621_v47 = vand.u32 4294901760, %v15198_v52 }
 0x574   : > { %10918 = vmatprep.subr.mxu0 %v16615_v22  ;;  %10981 = vmatpush3.msra.mxu1 %v16587_v21 }
 0x575   : > { %10919 = vmatpush3.msra.mxu0 %v16615_v22  ;;  %10982 = vmatprep.subr.mxu1 %v16589_v49 }
 0x576   : > { %10920 = vmatprep.subr.mxu0 %v16616_v44  ;;  %10983 = vmatpush3.msra.mxu1 %v16589_v49 }
 0x577   : > { %10838 = vmatmul.mubr.f32.gmra.mxu0 %v15090_v1  ;;  %10900 = vmatmul.mubr.f32.gmra.mxu1 %v16617_v32  ;;  %v16620_v1 = vld [vmem:[#allocation84_spill] sm:$0xff] }
 0x578   : > { %10921 = vmatpush3.msra.mxu0 %v16616_v44  ;;  %10984 = vmatprep.subr.mxu1 %v16591_v11 }
 0x579   : > { %10840 = vmatprep.mubr.f32.mxu0 %v15122_v31  ;;  %10902 = vmatprep.mubr.f32.mxu1 %v16618_v54  ;;  %v16624_v31 = vld [vmem:[#allocation6_spill] sm:$0xff] }
 0x57a   : > { %10922 = vmatprep.subr.mxu0 %v16619_v7  ;;  %10985 = vmatpush3.msra.mxu1 %v16591_v11 }
 0x57b   : > { %10923 = vmatpush3.msra.mxu0 %v16619_v7  ;;  %10986 = vmatprep.subr.mxu1 %v16593_v6 }
 0x57c   : > { %10924 = vmatprep.subr.mxu0 %v16620_v1  ;;  %10987 = vmatpush3.msra.mxu1 %v16593_v6 }
 0x57d   : > { %10841 = vmatmul.mubr.f32.gmra.mxu0 %v15141_v4  ;;  %10903 = vmatmul.mubr.f32.gmra.mxu1 %v16621_v47  ;;  %v16628_v4 = vld [vmem:[#allocation73_spill] sm:$0xff] }
 0x57e   : > { %10925 = vmatpush3.msra.mxu0 %v16620_v1  ;;  %10988 = vmatprep.subr.mxu1 %v16595_v26 }
 0x57f   : > { %10843 = vmatprep.mubr.f32.mxu0 %v15154_v20  ;;  %10905 = vmatprep.mubr.f32.mxu1 %v16622_v24  ;;  %v16629_v20 = vld [vmem:[#allocation31_spill] sm:$0xff]  ;;  %v15491_v24 = vld [vmem:[%s15624_s5] ss:$0 sm:$0xff] }
 0x580   : > { %10926 = vmatprep.subr.mxu0 %v16623_v41  ;;  %10989 = vmatpush3.msra.mxu1 %v16595_v26 }
 0x581   : > { %10927 = vmatpush3.msra.mxu0 %v16623_v41  ;;  %10990 = vmatprep.subr.mxu1 %v16597_v42 }
 0x582   : > { %10928 = vmatprep.subr.mxu0 %v16624_v31  ;;  %10991 = vmatpush3.msra.mxu1 %v16597_v42 }
 0x583   : > { %10844 = vmatmul.mubr.f32.gmra.mxu0 %v15170_v12  ;;  %10906 = vmatmul.mubr.f32.gmra.mxu1 %v7032_v30 }
 0x584   : > { %10929 = vmatpush3.msra.mxu0 %v16624_v31  ;;  %10992 = vmatprep.subr.mxu1 %v16599_v56 }
 0x585   : > { %10846 = vmatprep.mubr.f32.mxu0 %v15179_v28  ;;  %10930 = vmatprep.subr.mxu0 %v16625_v63 }
 0x586   : > { %10993 = vmatpush3.msra.mxu1 %v16599_v56  ;;  %10996 = vmatprep.mubr.f32.mxu1 %v15012_v10 }
 0x587   : > { %10931 = vmatpush3.msra.mxu0 %v16625_v63  ;;  %10994 = vmatprep.subr.mxu1 %v16601_v58 }
 0x588   : > { %10932 = vmatprep.subr.mxu0 %v16626_v48  ;;  %10995 = vmatpush3.msra.mxu1 %v16601_v58 }
 0x589   : > { %10847 = vmatmul.mubr.f32.gmra.mxu0 %v15198_v52  ;;  %10997 = vmatmul.mubr.f32.vlgmr.msra.gmra.mxu1 %v15002_v60 }
 0x58a   : > { %10933 = vmatpush3.msra.mxu0 %v16626_v48  ;;  %10849 = vmatprep.mubr.f32.mxu0 %v15207_v57 }
 0x58b   : > { %10934 = vmatprep.subr.mxu0 %v16627_v23  ;;  %10999 = vmatprep.mubr.f32.mxu1 %v15033_v36 }
 0x58c   : > { %10935 = vmatpush3.msra.mxu0 %v16627_v23 }
 0x58d   : > { %10936 = vmatprep.subr.mxu0 %v16628_v4  ;;  %10850 = vmatmul.mubr.f32.gmra.mxu0 %v15224_v2 }
 0x58e   : > { %10937 = vmatpush3.msra.mxu0 %v16628_v4  ;;  %11000 = vmatmul.mubr.f32.gmra.mxu1 %v15021_v55 }
 0x58f   : > { %10938 = vmatprep.subr.mxu0 %v16629_v20  ;;  %10940 = vmatprep.mubr.f32.mxu0 %v15012_v10 }
 0x590   : > { %11002 = vmatprep.mubr.f32.mxu1 %v15059_v15  ;;  %10939 = vmatpush3.msra.mxu0 %v16629_v20 }
 0x591   : > { %10941 = vmatmul.mubr.f32.vlgmr.msra.gmra.mxu0 %v15002_v60 }
 0x592   : > { %11003 = vmatmul.mubr.f32.gmra.mxu1 %v15046_v40  ;;  %10943 = vmatprep.mubr.f32.mxu0 %v15033_v36 }
 0x593   : > { %11005 = vmatprep.mubr.f32.mxu1 %v15084_v9 }
 0x595   : > { %10944 = vmatmul.mubr.f32.gmra.mxu0 %v15021_v55 }
 0x596   : > { %11006 = vmatmul.mubr.f32.gmra.mxu1 %v15062_v8  ;;  %10946 = vmatprep.mubr.f32.mxu0 %v15059_v15 }
 0x597   : > { %11008 = vmatprep.mubr.f32.mxu1 %v15109_v59 }
 0x599   : > { %10947 = vmatmul.mubr.f32.gmra.mxu0 %v15046_v40 }
 0x59a   : > { %11009 = vmatmul.mubr.f32.gmra.mxu1 %v15119_v34  ;;  %10949 = vmatprep.mubr.f32.mxu0 %v15084_v9 }
 0x59b   : > { %11011 = vmatprep.mubr.f32.mxu1 %v15135_v33 }
 0x59d   : > { %10950 = vmatmul.mubr.f32.gmra.mxu0 %v15062_v8 }
 0x59e   : > { %11012 = vmatmul.mubr.f32.gmra.mxu1 %v15146_v0  ;;  %10952 = vmatprep.mubr.f32.mxu0 %v15109_v59 }
 0x59f   : > { %11014 = vmatprep.mubr.f32.mxu1 %v15160_v25 }
 0x5a1   : > { %10953 = vmatmul.mubr.f32.gmra.mxu0 %v15119_v34 }
 0x5a2   : > { %11015 = vmatmul.mubr.f32.gmra.mxu1 %v15176_v53  ;;  %10955 = vmatprep.mubr.f32.mxu0 %v15135_v33 }
 0x5a3   : > { %11017 = vmatprep.mubr.f32.mxu1 %v15188_v35 }
 0x5a5   : > { %10956 = vmatmul.mubr.f32.gmra.mxu0 %v15146_v0 }
 0x5a6   : > { %11018 = vmatmul.mubr.f32.gmra.mxu1 %v15204_v61  ;;  %10958 = vmatprep.mubr.f32.mxu0 %v15160_v25 }
 0x5a9   : > { %10959 = vmatmul.mubr.f32.gmra.mxu0 %v15176_v53 }
 0x5aa   : > { %10961 = vmatprep.mubr.f32.mxu0 %v15188_v35 }
 0x5ad   : > { %10962 = vmatmul.mubr.f32.gmra.mxu0 %v15204_v61 }
 0x5ec   : > { %v15400_v60 = vpop.f32.mrf.mxu1 }
 0x5ee   : > { %v15402_v10 = vpop.f32.mrf.mxu1 }
 0x5f0   : > { %v15404_v55 = vpop.f32.mrf.mxu1 }
 0x5f2   : > { %v15406_v36 = vpop.f32.mrf.mxu1 }
 0x5f5   : > { %v10718_v40 = vpop.f32.mrf.mxu0  ;;  %v15408_v15 = vpop.f32.mrf.mxu1 }
 0x5f6   : > { %v6897_v23 = vadd.f32 %v10718_v40, %v15491_v24 }
 0x5f7   : > { %v6886_v8 = vpop.f32.mrf.mxu0  ;;  %v15410_v9 = vpop.f32.mrf.mxu1 }
 0x5f8   : > { %v6887_v4 = vadd.f32 %v15491_v24, %v6886_v8 }
 0x5fb   : > { %v10721_v59 = vpop.f32.mrf.mxu0  ;;  %v15412_v34 = vpop.f32.mrf.mxu1 }
 0x5fd   : > { %v6906_v33 = vpop.f32.mrf.mxu0  ;;  %v15414_v0 = vpop.f32.mrf.mxu1 }
 0x601   : > { %v15416_v21 = vpop.f32.mrf.mxu0  ;;  %v15418_v25 = vpop.f32.mrf.mxu1 }
 0x602   : > { %v6937_v8 = vadd.f32 %v15416_v21, %v15491_v24 }
 0x603   : > { %v15420_v49 = vpop.f32.mrf.mxu0  ;;  %v15422_v12 = vpop.f32.mrf.mxu1 }
 0x607   : > { %v15424_v57 = vpop.f32.mrf.mxu0  ;;  %v15426_v53 = vpop.f32.mrf.mxu1 }
 0x609   : > { %v15428_v28 = vpop.f32.mrf.mxu0  ;;  %v15430_v11 = vpop.f32.mrf.mxu1 }
 0x60d   : > { %v15432_v17 = vpop.f32.mrf.mxu0  ;;  %v15434_v35 = vpop.f32.mrf.mxu1 }
 0x60f   : > { %v15436_v6 = vpop.f32.mrf.mxu0  ;;  %v15438_v52 = vpop.f32.mrf.mxu1 }
 0x610   : > { %16630 = vst [vmem:[#allocation45_spill] sm:$0xff] %v15438_v52 }
 0x613   : > { %v15440_v61 = vpop.f32.mrf.mxu0  ;;  %v15442_v26 = vpop.f32.mrf.mxu1 }
 0x614   : > { %16631 = vst [vmem:[#allocation34_spill] sm:$0xff] %v15442_v26  ;;  %v6907_v26 = vadd.f32 %v15491_v24, %v6906_v33 }
 0x615   : > { %v15444_v16 = vpop.f32.mrf.mxu0  ;;  %v15446_v42 = vpop.f32.mrf.mxu1 }
 0x616   : > { %16632 = vst [vmem:[#allocation11_spill] sm:$0xff] %v15446_v42  ;;  %v7194_v42 = vadd.f32 %v15400_v60, %v6897_v23  ;;  %v6927_v60 = vadd.f32 %v15491_v24, %v15420_v49  ;;  %v7200_v33 = vadd.f32 %v15406_v36, %v6907_v26  ;;  %v6947_v49 = vadd.f32 %v15491_v24, %v15428_v28 }
 0x617   : > { %v6977_v28 = vadd.f32 %v15432_v17, %v15491_v24 }
 0x619   : > { %v15448_v2 = vpop.f32.mrf.mxu0  ;;  %v10886_v13 = vpop.f32.mrf.mxu1 }
 0x61b   : > { %v15450_v56 = vpop.f32.mrf.mxu0  ;;  %v7575_v30 = vpop.f32.mrf.mxu1 }
 0x61f   : > { %v15452_v14 = vpop.f32.mrf.mxu0  ;;  %v15454_v38 = vpop.f32.mrf.mxu1 }
 0x621   : > { %v15456_v58 = vpop.f32.mrf.mxu0  ;;  %v15458_v46 = vpop.f32.mrf.mxu1 }
 0x625   : > { %v10830_v27 = vpop.f32.mrf.mxu0  ;;  %v15460_v5 = vpop.f32.mrf.mxu1 }
 0x627   : > { %v7381_v39 = vpop.f32.mrf.mxu0  ;;  %v15462_v51 = vpop.f32.mrf.mxu1 }
 0x62b   : > { %v10833_v37 = vpop.f32.mrf.mxu0  ;;  %v15464_v19 = vpop.f32.mrf.mxu1 }
 0x62d   : > { %v7395_v50 = vpop.f32.mrf.mxu0  ;;  %v15466_v29 = vpop.f32.mrf.mxu1 }
 0x62e   : > { %v7396_v21 = vadd.f32 %v7395_v50, %v7200_v33  ;;  %v6997_v33 = vadd.f32 %v15440_v61, %v15491_v24 }
 0x631   : > { %v10836_v18 = vpop.f32.mrf.mxu0  ;;  %v15468_v3 = vpop.f32.mrf.mxu1 }
 0x633   : > { %v7409_v45 = vpop.f32.mrf.mxu0  ;;  %v15470_v43 = vpop.f32.mrf.mxu1 }
 0x637   : > { %v15472_v62 = vpop.f32.mrf.mxu0  ;;  %v15474_v22 = vpop.f32.mrf.mxu1 }
 0x638   : > { %16633 = vst [vmem:[#allocation38_spill] sm:$0xff] %v15474_v22  ;;  %v7188_v22 = vadd.f32 %v15402_v10, %v6887_v4 }
 0x639   : > { %v15476_v44 = vpop.f32.mrf.mxu0  ;;  %v15478_v32 = vpop.f32.mrf.mxu1 }
 0x63a   : > { %16634 = vst [vmem:[#allocation20_spill] sm:$0xff] %v15478_v32 }
 0x63d   : > { %v15480_v54 = vpop.f32.mrf.mxu0  ;;  %v15482_v7 = vpop.f32.mrf.mxu1 }
 0x63e   : > { %16635 = vst [vmem:[#allocation47_spill] sm:$0xff] %v15482_v7  ;;  %v6917_v7 = vadd.f32 %v10721_v59, %v15491_v24 }
 0x63f   : > { %v15484_v1 = vpop.f32.mrf.mxu0  ;;  %v15486_v47 = vpop.f32.mrf.mxu1 }
 0x640   : > { %16636 = vst [vmem:[#allocation29_spill] sm:$0xff] %v15486_v47  ;;  %v7206_v52 = vadd.f32 %v15404_v55, %v6917_v7 }
 0x643   : > { %v15493_v41 = vpop.f32.mrf.mxu0  ;;  %v15495_v31 = vpop.f32.mrf.mxu1 }
 0x644   : > { %16637 = vst [vmem:[#allocation60_spill] sm:$0xff] %v15495_v31 }
 0x645   : > { %v15497_v63 = vpop.f32.mrf.mxu0  ;;  %v15499_v48 = vpop.f32.mrf.mxu1 }
 0x646   : > { %16638 = vst [vmem:[#allocation41_spill] sm:$0xff] %v15499_v48  ;;  %v7389_v48 = vadd.f32 %v10830_v27, %v7194_v42  ;;  %v6957_v27 = vadd.f32 %v15424_v57, %v15491_v24 }
 0x648   : > { %v7584_v10 = vadd.f32 %v10886_v13, %v7389_v48 }
 0x649   : > { %v15505_v20 = vpop.f32.mrf.mxu0  ;;  %v10998_v47 = vpop.f32.mrf.mxu1 }
 0x64a   : > { %16639 = vst [vmem:[#allocation18_spill] sm:$0xff] %v15505_v20  ;;  %v7382_v20 = vadd.f32 %v7381_v39, %v7188_v22  ;;  %v7218_v39 = vadd.f32 %v15408_v15, %v6937_v8 }
 0x64b   : > { %v15509_v32 = vpop.f32.mrf.mxu0  ;;  %v7991_v31 = vpop.f32.mrf.mxu1 }
 0x64c   : > { %16640 = vst [vmem:[#allocation44_spill] sm:$0xff] %v15509_v32  ;;  %v7403_v32 = vadd.f32 %v10833_v37, %v7206_v52  ;;  %v7576_v7 = vadd.f32 %v7575_v30, %v7382_v20  ;;  %v7212_v52 = vadd.f32 %v15410_v9, %v6927_v60  ;;  %v7417_v57 = vadd.f32 %v10836_v18, %v7218_v39 }
 0x64d   : > { %v15513_v40 = vpop.f32.mrf.mxu0  ;;  %v7230_v9 = vadd.f32 %v15412_v34, %v6957_v27  ;;  %v7592_v18 = vadd.f32 %v15458_v46, %v7396_v21  ;;  %v7242_v46 = vadd.f32 %v15418_v25, %v6977_v28  ;;  %v7027_v28 = vadd.f32 %v15491_v24, %v15456_v58 }
 0x64e   : > { %v11001_v59 = vpop.f32.mrf.mxu1  ;;  %v7600_v30 = vadd.f32 %v15454_v38, %v7403_v32  ;;  %v7410_v50 = vadd.f32 %v7409_v45, %v7212_v52  ;;  %v7224_v38 = vadd.f32 %v15414_v0, %v6947_v49  ;;  %v7007_v52 = vadd.f32 %v15491_v24, %v15450_v56 }
 0x64f   : > { %v15520_v23 = vpop.f32.mrf.mxu0  ;;  %v7431_v17 = vadd.f32 %v15472_v62, %v7230_v9  ;;  %v7445_v61 = vadd.f32 %v15480_v54, %v7242_v46 }
 0x650   : > { %v8003_v42 = vpop.f32.mrf.mxu1 }
 0x651   : > { %v10942_v4 = vpop.f32.mrf.mxu0 }
 0x652   : > { %v7821_v55 = vadd.f32 %v10942_v4, %v7584_v10  ;;  %v11004_v22 = vpop.f32.mrf.mxu1  ;;  %v6987_v4 = vadd.f32 %v15491_v24, %v15444_v16 }
 0x653   : > { %v7814_v36 = vpop.f32.mrf.mxu0 }
 0x654   : > { %v7998_v26 = vadd.f32 %v10998_v47, %v7821_v55  ;;  %v7815_v13 = vadd.f32 %v7814_v36, %v7576_v7  ;;  %v8015_v15 = vpop.f32.mrf.mxu1  ;;  %v6967_v47 = vadd.f32 %v15491_v24, %v15436_v6  ;;  %v7424_v6 = vadd.f32 %v15476_v44, %v7224_v38 }
 0x655   : > { %v10945_v37 = vpop.f32.mrf.mxu0  ;;  %v7017_v55 = vadd.f32 %v15448_v2, %v15491_v24 }
 0x656   : > { %8087 = vst.msk [vmem:[%s15532_s15 + $0x8] sm:$0xff] %vm8085_vm2, %v7998_v26  ;;  %v7992_v48 = vadd.f32 %v7991_v31, %v7815_v13  ;;  %v7833_v20 = vadd.f32 %v10945_v37, %v7600_v30  ;;  %v11007_v8 = vpop.f32.mrf.mxu1  ;;  %v7616_v31 = vadd.f32 %v15460_v5, %v7417_v57  ;;  %v7236_v5 = vadd.f32 %v15422_v12, %v6967_v47 }
 0x657   : > { %v7826_v32 = vpop.f32.mrf.mxu0  ;;  %v7648_v57 = vadd.f32 %v15468_v3, %v7445_v61  ;;  %v7037_v26 = vadd.f32 %v15452_v14, %v15491_v24  ;;  %v16641_v3 = vld [vmem:[#allocation45_spill] sm:$0xff]  ;;  %v16642_v14 = vld [vmem:[#allocation18_spill] sm:$0xff] }
 0x658   : > { %8086 = vst.msk [vmem:[%s15532_s15] sm:$0xff] %vm8085_vm2, %v7992_v48  ;;  %v8010_v34 = vadd.f32 %v11001_v59, %v7833_v20  ;;  %v7827_v45 = vadd.f32 %v7826_v32, %v7592_v18  ;;  %v8027_v60 = vpop.f32.mrf.mxu1  ;;  %v7608_v59 = vadd.f32 %v15462_v51, %v7410_v50  ;;  %v7254_v51 = vadd.f32 %v15426_v53, %v6997_v33  ;;  %v16643_v48 = vld [vmem:[#allocation38_spill] sm:$0xff] }
 0x659   : > { %v10948_v10 = vpop.f32.mrf.mxu0  ;;  %v7438_v16 = vadd.f32 %v15484_v1, %v7236_v5  ;;  %v7260_v9 = vadd.f32 %v16641_v3, %v7007_v52 }
 0x65a   : > { %8089 = vst.msk [vmem:[%s15532_s15 + $0x18] sm:$0xff] %vm8085_vm2, %v8010_v34  ;;  %v8004_v0 = vadd.f32 %v8003_v42, %v7827_v45  ;;  %v7845_v62 = vadd.f32 %v10948_v10, %v7616_v31  ;;  %v11010_v27 = vpop.f32.mrf.mxu1  ;;  %v7632_v42 = vadd.f32 %v15464_v19, %v7431_v17  ;;  %v7248_v19 = vadd.f32 %v15430_v11, %v6987_v4  ;;  %v16646_v17 = vld [vmem:[#allocation20_spill] sm:$0xff]  ;;  %v16647_v45 = vld [vmem:[#allocation11_spill] sm:$0xff] }
 0x65b   : > { %v7838_v21 = vpop.f32.mrf.mxu0  ;;  %v7459_v2 = vadd.f32 %v15493_v41, %v7254_v51  ;;  %v7640_v30 = vadd.f32 %v15470_v43, %v7438_v16  ;;  %v16645_v43 = vld [vmem:[#allocation44_spill] sm:$0xff]  ;;  %v16651_v16 = vld [vmem:[#allocation41_spill] sm:$0xff] }
 0x65c   : > { %8088 = vst.msk [vmem:[%s15532_s15 + $0x10] sm:$0xff] %vm8085_vm2, %v8004_v0  ;;  %v8022_v25 = vadd.f32 %v11004_v22, %v7845_v62  ;;  %v7839_v44 = vadd.f32 %v7838_v21, %v7608_v59  ;;  %v8039_v39 = vpop.f32.mrf.mxu1  ;;  %v7624_v22 = vadd.f32 %v15466_v29, %v7424_v6  ;;  %v7266_v29 = vadd.f32 %v15434_v35, %v7017_v55  ;;  %v16648_v6 = vld [vmem:[#allocation47_spill] sm:$0xff]  ;;  %v16649_v21 = vld [vmem:[#allocation29_spill] sm:$0xff] }
 0x65d   : > { %v10951_v7 = vpop.f32.mrf.mxu0  ;;  %v7452_v56 = vadd.f32 %v15497_v63, %v7248_v19  ;;  %v7664_v20 = vadd.f32 %v16643_v48, %v7459_v2  ;;  %v7466_v32 = vadd.f32 %v16645_v43, %v7260_v9 }
 0x65e   : > { %8091 = vst.msk [vmem:[%s15532_s15 + $0x28] sm:$0xff] %vm8085_vm2, %v8022_v25  ;;  %v8016_v12 = vadd.f32 %v8015_v15, %v7839_v44  ;;  %v7857_v54 = vadd.f32 %v10951_v7, %v7632_v42  ;;  %v11013_v49 = vpop.f32.mrf.mxu1  ;;  %v7473_v50 = vadd.f32 %v16642_v14, %v7266_v29 }
 0x65f   : > { %v7850_v36 = vpop.f32.mrf.mxu0  ;;  %v7656_v34 = vadd.f32 %v16646_v17, %v7452_v56  ;;  %v7672_v61 = vadd.f32 %v16649_v21, %v7466_v32 }
 0x660   : > { %8090 = vst.msk [vmem:[%s15532_s15 + $0x20] sm:$0xff] %vm8085_vm2, %v8016_v12  ;;  %v8034_v53 = vadd.f32 %v11007_v8, %v7857_v54  ;;  %v7851_v1 = vadd.f32 %v7850_v36, %v7624_v22  ;;  %v8051_v13 = vpop.f32.mrf.mxu1  ;;  %v16644_v8 = vld [vmem:[#allocation34_spill] sm:$0xff]  ;;  %v7680_v0 = vadd.f32 %v16648_v6, %v7473_v50 }
 0x661   : > { %v10954_v15 = vpop.f32.mrf.mxu0  ;;  %v7278_v18 = vadd.f32 %v16644_v8, %v7037_v26 }
 0x662   : > { %8093 = vst.msk [vmem:[%s15532_s15 + $0x38] sm:$0xff] %vm8085_vm2, %v8034_v53  ;;  %v8028_v11 = vadd.f32 %v8027_v60, %v7851_v1  ;;  %v7869_v41 = vadd.f32 %v10954_v15, %v7648_v57  ;;  %v11016_v47 = vpop.f32.mrf.mxu1  ;;  %v7272_v60 = vadd.f32 %v16647_v45, %v7027_v28 }
 0x663   : > { %v7862_v37 = vpop.f32.mrf.mxu0  ;;  %v7487_v33 = vadd.f32 %v15513_v40, %v7278_v18 }
 0x664   : > { %8092 = vst.msk [vmem:[%s15532_s15 + $0x30] sm:$0xff] %vm8085_vm2, %v8028_v11  ;;  %v8046_v35 = vadd.f32 %v11010_v27, %v7869_v41  ;;  %v7863_v63 = vadd.f32 %v7862_v37, %v7640_v30  ;;  %v8063_v62 = vpop.f32.mrf.mxu1  ;;  %v7480_v59 = vadd.f32 %v15520_v23, %v7272_v60 }
 0x665   : > { %v10957_v38 = vpop.f32.mrf.mxu0 }
 0x666   : > { %8095 = vst.msk [vmem:[%s15532_s15 + $0x48] sm:$0xff] %vm8085_vm2, %v8046_v35  ;;  %v8040_v58 = vadd.f32 %v8039_v39, %v7863_v63  ;;  %v7881_v24 = vadd.f32 %v10957_v38, %v7664_v20  ;;  %v16650_v39 = vld [vmem:[#allocation60_spill] sm:$0xff]  ;;  %v11019_v55 = vpop.f32.mrf.mxu1  ;;  %v7688_v12 = vadd.f32 %v16651_v16, %v7480_v59 }
 0x667   : > { %v7874_v31 = vpop.f32.mrf.mxu0  ;;  %v7696_v42 = vadd.f32 %v16650_v39, %v7487_v33 }
 0x668   : > { %8094 = vst.msk [vmem:[%s15532_s15 + $0x40] sm:$0xff] %vm8085_vm2, %v8040_v58  ;;  %v8058_v46 = vadd.f32 %v11013_v49, %v7881_v24  ;;  %v7875_v10 = vadd.f32 %v7874_v31, %v7656_v34  ;;  %v8075_v52 = vpop.f32.mrf.mxu1 }
 0x669   : > { %v10960_v27 = vpop.f32.mrf.mxu0 }
 0x66a   : > { %8097 = vst.msk [vmem:[%s15532_s15 + $0x58] sm:$0xff] %vm8085_vm2, %v8058_v46  ;;  %v8052_v4 = vadd.f32 %v8051_v13, %v7875_v10  ;;  %v7893_v5 = vadd.f32 %v10960_v27, %v7680_v0 }
 0x66b   : > { %v7886_v25 = vpop.f32.mrf.mxu0 }
 0x66c   : > { %8096 = vst.msk [vmem:[%s15532_s15 + $0x50] sm:$0xff] %vm8085_vm2, %v8052_v4  ;;  %v8070_v40 = vadd.f32 %v11016_v47, %v7893_v5  ;;  %v7887_v44 = vadd.f32 %v7886_v25, %v7672_v61 }
 0x66d   : > { %v10963_v51 = vpop.f32.mrf.mxu0 }
 0x66e   : > { %8099 = vst.msk [vmem:[%s15532_s15 + $0x68] sm:$0xff] %vm8085_vm2, %v8070_v40  ;;  %v8064_v23 = vadd.f32 %v8063_v62, %v7887_v44  ;;  %v7905_v7 = vadd.f32 %v10963_v51, %v7696_v42 }
 0x66f   : > { %v7898_v54 = vpop.f32.mrf.mxu0 }
 0x670   : > { %8098 = vst.msk [vmem:[%s15532_s15 + $0x60] sm:$0xff] %vm8085_vm2, %v8064_v23  ;;  %v8082_v49 = vadd.f32 %v11019_v55, %v7905_v7  ;;  %v7899_v22 = vadd.f32 %v7898_v54, %v7688_v12 }
 0x672   : > { %8101 = vst.msk [vmem:[%s15532_s15 + $0x78] sm:$0xff] %vm8085_vm2, %v8082_v49  ;;  %v8076_v19 = vadd.f32 %v8075_v52, %v7899_v22 }
 0x674   : > { %8100 = vst.msk [vmem:[%s15532_s15 + $0x70] sm:$0xff] %vm8085_vm2, %v8076_v19 }
 0x675 PF: > { %s16_s21 = sadd.s32 1, %s11034_s21  }
 0x676   : > { %p13_p5 = scmp.ge.s32.totalorder %s16_s21, 4  }
 0x678   :  { %15 = sbr.rel (!%p13_p5) target bundleno = 1 (0x1), region = 77 }

</bundles_post_ra>
